<compile_context>
chip_gen: v7x
topology: tpu7x:2x2x1
jax: 0.10.0
libtpu: 0.0.40
codegen_flags: <defaults>
</compile_context>

<pallas_src>
import functools
import math

import jax
import jax.numpy as jnp
from jax.experimental import pallas as pl
from jax.experimental.pallas import tpu as pltpu


# ---------------------------------------------------------------------------
# Pallas kernel: whole encoder stack, grid = (batch_tiles, num_layers)
# ---------------------------------------------------------------------------
def _layernorm(t, g, b, eps=1e-5):
    mu = jnp.mean(t, axis=-1, keepdims=True)
    var = jnp.mean((t - mu) ** 2, axis=-1, keepdims=True)
    return (t - mu) * jax.lax.rsqrt(var + eps) * g + b


def _encoder_stack_kernel(x_ref, wqkv_ref, bqkv_ref, wo_ref, bo_ref,
                          ln1g_ref, ln1b_ref, w1_ref, b1_ref,
                          w2_ref, b2_ref, ln2g_ref, ln2b_ref,
                          fng_ref, fnb_ref,
                          o_ref, ctx_ref,
                          *, BT, S, E, nhead, apply_final_norm):
    l = pl.program_id(1)                  # layer axis (sequential, "arbitrary")
    hd = E // nhead
    M = BT * S

    # First layer of this batch tile: seed the resident activation buffer
    # (the output block, which stays in VMEM across the whole layer loop).
    @pl.when(l == 0)
    def _():
        o_ref[...] = x_ref[...]

    x = o_ref[...].reshape(M, E)          # f32 resident activations
    xb = x.astype(jnp.bfloat16)

    # ---- fused QKV projection (bf16 operands -> f32 accumulation).
    #      1/sqrt(hd) is pre-folded into the Q columns of Wqkv / bqkv. ----
    qkv = jnp.dot(xb, wqkv_ref[...],
                  preferred_element_type=jnp.float32) + bqkv_ref[...]

    # ---- multi-head self-attention. Each head's context goes into its lane
    #      slice of a bf16 VMEM buffer; one full-K output projection follows.
    # TODO(synk): switch to lax.fori_loop + pl.ds slices for large nhead.
    for h in range(nhead):                                     # static, small
        qh = qkv[:, h * hd:(h + 1) * hd].reshape(BT, S, hd)
        kh = qkv[:, E + h * hd:E + (h + 1) * hd].reshape(BT, S, hd)
        vh = qkv[:, 2 * E + h * hd:2 * E + (h + 1) * hd].reshape(BT, S, hd)

        s = jnp.einsum("bqd,bkd->bqk",
                       qh.astype(jnp.bfloat16), kh.astype(jnp.bfloat16),
                       preferred_element_type=jnp.float32)     # (BT,S,S) f32
        s = s - jnp.max(s, axis=-1, keepdims=True)
        p = jnp.exp(s)                                         # f32 stats
        denom = jnp.sum(p, axis=-1, keepdims=True)
        r = pl.reciprocal(denom, approx=True)                  # EUP slot
        r = r * (2.0 - denom * r)                              # Newton -> f32 acc

        ctx = jnp.einsum("bqk,bkd->bqd",
                         p.astype(jnp.bfloat16), vh.astype(jnp.bfloat16),
                         preferred_element_type=jnp.float32)   # (BT,S,hd)
        ctx = ctx * r                                          # deferred softmax scale
        ctx_ref[:, h * hd:(h + 1) * hd] = (
            ctx.reshape(M, hd).astype(jnp.bfloat16))

    # single output projection with full contraction depth K = E
    attn = jnp.dot(ctx_ref[...], wo_ref[...],
                   preferred_element_type=jnp.float32) + bo_ref[...]

    # ---- residual + LayerNorm 1 (post-norm, f32 stats) ----
    y = _layernorm(x + attn, ln1g_ref[...], ln1b_ref[...])

    # ---- feed-forward (ReLU), bf16 MXU operands / f32 accumulation ----
    h1 = jnp.maximum(
        jnp.dot(y.astype(jnp.bfloat16), w1_ref[...],
                preferred_element_type=jnp.float32) + b1_ref[...], 0.0)
    ffn = jnp.dot(h1.astype(jnp.bfloat16), w2_ref[...],
                  preferred_element_type=jnp.float32) + b2_ref[...]

    # ---- residual + LayerNorm 2; write back to the resident output block ----
    z = _layernorm(y + ffn, ln2g_ref[...], ln2b_ref[...])
    o_ref[...] = z.reshape(BT, S, E)

    # ---- last layer: optional final LayerNorm fused (overwrites in VMEM) ----
    if apply_final_norm:
        @pl.when(l == pl.num_programs(1) - 1)
        def _():
            o_ref[...] = _layernorm(z, fng_ref[...],
                                    fnb_ref[...]).reshape(BT, S, E)


# ---------------------------------------------------------------------------
# Wrapper
# ---------------------------------------------------------------------------
def _weight_spec(shape):
    """Per-layer weight block: leading layer dim squeezed, full tile otherwise."""
    n = len(shape)
    return pl.BlockSpec((None,) + shape, lambda bt, l, n=n: (l,) + (0,) * n)


def _stack_and_fold(layer_params, nhead):
    """Stack per-layer params (leading layer axis); fold attn scale into Wq/bq;
    cast matmul weights to bf16, keep biases / LN params in f32."""
    E = layer_params[0]["wo"].shape[0]
    hd = E // nhead
    scale = 1.0 / math.sqrt(hd)
    col_scale = jnp.concatenate(
        [jnp.full((E,), scale, jnp.float32),
         jnp.ones((2 * E,), jnp.float32)])[None, :]
    mxu_weights = ("wqkv", "wo", "w1", "w2")

    def fold(p):
        p = dict(p, wqkv=p["wqkv"] * col_scale, bqkv=p["bqkv"] * col_scale)
        return {k: (v.astype(jnp.bfloat16) if k in mxu_weights
                    else v.astype(jnp.float32)) for k, v in p.items()}

    folded = [fold(p) for p in layer_params]
    return {k: jnp.stack([p[k] for p in folded], axis=0) for k in folded[0]}


def _vmem_limit_bytes():
    """Generation-aware VMEM budget: leave headroom below physical capacity."""
    try:
        cap = int(pltpu.get_tpu_info().vmem_capacity_bytes)
        return int(min(cap - 16 * 1024 * 1024, 100 * 1024 * 1024))
    except Exception:
        return 48 * 1024 * 1024          # safe everywhere (incl. v7x 64 MiB)


def mp_transformer_encoder(x, layer_params, nhead, final_norm=None,
                           *, batch_tiles=None):
    """Equivalent of MP_TransformerEncoder.forward (masks=None, eval mode)."""
    B, S, E = x.shape
    L = len(layer_params)
    F = layer_params[0]["w1"].shape[1]

    # Parallel batch-tile axis: lets v7x's 2 TensorCores split the work.
    if batch_tiles is None:
        batch_tiles = 2 if (B >= 2 and B % 2 == 0) else 1
    assert B % batch_tiles == 0
    BT = B // batch_tiles

    stacked = _stack_and_fold(layer_params, nhead)
    if final_norm is not None:
        fng = final_norm["g"].astype(jnp.float32)
        fnb = final_norm["b"].astype(jnp.float32)
    else:
        fng = jnp.ones((1, E), jnp.float32)
        fnb = jnp.zeros((1, E), jnp.float32)

    kernel = functools.partial(
        _encoder_stack_kernel, BT=BT, S=S, E=E, nhead=nhead,
        apply_final_norm=final_norm is not None)

    act_map = lambda bt, l: (bt, 0, 0)     # x / output: per batch tile, layer-invariant
    fin_map = lambda bt, l: (0, 0)

    in_specs = [
        pl.BlockSpec((BT, S, E), act_map),    # x (read only on layer 0 of each tile)
        _weight_spec((E, 3 * E)),             # wqkv   (bf16)
        _weight_spec((1, 3 * E)),             # bqkv   (f32)
        _weight_spec((E, E)),                 # wo     (bf16)
        _weight_spec((1, E)),                 # bo     (f32)
        _weight_spec((1, E)),                 # ln1 gamma
        _weight_spec((1, E)),                 # ln1 beta
        _weight_spec((E, F)),                 # ffn linear1 W (bf16)
        _weight_spec((1, F)),                 # ffn linear1 b
        _weight_spec((F, E)),                 # ffn linear2 W (bf16)
        _weight_spec((1, E)),                 # ffn linear2 b
        _weight_spec((1, E)),                 # ln2 gamma
        _weight_spec((1, E)),                 # ln2 beta
        pl.BlockSpec((1, E), fin_map),        # final-norm gamma
        pl.BlockSpec((1, E), fin_map),        # final-norm beta
    ]
    out_spec = pl.BlockSpec((BT, S, E), act_map)

    return pl.pallas_call(
        kernel,
        out_shape=jax.ShapeDtypeStruct((B, S, E), jnp.float32),
        grid=(batch_tiles, L),
        in_specs=in_specs,
        out_specs=out_spec,
        # bf16 per-head context buffer for the single full-K out-projection
        scratch_shapes=[pltpu.VMEM((BT * S, E), jnp.bfloat16)],
        compiler_params=pltpu.CompilerParams(
            dimension_semantics=("parallel", "arbitrary"),
            vmem_limit_bytes=_vmem_limit_bytes()),
    )(x, stacked["wqkv"], stacked["bqkv"], stacked["wo"], stacked["bo"],
      stacked["ln1g"], stacked["ln1b"], stacked["w1"], stacked["b1"],
      stacked["w2"], stacked["b2"], stacked["ln2g"], stacked["ln2b"],
      fng, fnb)


# ---------------------------------------------------------------------------
# Deterministic parameter construction (shapes per nn.TransformerEncoderLayer)
# ---------------------------------------------------------------------------
def make_layer_params(key, d_model, dim_ff):
    ks = jax.random.split(key, 6)
    s = 0.05
    # PyTorch stores weights as (out, in); these are pre-transposed so the
    # kernel computes x @ W (matching PyTorch's x @ W.T).
    return {
        "wqkv": s * jax.random.normal(ks[0], (d_model, 3 * d_model), jnp.float32),
        "bqkv": s * jax.random.normal(ks[1], (1, 3 * d_model), jnp.float32),
        "wo":   s * jax.random.normal(ks[2], (d_model, d_model), jnp.float32),
        "bo":   s * jax.random.normal(ks[3], (1, d_model), jnp.float32),
        "ln1g": jnp.ones((1, d_model), jnp.float32),
        "ln1b": jnp.zeros((1, d_model), jnp.float32),
        "w1":   s * jax.random.normal(ks[4], (d_model, dim_ff), jnp.float32),
        "b1":   jnp.zeros((1, dim_ff), jnp.float32),
        "w2":   s * jax.random.normal(ks[5], (dim_ff, d_model), jnp.float32),
        "b2":   jnp.zeros((1, d_model), jnp.float32),
        "ln2g": jnp.ones((1, d_model), jnp.float32),
        "ln2b": jnp.zeros((1, d_model), jnp.float32),
    }


# ---------------------------------------------------------------------------
# Pure-JAX f32 reference (for correctness check)
# ---------------------------------------------------------------------------
def _layer_ref(x, p, nhead):
    B, S, E = x.shape
    hd = E // nhead
    qkv = x @ p["wqkv"] + p["bqkv"][0]
    q, k, v = qkv[..., :E], qkv[..., E:2 * E], qkv[..., 2 * E:]

    def split(t):  # (B,S,E) -> (B,nh,S,hd)
        return t.reshape(B, S, nhead, hd).transpose(0, 2, 1, 3)

    qh, kh, vh = split(q), split(k), split(v)
    sc = jnp.einsum("bhqd,bhkd->bhqk", qh, kh) / math.sqrt(hd)
    a = jax.nn.softmax(sc, axis=-1)
    ctx = jnp.einsum("bhqk,bhkd->bhqd", a, vh).transpose(0, 2, 1, 3).reshape(B, S, E)
    attn = ctx @ p["wo"] + p["bo"][0]

    def ln(t, g, b):
        mu = jnp.mean(t, -1, keepdims=True)
        var = jnp.mean((t - mu) ** 2, -1, keepdims=True)
        return (t - mu) * jax.lax.rsqrt(var + 1e-5) * g[0] + b[0]

    y = ln(x + attn, p["ln1g"], p["ln1b"])
    f = jnp.maximum(y @ p["w1"] + p["b1"][0], 0.0) @ p["w2"] + p["b2"][0]
    return ln(y + f, p["ln2g"], p["ln2b"])


def _encoder_ref(x, layer_params, nhead, final_norm):
    out = x
    for p in layer_params:
        out = _layer_ref(out, p, nhead)
    if final_norm is not None:
        mu = jnp.mean(out, -1, keepdims=True)
        var = jnp.mean((out - mu) ** 2, -1, keepdims=True)
        out = (out - mu) * jax.lax.rsqrt(var + 1e-5) * final_norm["g"][0] + final_norm["b"][0]
    return out


# ---------------------------------------------------------------------------
if __name__ == "__main__":
    B, S, E = 2, 128, 128       # batch, seq_len, d_model (lane-dense: E % 128 == 0)
    NHEAD, FF = 4, 256          # heads, dim_feedforward
    NUM_LAYERS = 2

    root = jax.random.PRNGKey(0)
    x_key, *layer_keys = jax.random.split(root, NUM_LAYERS + 1)

    x = jax.random.normal(x_key, (B, S, E), jnp.float32)
    layer_params = [make_layer_params(k, E, FF) for k in layer_keys]
    final_norm = {"g": jnp.ones((1, E), jnp.float32),
                  "b": jnp.zeros((1, E), jnp.float32)}

    out = mp_transformer_encoder(x, layer_params, NHEAD, final_norm)
    out = jax.block_until_ready(out)

    ref = _encoder_ref(x, layer_params, NHEAD, final_norm)
    assert out.shape == (B, S, E)
    # bf16 MXU operands vs. the f32 reference: loosened tolerance (stats,
    # accumulation and LayerNorm stay f32, so the error stays small).
    assert jnp.allclose(out, ref, atol=5e-2, rtol=5e-2), "mismatch vs reference"

    print("KERNEL_OK")
</pallas_src>

<mosaic_0001>
module attributes {stable_mosaic.version = 11 : i64} {
  func.func @_encoder_stack_kernel(%arg0: i32, %arg1: i32, %arg2: memref<1x128x128xf32, #tpu.memory_space<vmem>>, %arg3: memref<1x128x384xbf16, #tpu.memory_space<vmem>>, %arg4: memref<1x1x384xf32, #tpu.memory_space<vmem>>, %arg5: memref<1x128x128xbf16, #tpu.memory_space<vmem>>, %arg6: memref<1x1x128xf32, #tpu.memory_space<vmem>>, %arg7: memref<1x1x128xf32, #tpu.memory_space<vmem>>, %arg8: memref<1x1x128xf32, #tpu.memory_space<vmem>>, %arg9: memref<1x128x256xbf16, #tpu.memory_space<vmem>>, %arg10: memref<1x1x256xf32, #tpu.memory_space<vmem>>, %arg11: memref<1x256x128xbf16, #tpu.memory_space<vmem>>, %arg12: memref<1x1x128xf32, #tpu.memory_space<vmem>>, %arg13: memref<1x1x128xf32, #tpu.memory_space<vmem>>, %arg14: memref<1x1x128xf32, #tpu.memory_space<vmem>>, %arg15: memref<1x128xf32, #tpu.memory_space<vmem>>, %arg16: memref<1x128xf32, #tpu.memory_space<vmem>>, %arg17: memref<1x128x128xf32, #tpu.memory_space<vmem>>, %arg18: memref<128x128xbf16, #tpu.memory_space<vmem>>) attributes {dimension_semantics = [#tpu.dimension_semantics<parallel>, #tpu.dimension_semantics<arbitrary>], iteration_bounds = array<i64: 2, 2>, scalar_prefetch = 0 : i64, scratch_operands = 1 : i64, tpu.core_type = #tpu.core_type<tc>, window_params = [{transform_indices = @transform_0, window_bounds = array<i64: 1, 128, 128>}, {transform_indices = @transform_1, window_bounds = array<i64: 1, 128, 384>}, {transform_indices = @transform_2, window_bounds = array<i64: 1, 1, 384>}, {transform_indices = @transform_3, window_bounds = array<i64: 1, 128, 128>}, {transform_indices = @transform_4, window_bounds = array<i64: 1, 1, 128>}, {transform_indices = @transform_5, window_bounds = array<i64: 1, 1, 128>}, {transform_indices = @transform_6, window_bounds = array<i64: 1, 1, 128>}, {transform_indices = @transform_7, window_bounds = array<i64: 1, 128, 256>}, {transform_indices = @transform_8, window_bounds = array<i64: 1, 1, 256>}, {transform_indices = @transform_9, window_bounds = array<i64: 1, 256, 128>}, {transform_indices = @transform_10, window_bounds = array<i64: 1, 1, 128>}, {transform_indices = @transform_11, window_bounds = array<i64: 1, 1, 128>}, {transform_indices = @transform_12, window_bounds = array<i64: 1, 1, 128>}, {pipeline_mode = #tpu.pipeline_mode<synchronous>, transform_indices = @transform_13, window_bounds = array<i64: 1, 128>}, {pipeline_mode = #tpu.pipeline_mode<synchronous>, transform_indices = @transform_14, window_bounds = array<i64: 1, 128>}, {transform_indices = @transform_15, window_bounds = array<i64: 1, 128, 128>}]} {
    %c0_i32 = arith.constant 0 : i32
    %0 = arith.cmpi eq, %arg1, %c0_i32 : i32
    %1 = arith.extui %0 : i1 to i32
    %c0_i32_0 = arith.constant 0 : i32
    %2 = arith.cmpi ne, %1, %c0_i32_0 : i32
    scf.if %2 {
      %c0_84 = arith.constant 0 : index
      %c0_85 = arith.constant 0 : index
      %c0_86 = arith.constant 0 : index
      %214 = vector.load %arg2[%c0_84, %c0_85, %c0_86] : memref<1x128x128xf32, #tpu.memory_space<vmem>>, vector<1x128x128xf32>
      %c0_87 = arith.constant 0 : index
      %c0_88 = arith.constant 0 : index
      %c0_89 = arith.constant 0 : index
      %215 = vector.load %arg17[%c0_87, %c0_88, %c0_89] : memref<1x128x128xf32, #tpu.memory_space<vmem>>, vector<1x128x128xf32>
      tpu.vector_store %arg17[%c0_87, %c0_88, %c0_89], %214 {strides = array<i32>} : memref<1x128x128xf32, #tpu.memory_space<vmem>>, vector<1x128x128xf32>,
    } else {
    }
    %c0 = arith.constant 0 : index
    %c0_1 = arith.constant 0 : index
    %c0_2 = arith.constant 0 : index
    %3 = vector.load %arg17[%c0, %c0_1, %c0_2] : memref<1x128x128xf32, #tpu.memory_space<vmem>>, vector<1x128x128xf32>
    %4 = vector.shape_cast %3 : vector<1x128x128xf32> to vector<128x128xf32>
    %5 = arith.truncf %4 : vector<128x128xf32> to vector<128x128xbf16>
    %c0_3 = arith.constant 0 : index
    %c0_4 = arith.constant 0 : index
    %c0_5 = arith.constant 0 : index
    %6 = vector.load %arg3[%c0_3, %c0_4, %c0_5] : memref<1x128x384xbf16, #tpu.memory_space<vmem>>, vector<1x128x384xbf16>
    %7 = vector.shape_cast %6 : vector<1x128x384xbf16> to vector<128x384xbf16>
    %cst = arith.constant dense<0.000000e+00> : vector<128x384xf32>
    %8 = tpu.matmul %5, %7, %cst {dimension_numbers = #tpu.dot_dimension_numbers<[1], [0], [0], [1], [0, 0, 1, 1], [], []>} : vector<128x128xbf16>, vector<128x384xbf16>, vector<128x384xf32> -> vector<128x384xf32>
    %c0_6 = arith.constant 0 : index
    %c0_7 = arith.constant 0 : index
    %c0_8 = arith.constant 0 : index
    %9 = vector.load %arg4[%c0_6, %c0_7, %c0_8] : memref<1x1x384xf32, #tpu.memory_space<vmem>>, vector<1x1x384xf32>
    %10 = vector.shape_cast %9 : vector<1x1x384xf32> to vector<1x384xf32>
    %11 = vector.broadcast %10 : vector<1x384xf32> to vector<128x384xf32>
    %12 = arith.addf %8, %11 : vector<128x384xf32>
    %13 = vector.extract_strided_slice %12 {offsets = [0, 0], sizes = [128, 32], strides = [1, 1]} : vector<128x384xf32> to vector<128x32xf32>
    %14 = vector.shape_cast %13 : vector<128x32xf32> to vector<1x128x32xf32>
    %15 = vector.extract_strided_slice %12 {offsets = [0, 128], sizes = [128, 32], strides = [1, 1]} : vector<128x384xf32> to vector<128x32xf32>
    %16 = vector.shape_cast %15 : vector<128x32xf32> to vector<1x128x32xf32>
    %17 = vector.extract_strided_slice %12 {offsets = [0, 256], sizes = [128, 32], strides = [1, 1]} : vector<128x384xf32> to vector<128x32xf32>
    %18 = vector.shape_cast %17 : vector<128x32xf32> to vector<1x128x32xf32>
    %19 = arith.truncf %14 : vector<1x128x32xf32> to vector<1x128x32xbf16>
    %20 = arith.truncf %16 : vector<1x128x32xf32> to vector<1x128x32xbf16>
    "tpu.trace_start"() <{level = 10 : i32, message = "bqd,bkd->bqk"}> : () -> ()
    %cst_9 = arith.constant dense<0.000000e+00> : vector<1x128x128xf32>
    %21 = tpu.matmul %19, %20, %cst_9 {dimension_numbers = #tpu.dot_dimension_numbers<[2], [2], [1], [1], [0, 0, 0, 1, 1, 1], [0], [0]>} : vector<1x128x32xbf16>, vector<1x128x32xbf16>, vector<1x128x128xf32> -> vector<1x128x128xf32>
    "tpu.trace_stop"() : () -> ()
    %cst_10 = arith.constant dense<0xFF800000> : vector<1x128xf32>
    %22 = vector.multi_reduction <maximumf>, %21, %cst_10 [2] : vector<1x128x128xf32> to vector<1x128xf32>
    %23 = vector.shape_cast %22 : vector<1x128xf32> to vector<1x128x1xf32>
    %24 = vector.broadcast %23 : vector<1x128x1xf32> to vector<1x128x128xf32>
    %25 = arith.subf %21, %24 : vector<1x128x128xf32>
    %26 = math.exp %25 : vector<1x128x128xf32>
    %cst_11 = arith.constant dense<0.000000e+00> : vector<1x128xf32>
    %27 = vector.multi_reduction <add>, %26, %cst_11 [2] : vector<1x128x128xf32> to vector<1x128xf32>
    %28 = vector.shape_cast %27 : vector<1x128xf32> to vector<1x128x1xf32>
    %29 = tpu.reciprocal %28 {approx = true} : vector<1x128x1xf32> -> vector<1x128x1xf32>
    %30 = arith.mulf %28, %29 : vector<1x128x1xf32>
    %cst_12 = arith.constant 2.000000e+00 : f32
    %31 = vector.broadcast %cst_12 : f32 to vector<1x128x1xf32>
    %32 = arith.subf %31, %30 : vector<1x128x1xf32>
    %33 = arith.mulf %29, %32 : vector<1x128x1xf32>
    %34 = arith.truncf %26 : vector<1x128x128xf32> to vector<1x128x128xbf16>
    %35 = arith.truncf %18 : vector<1x128x32xf32> to vector<1x128x32xbf16>
    "tpu.trace_start"() <{level = 10 : i32, message = "bqk,bkd->bqd"}> : () -> ()
    %cst_13 = arith.constant dense<0.000000e+00> : vector<1x128x32xf32>
    %36 = tpu.matmul %34, %35, %cst_13 {dimension_numbers = #tpu.dot_dimension_numbers<[2], [1], [1], [2], [0, 0, 0, 1, 1, 2], [0], [0]>} : vector<1x128x128xbf16>, vector<1x128x32xbf16>, vector<1x128x32xf32> -> vector<1x128x32xf32>
    "tpu.trace_stop"() : () -> ()
    %37 = vector.broadcast %33 : vector<1x128x1xf32> to vector<1x128x32xf32>
    %38 = arith.mulf %36, %37 : vector<1x128x32xf32>
    %39 = vector.shape_cast %38 : vector<1x128x32xf32> to vector<128x32xf32>
    %40 = arith.truncf %39 : vector<128x32xf32> to vector<128x32xbf16>
    %c0_14 = arith.constant 0 : index
    %c0_15 = arith.constant 0 : index
    %41 = vector.load %arg18[%c0_14, %c0_15] : memref<128x128xbf16, #tpu.memory_space<vmem>>, vector<128x32xbf16>
    tpu.vector_store %arg18[%c0_14, %c0_15], %40 {strides = array<i32>} : memref<128x128xbf16, #tpu.memory_space<vmem>>, vector<128x32xbf16>,
    %42 = vector.extract_strided_slice %12 {offsets = [0, 32], sizes = [128, 32], strides = [1, 1]} : vector<128x384xf32> to vector<128x32xf32>
    %43 = vector.shape_cast %42 : vector<128x32xf32> to vector<1x128x32xf32>
    %44 = vector.extract_strided_slice %12 {offsets = [0, 160], sizes = [128, 32], strides = [1, 1]} : vector<128x384xf32> to vector<128x32xf32>
    %45 = vector.shape_cast %44 : vector<128x32xf32> to vector<1x128x32xf32>
    %46 = vector.extract_strided_slice %12 {offsets = [0, 288], sizes = [128, 32], strides = [1, 1]} : vector<128x384xf32> to vector<128x32xf32>
    %47 = vector.shape_cast %46 : vector<128x32xf32> to vector<1x128x32xf32>
    %48 = arith.truncf %43 : vector<1x128x32xf32> to vector<1x128x32xbf16>
    %49 = arith.truncf %45 : vector<1x128x32xf32> to vector<1x128x32xbf16>
    "tpu.trace_start"() <{level = 10 : i32, message = "bqd,bkd->bqk"}> : () -> ()
    %cst_16 = arith.constant dense<0.000000e+00> : vector<1x128x128xf32>
    %50 = tpu.matmul %48, %49, %cst_16 {dimension_numbers = #tpu.dot_dimension_numbers<[2], [2], [1], [1], [0, 0, 0, 1, 1, 1], [0], [0]>} : vector<1x128x32xbf16>, vector<1x128x32xbf16>, vector<1x128x128xf32> -> vector<1x128x128xf32>
    "tpu.trace_stop"() : () -> ()
    %cst_17 = arith.constant dense<0xFF800000> : vector<1x128xf32>
    %51 = vector.multi_reduction <maximumf>, %50, %cst_17 [2] : vector<1x128x128xf32> to vector<1x128xf32>
    %52 = vector.shape_cast %51 : vector<1x128xf32> to vector<1x128x1xf32>
    %53 = vector.broadcast %52 : vector<1x128x1xf32> to vector<1x128x128xf32>
    %54 = arith.subf %50, %53 : vector<1x128x128xf32>
    %55 = math.exp %54 : vector<1x128x128xf32>
    %cst_18 = arith.constant dense<0.000000e+00> : vector<1x128xf32>
    %56 = vector.multi_reduction <add>, %55, %cst_18 [2] : vector<1x128x128xf32> to vector<1x128xf32>
    %57 = vector.shape_cast %56 : vector<1x128xf32> to vector<1x128x1xf32>
    %58 = tpu.reciprocal %57 {approx = true} : vector<1x128x1xf32> -> vector<1x128x1xf32>
    %59 = arith.mulf %57, %58 : vector<1x128x1xf32>
    %cst_19 = arith.constant 2.000000e+00 : f32
    %60 = vector.broadcast %cst_19 : f32 to vector<1x128x1xf32>
    %61 = arith.subf %60, %59 : vector<1x128x1xf32>
    %62 = arith.mulf %58, %61 : vector<1x128x1xf32>
    %63 = arith.truncf %55 : vector<1x128x128xf32> to vector<1x128x128xbf16>
    %64 = arith.truncf %47 : vector<1x128x32xf32> to vector<1x128x32xbf16>
    "tpu.trace_start"() <{level = 10 : i32, message = "bqk,bkd->bqd"}> : () -> ()
    %cst_20 = arith.constant dense<0.000000e+00> : vector<1x128x32xf32>
    %65 = tpu.matmul %63, %64, %cst_20 {dimension_numbers = #tpu.dot_dimension_numbers<[2], [1], [1], [2], [0, 0, 0, 1, 1, 2], [0], [0]>} : vector<1x128x128xbf16>, vector<1x128x32xbf16>, vector<1x128x32xf32> -> vector<1x128x32xf32>
    "tpu.trace_stop"() : () -> ()
    %66 = vector.broadcast %62 : vector<1x128x1xf32> to vector<1x128x32xf32>
    %67 = arith.mulf %65, %66 : vector<1x128x32xf32>
    %68 = vector.shape_cast %67 : vector<1x128x32xf32> to vector<128x32xf32>
    %69 = arith.truncf %68 : vector<128x32xf32> to vector<128x32xbf16>
    %c0_21 = arith.constant 0 : index
    %c32 = arith.constant 32 : index
    %70 = vector.load %arg18[%c0_21, %c32] : memref<128x128xbf16, #tpu.memory_space<vmem>>, vector<128x32xbf16>
    tpu.vector_store %arg18[%c0_21, %c32], %69 {strides = array<i32>} : memref<128x128xbf16, #tpu.memory_space<vmem>>, vector<128x32xbf16>,
    %71 = vector.extract_strided_slice %12 {offsets = [0, 64], sizes = [128, 32], strides = [1, 1]} : vector<128x384xf32> to vector<128x32xf32>
    %72 = vector.shape_cast %71 : vector<128x32xf32> to vector<1x128x32xf32>
    %73 = vector.extract_strided_slice %12 {offsets = [0, 192], sizes = [128, 32], strides = [1, 1]} : vector<128x384xf32> to vector<128x32xf32>
    %74 = vector.shape_cast %73 : vector<128x32xf32> to vector<1x128x32xf32>
    %75 = vector.extract_strided_slice %12 {offsets = [0, 320], sizes = [128, 32], strides = [1, 1]} : vector<128x384xf32> to vector<128x32xf32>
    %76 = vector.shape_cast %75 : vector<128x32xf32> to vector<1x128x32xf32>
    %77 = arith.truncf %72 : vector<1x128x32xf32> to vector<1x128x32xbf16>
    %78 = arith.truncf %74 : vector<1x128x32xf32> to vector<1x128x32xbf16>
    "tpu.trace_start"() <{level = 10 : i32, message = "bqd,bkd->bqk"}> : () -> ()
    %cst_22 = arith.constant dense<0.000000e+00> : vector<1x128x128xf32>
    %79 = tpu.matmul %77, %78, %cst_22 {dimension_numbers = #tpu.dot_dimension_numbers<[2], [2], [1], [1], [0, 0, 0, 1, 1, 1], [0], [0]>} : vector<1x128x32xbf16>, vector<1x128x32xbf16>, vector<1x128x128xf32> -> vector<1x128x128xf32>
    "tpu.trace_stop"() : () -> ()
    %cst_23 = arith.constant dense<0xFF800000> : vector<1x128xf32>
    %80 = vector.multi_reduction <maximumf>, %79, %cst_23 [2] : vector<1x128x128xf32> to vector<1x128xf32>
    %81 = vector.shape_cast %80 : vector<1x128xf32> to vector<1x128x1xf32>
    %82 = vector.broadcast %81 : vector<1x128x1xf32> to vector<1x128x128xf32>
    %83 = arith.subf %79, %82 : vector<1x128x128xf32>
    %84 = math.exp %83 : vector<1x128x128xf32>
    %cst_24 = arith.constant dense<0.000000e+00> : vector<1x128xf32>
    %85 = vector.multi_reduction <add>, %84, %cst_24 [2] : vector<1x128x128xf32> to vector<1x128xf32>
    %86 = vector.shape_cast %85 : vector<1x128xf32> to vector<1x128x1xf32>
    %87 = tpu.reciprocal %86 {approx = true} : vector<1x128x1xf32> -> vector<1x128x1xf32>
    %88 = arith.mulf %86, %87 : vector<1x128x1xf32>
    %cst_25 = arith.constant 2.000000e+00 : f32
    %89 = vector.broadcast %cst_25 : f32 to vector<1x128x1xf32>
    %90 = arith.subf %89, %88 : vector<1x128x1xf32>
    %91 = arith.mulf %87, %90 : vector<1x128x1xf32>
    %92 = arith.truncf %84 : vector<1x128x128xf32> to vector<1x128x128xbf16>
    %93 = arith.truncf %76 : vector<1x128x32xf32> to vector<1x128x32xbf16>
    "tpu.trace_start"() <{level = 10 : i32, message = "bqk,bkd->bqd"}> : () -> ()
    %cst_26 = arith.constant dense<0.000000e+00> : vector<1x128x32xf32>
    %94 = tpu.matmul %92, %93, %cst_26 {dimension_numbers = #tpu.dot_dimension_numbers<[2], [1], [1], [2], [0, 0, 0, 1, 1, 2], [0], [0]>} : vector<1x128x128xbf16>, vector<1x128x32xbf16>, vector<1x128x32xf32> -> vector<1x128x32xf32>
    "tpu.trace_stop"() : () -> ()
    %95 = vector.broadcast %91 : vector<1x128x1xf32> to vector<1x128x32xf32>
    %96 = arith.mulf %94, %95 : vector<1x128x32xf32>
    %97 = vector.shape_cast %96 : vector<1x128x32xf32> to vector<128x32xf32>
    %98 = arith.truncf %97 : vector<128x32xf32> to vector<128x32xbf16>
    %c0_27 = arith.constant 0 : index
    %c64 = arith.constant 64 : index
    %99 = vector.load %arg18[%c0_27, %c64] : memref<128x128xbf16, #tpu.memory_space<vmem>>, vector<128x32xbf16>
    tpu.vector_store %arg18[%c0_27, %c64], %98 {strides = array<i32>} : memref<128x128xbf16, #tpu.memory_space<vmem>>, vector<128x32xbf16>,
    %100 = vector.extract_strided_slice %12 {offsets = [0, 96], sizes = [128, 32], strides = [1, 1]} : vector<128x384xf32> to vector<128x32xf32>
    %101 = vector.shape_cast %100 : vector<128x32xf32> to vector<1x128x32xf32>
    %102 = vector.extract_strided_slice %12 {offsets = [0, 224], sizes = [128, 32], strides = [1, 1]} : vector<128x384xf32> to vector<128x32xf32>
    %103 = vector.shape_cast %102 : vector<128x32xf32> to vector<1x128x32xf32>
    %104 = vector.extract_strided_slice %12 {offsets = [0, 352], sizes = [128, 32], strides = [1, 1]} : vector<128x384xf32> to vector<128x32xf32>
    %105 = vector.shape_cast %104 : vector<128x32xf32> to vector<1x128x32xf32>
    %106 = arith.truncf %101 : vector<1x128x32xf32> to vector<1x128x32xbf16>
    %107 = arith.truncf %103 : vector<1x128x32xf32> to vector<1x128x32xbf16>
    "tpu.trace_start"() <{level = 10 : i32, message = "bqd,bkd->bqk"}> : () -> ()
    %cst_28 = arith.constant dense<0.000000e+00> : vector<1x128x128xf32>
    %108 = tpu.matmul %106, %107, %cst_28 {dimension_numbers = #tpu.dot_dimension_numbers<[2], [2], [1], [1], [0, 0, 0, 1, 1, 1], [0], [0]>} : vector<1x128x32xbf16>, vector<1x128x32xbf16>, vector<1x128x128xf32> -> vector<1x128x128xf32>
    "tpu.trace_stop"() : () -> ()
    %cst_29 = arith.constant dense<0xFF800000> : vector<1x128xf32>
    %109 = vector.multi_reduction <maximumf>, %108, %cst_29 [2] : vector<1x128x128xf32> to vector<1x128xf32>
    %110 = vector.shape_cast %109 : vector<1x128xf32> to vector<1x128x1xf32>
    %111 = vector.broadcast %110 : vector<1x128x1xf32> to vector<1x128x128xf32>
    %112 = arith.subf %108, %111 : vector<1x128x128xf32>
    %113 = math.exp %112 : vector<1x128x128xf32>
    %cst_30 = arith.constant dense<0.000000e+00> : vector<1x128xf32>
    %114 = vector.multi_reduction <add>, %113, %cst_30 [2] : vector<1x128x128xf32> to vector<1x128xf32>
    %115 = vector.shape_cast %114 : vector<1x128xf32> to vector<1x128x1xf32>
    %116 = tpu.reciprocal %115 {approx = true} : vector<1x128x1xf32> -> vector<1x128x1xf32>
    %117 = arith.mulf %115, %116 : vector<1x128x1xf32>
    %cst_31 = arith.constant 2.000000e+00 : f32
    %118 = vector.broadcast %cst_31 : f32 to vector<1x128x1xf32>
    %119 = arith.subf %118, %117 : vector<1x128x1xf32>
    %120 = arith.mulf %116, %119 : vector<1x128x1xf32>
    %121 = arith.truncf %113 : vector<1x128x128xf32> to vector<1x128x128xbf16>
    %122 = arith.truncf %105 : vector<1x128x32xf32> to vector<1x128x32xbf16>
    "tpu.trace_start"() <{level = 10 : i32, message = "bqk,bkd->bqd"}> : () -> ()
    %cst_32 = arith.constant dense<0.000000e+00> : vector<1x128x32xf32>
    %123 = tpu.matmul %121, %122, %cst_32 {dimension_numbers = #tpu.dot_dimension_numbers<[2], [1], [1], [2], [0, 0, 0, 1, 1, 2], [0], [0]>} : vector<1x128x128xbf16>, vector<1x128x32xbf16>, vector<1x128x32xf32> -> vector<1x128x32xf32>
    "tpu.trace_stop"() : () -> ()
    %124 = vector.broadcast %120 : vector<1x128x1xf32> to vector<1x128x32xf32>
    %125 = arith.mulf %123, %124 : vector<1x128x32xf32>
    %126 = vector.shape_cast %125 : vector<1x128x32xf32> to vector<128x32xf32>
    %127 = arith.truncf %126 : vector<128x32xf32> to vector<128x32xbf16>
    %c0_33 = arith.constant 0 : index
    %c96 = arith.constant 96 : index
    %128 = vector.load %arg18[%c0_33, %c96] : memref<128x128xbf16, #tpu.memory_space<vmem>>, vector<128x32xbf16>
    tpu.vector_store %arg18[%c0_33, %c96], %127 {strides = array<i32>} : memref<128x128xbf16, #tpu.memory_space<vmem>>, vector<128x32xbf16>,
    %c0_34 = arith.constant 0 : index
    %c0_35 = arith.constant 0 : index
    %129 = vector.load %arg18[%c0_34, %c0_35] : memref<128x128xbf16, #tpu.memory_space<vmem>>, vector<128x128xbf16>
    %c0_36 = arith.constant 0 : index
    %c0_37 = arith.constant 0 : index
    %c0_38 = arith.constant 0 : index
    %130 = vector.load %arg5[%c0_36, %c0_37, %c0_38] : memref<1x128x128xbf16, #tpu.memory_space<vmem>>, vector<1x128x128xbf16>
    %131 = vector.shape_cast %130 : vector<1x128x128xbf16> to vector<128x128xbf16>
    %cst_39 = arith.constant dense<0.000000e+00> : vector<128x128xf32>
    %132 = tpu.matmul %129, %131, %cst_39 {dimension_numbers = #tpu.dot_dimension_numbers<[1], [0], [0], [1], [0, 0, 1, 1], [], []>} : vector<128x128xbf16>, vector<128x128xbf16>, vector<128x128xf32> -> vector<128x128xf32>
    %c0_40 = arith.constant 0 : index
    %c0_41 = arith.constant 0 : index
    %c0_42 = arith.constant 0 : index
    %133 = vector.load %arg6[%c0_40, %c0_41, %c0_42] : memref<1x1x128xf32, #tpu.memory_space<vmem>>, vector<1x1x128xf32>
    %134 = vector.shape_cast %133 : vector<1x1x128xf32> to vector<1x128xf32>
    %135 = vector.broadcast %134 : vector<1x128xf32> to vector<128x128xf32>
    %136 = arith.addf %132, %135 : vector<128x128xf32>
    %137 = arith.addf %4, %136 : vector<128x128xf32>
    %c0_43 = arith.constant 0 : index
    %c0_44 = arith.constant 0 : index
    %c0_45 = arith.constant 0 : index
    %138 = vector.load %arg7[%c0_43, %c0_44, %c0_45] : memref<1x1x128xf32, #tpu.memory_space<vmem>>, vector<1x1x128xf32>
    %139 = vector.shape_cast %138 : vector<1x1x128xf32> to vector<1x128xf32>
    %c0_46 = arith.constant 0 : index
    %c0_47 = arith.constant 0 : index
    %c0_48 = arith.constant 0 : index
    %140 = vector.load %arg8[%c0_46, %c0_47, %c0_48] : memref<1x1x128xf32, #tpu.memory_space<vmem>>, vector<1x1x128xf32>
    %141 = vector.shape_cast %140 : vector<1x1x128xf32> to vector<1x128xf32>
    %cst_49 = arith.constant dense<0.000000e+00> : vector<128xf32>
    %142 = vector.multi_reduction <add>, %137, %cst_49 [1] : vector<128x128xf32> to vector<128xf32>
    %143 = vector.shape_cast %142 : vector<128xf32> to vector<128x1xf32>
    %cst_50 = arith.constant 1.280000e+02 : f32
    %144 = vector.broadcast %cst_50 : f32 to vector<128x1xf32>
    %145 = arith.divf %143, %144 : vector<128x1xf32>
    %146 = vector.broadcast %145 : vector<128x1xf32> to vector<128x128xf32>
    %147 = arith.subf %137, %146 : vector<128x128xf32>
    %148 = arith.mulf %147, %147 : vector<128x128xf32>
    %cst_51 = arith.constant dense<0.000000e+00> : vector<128xf32>
    %149 = vector.multi_reduction <add>, %148, %cst_51 [1] : vector<128x128xf32> to vector<128xf32>
    %150 = vector.shape_cast %149 : vector<128xf32> to vector<128x1xf32>
    %cst_52 = arith.constant 1.280000e+02 : f32
    %151 = vector.broadcast %cst_52 : f32 to vector<128x1xf32>
    %152 = arith.divf %150, %151 : vector<128x1xf32>
    %153 = vector.broadcast %145 : vector<128x1xf32> to vector<128x128xf32>
    %154 = arith.subf %137, %153 : vector<128x128xf32>
    %cst_53 = arith.constant 9.99999974E-6 : f32
    %155 = vector.broadcast %cst_53 : f32 to vector<128x1xf32>
    %156 = arith.addf %152, %155 : vector<128x1xf32>
    %157 = math.rsqrt %156 : vector<128x1xf32>
    %158 = vector.broadcast %157 : vector<128x1xf32> to vector<128x128xf32>
    %159 = arith.mulf %154, %158 : vector<128x128xf32>
    %160 = vector.broadcast %139 : vector<1x128xf32> to vector<128x128xf32>
    %161 = arith.mulf %159, %160 : vector<128x128xf32>
    %162 = vector.broadcast %141 : vector<1x128xf32> to vector<128x128xf32>
    %163 = arith.addf %161, %162 : vector<128x128xf32>
    %164 = arith.truncf %163 : vector<128x128xf32> to vector<128x128xbf16>
    %c0_54 = arith.constant 0 : index
    %c0_55 = arith.constant 0 : index
    %c0_56 = arith.constant 0 : index
    %165 = vector.load %arg9[%c0_54, %c0_55, %c0_56] : memref<1x128x256xbf16, #tpu.memory_space<vmem>>, vector<1x128x256xbf16>
    %166 = vector.shape_cast %165 : vector<1x128x256xbf16> to vector<128x256xbf16>
    %cst_57 = arith.constant dense<0.000000e+00> : vector<128x256xf32>
    %167 = tpu.matmul %164, %166, %cst_57 {dimension_numbers = #tpu.dot_dimension_numbers<[1], [0], [0], [1], [0, 0, 1, 1], [], []>} : vector<128x128xbf16>, vector<128x256xbf16>, vector<128x256xf32> -> vector<128x256xf32>
    %c0_58 = arith.constant 0 : index
    %c0_59 = arith.constant 0 : index
    %c0_60 = arith.constant 0 : index
    %168 = vector.load %arg10[%c0_58, %c0_59, %c0_60] : memref<1x1x256xf32, #tpu.memory_space<vmem>>, vector<1x1x256xf32>
    %169 = vector.shape_cast %168 : vector<1x1x256xf32> to vector<1x256xf32>
    %170 = vector.broadcast %169 : vector<1x256xf32> to vector<128x256xf32>
    %171 = arith.addf %167, %170 : vector<128x256xf32>
    %cst_61 = arith.constant 0.000000e+00 : f32
    %172 = vector.broadcast %cst_61 : f32 to vector<128x256xf32>
    %173 = arith.maximumf %171, %172 : vector<128x256xf32>
    %174 = arith.truncf %173 : vector<128x256xf32> to vector<128x256xbf16>
    %c0_62 = arith.constant 0 : index
    %c0_63 = arith.constant 0 : index
    %c0_64 = arith.constant 0 : index
    %175 = vector.load %arg11[%c0_62, %c0_63, %c0_64] : memref<1x256x128xbf16, #tpu.memory_space<vmem>>, vector<1x256x128xbf16>
    %176 = vector.shape_cast %175 : vector<1x256x128xbf16> to vector<256x128xbf16>
    %cst_65 = arith.constant dense<0.000000e+00> : vector<128x128xf32>
    %177 = tpu.matmul %174, %176, %cst_65 {dimension_numbers = #tpu.dot_dimension_numbers<[1], [0], [0], [1], [0, 0, 1, 1], [], []>} : vector<128x256xbf16>, vector<256x128xbf16>, vector<128x128xf32> -> vector<128x128xf32>
    %c0_66 = arith.constant 0 : index
    %c0_67 = arith.constant 0 : index
    %c0_68 = arith.constant 0 : index
    %178 = vector.load %arg12[%c0_66, %c0_67, %c0_68] : memref<1x1x128xf32, #tpu.memory_space<vmem>>, vector<1x1x128xf32>
    %179 = vector.shape_cast %178 : vector<1x1x128xf32> to vector<1x128xf32>
    %180 = vector.broadcast %179 : vector<1x128xf32> to vector<128x128xf32>
    %181 = arith.addf %177, %180 : vector<128x128xf32>
    %182 = arith.addf %163, %181 : vector<128x128xf32>
    %c0_69 = arith.constant 0 : index
    %c0_70 = arith.constant 0 : index
    %c0_71 = arith.constant 0 : index
    %183 = vector.load %arg13[%c0_69, %c0_70, %c0_71] : memref<1x1x128xf32, #tpu.memory_space<vmem>>, vector<1x1x128xf32>
    %184 = vector.shape_cast %183 : vector<1x1x128xf32> to vector<1x128xf32>
    %c0_72 = arith.constant 0 : index
    %c0_73 = arith.constant 0 : index
    %c0_74 = arith.constant 0 : index
    %185 = vector.load %arg14[%c0_72, %c0_73, %c0_74] : memref<1x1x128xf32, #tpu.memory_space<vmem>>, vector<1x1x128xf32>
    %186 = vector.shape_cast %185 : vector<1x1x128xf32> to vector<1x128xf32>
    %cst_75 = arith.constant dense<0.000000e+00> : vector<128xf32>
    %187 = vector.multi_reduction <add>, %182, %cst_75 [1] : vector<128x128xf32> to vector<128xf32>
    %188 = vector.shape_cast %187 : vector<128xf32> to vector<128x1xf32>
    %cst_76 = arith.constant 1.280000e+02 : f32
    %189 = vector.broadcast %cst_76 : f32 to vector<128x1xf32>
    %190 = arith.divf %188, %189 : vector<128x1xf32>
    %191 = vector.broadcast %190 : vector<128x1xf32> to vector<128x128xf32>
    %192 = arith.subf %182, %191 : vector<128x128xf32>
    %193 = arith.mulf %192, %192 : vector<128x128xf32>
    %cst_77 = arith.constant dense<0.000000e+00> : vector<128xf32>
    %194 = vector.multi_reduction <add>, %193, %cst_77 [1] : vector<128x128xf32> to vector<128xf32>
    %195 = vector.shape_cast %194 : vector<128xf32> to vector<128x1xf32>
    %cst_78 = arith.constant 1.280000e+02 : f32
    %196 = vector.broadcast %cst_78 : f32 to vector<128x1xf32>
    %197 = arith.divf %195, %196 : vector<128x1xf32>
    %198 = vector.broadcast %190 : vector<128x1xf32> to vector<128x128xf32>
    %199 = arith.subf %182, %198 : vector<128x128xf32>
    %cst_79 = arith.constant 9.99999974E-6 : f32
    %200 = vector.broadcast %cst_79 : f32 to vector<128x1xf32>
    %201 = arith.addf %197, %200 : vector<128x1xf32>
    %202 = math.rsqrt %201 : vector<128x1xf32>
    %203 = vector.broadcast %202 : vector<128x1xf32> to vector<128x128xf32>
    %204 = arith.mulf %199, %203 : vector<128x128xf32>
    %205 = vector.broadcast %184 : vector<1x128xf32> to vector<128x128xf32>
    %206 = arith.mulf %204, %205 : vector<128x128xf32>
    %207 = vector.broadcast %186 : vector<1x128xf32> to vector<128x128xf32>
    %208 = arith.addf %206, %207 : vector<128x128xf32>
    %209 = vector.shape_cast %208 : vector<128x128xf32> to vector<1x128x128xf32>
    %c0_80 = arith.constant 0 : index
    %c0_81 = arith.constant 0 : index
    %c0_82 = arith.constant 0 : index
    %210 = vector.load %arg17[%c0_80, %c0_81, %c0_82] : memref<1x128x128xf32, #tpu.memory_space<vmem>>, vector<1x128x128xf32>
    tpu.vector_store %arg17[%c0_80, %c0_81, %c0_82], %209 {strides = array<i32>} : memref<1x128x128xf32, #tpu.memory_space<vmem>>, vector<1x128x128xf32>,
    %c1_i32 = arith.constant 1 : i32
    %211 = arith.cmpi eq, %arg1, %c1_i32 : i32
    %212 = arith.extui %211 : i1 to i32
    %c0_i32_83 = arith.constant 0 : i32
    %213 = arith.cmpi ne, %212, %c0_i32_83 : i32
    scf.if %213 {
      %c0_84 = arith.constant 0 : index
      %c0_85 = arith.constant 0 : index
      %214 = vector.load %arg15[%c0_84, %c0_85] : memref<1x128xf32, #tpu.memory_space<vmem>>, vector<1x128xf32>
      %c0_86 = arith.constant 0 : index
      %c0_87 = arith.constant 0 : index
      %215 = vector.load %arg16[%c0_86, %c0_87] : memref<1x128xf32, #tpu.memory_space<vmem>>, vector<1x128xf32>
      %cst_88 = arith.constant dense<0.000000e+00> : vector<128xf32>
      %216 = vector.multi_reduction <add>, %208, %cst_88 [1] : vector<128x128xf32> to vector<128xf32>
      %217 = vector.shape_cast %216 : vector<128xf32> to vector<128x1xf32>
      %cst_89 = arith.constant 1.280000e+02 : f32
      %218 = vector.broadcast %cst_89 : f32 to vector<128x1xf32>
      %219 = arith.divf %217, %218 : vector<128x1xf32>
      %220 = vector.broadcast %219 : vector<128x1xf32> to vector<128x128xf32>
      %221 = arith.subf %208, %220 : vector<128x128xf32>
      %222 = arith.mulf %221, %221 : vector<128x128xf32>
      %cst_90 = arith.constant dense<0.000000e+00> : vector<128xf32>
      %223 = vector.multi_reduction <add>, %222, %cst_90 [1] : vector<128x128xf32> to vector<128xf32>
      %224 = vector.shape_cast %223 : vector<128xf32> to vector<128x1xf32>
      %cst_91 = arith.constant 1.280000e+02 : f32
      %225 = vector.broadcast %cst_91 : f32 to vector<128x1xf32>
      %226 = arith.divf %224, %225 : vector<128x1xf32>
      %227 = vector.broadcast %219 : vector<128x1xf32> to vector<128x128xf32>
      %228 = arith.subf %208, %227 : vector<128x128xf32>
      %cst_92 = arith.constant 9.99999974E-6 : f32
      %229 = vector.broadcast %cst_92 : f32 to vector<128x1xf32>
      %230 = arith.addf %226, %229 : vector<128x1xf32>
      %231 = math.rsqrt %230 : vector<128x1xf32>
      %232 = vector.broadcast %231 : vector<128x1xf32> to vector<128x128xf32>
      %233 = arith.mulf %228, %232 : vector<128x128xf32>
      %234 = vector.broadcast %214 : vector<1x128xf32> to vector<128x128xf32>
      %235 = arith.mulf %233, %234 : vector<128x128xf32>
      %236 = vector.broadcast %215 : vector<1x128xf32> to vector<128x128xf32>
      %237 = arith.addf %235, %236 : vector<128x128xf32>
      %238 = vector.shape_cast %237 : vector<128x128xf32> to vector<1x128x128xf32>
      %c0_93 = arith.constant 0 : index
      %c0_94 = arith.constant 0 : index
      %c0_95 = arith.constant 0 : index
      %239 = vector.load %arg17[%c0_93, %c0_94, %c0_95] : memref<1x128x128xf32, #tpu.memory_space<vmem>>, vector<1x128x128xf32>
      tpu.vector_store %arg17[%c0_93, %c0_94, %c0_95], %238 {strides = array<i32>} : memref<1x128x128xf32, #tpu.memory_space<vmem>>, vector<1x128x128xf32>,
    } else {
    }
    return
  }
  func.func @transform_0(%arg0: i32, %arg1: i32) -> (i32, i32, i32) {
    %c0_i32 = arith.constant 0 : i32
    %c0_i32_0 = arith.constant 0 : i32
    %c0_i32_1 = arith.constant 0 : i32
    return %arg0, %c0_i32, %c0_i32_0 : i32, i32, i32
  }
  func.func @transform_1(%arg0: i32, %arg1: i32) -> (i32, i32, i32) {
    %c0_i32 = arith.constant 0 : i32
    %c0_i32_0 = arith.constant 0 : i32
    %c0_i32_1 = arith.constant 0 : i32
    return %arg1, %c0_i32, %c0_i32_0 : i32, i32, i32
  }
  func.func @transform_2(%arg0: i32, %arg1: i32) -> (i32, i32, i32) {
    %c0_i32 = arith.constant 0 : i32
    %c0_i32_0 = arith.constant 0 : i32
    %c0_i32_1 = arith.constant 0 : i32
    return %arg1, %c0_i32, %c0_i32_0 : i32, i32, i32
  }
  func.func @transform_3(%arg0: i32, %arg1: i32) -> (i32, i32, i32) {
    %c0_i32 = arith.constant 0 : i32
    %c0_i32_0 = arith.constant 0 : i32
    %c0_i32_1 = arith.constant 0 : i32
    return %arg1, %c0_i32, %c0_i32_0 : i32, i32, i32
  }
  func.func @transform_4(%arg0: i32, %arg1: i32) -> (i32, i32, i32) {
    %c0_i32 = arith.constant 0 : i32
    %c0_i32_0 = arith.constant 0 : i32
    %c0_i32_1 = arith.constant 0 : i32
    return %arg1, %c0_i32, %c0_i32_0 : i32, i32, i32
  }
  func.func @transform_5(%arg0: i32, %arg1: i32) -> (i32, i32, i32) {
    %c0_i32 = arith.constant 0 : i32
    %c0_i32_0 = arith.constant 0 : i32
    %c0_i32_1 = arith.constant 0 : i32
    return %arg1, %c0_i32, %c0_i32_0 : i32, i32, i32
  }
  func.func @transform_6(%arg0: i32, %arg1: i32) -> (i32, i32, i32) {
    %c0_i32 = arith.constant 0 : i32
    %c0_i32_0 = arith.constant 0 : i32
    %c0_i32_1 = arith.constant 0 : i32
    return %arg1, %c0_i32, %c0_i32_0 : i32, i32, i32
  }
  func.func @transform_7(%arg0: i32, %arg1: i32) -> (i32, i32, i32) {
    %c0_i32 = arith.constant 0 : i32
    %c0_i32_0 = arith.constant 0 : i32
    %c0_i32_1 = arith.constant 0 : i32
    return %arg1, %c0_i32, %c0_i32_0 : i32, i32, i32
  }
  func.func @transform_8(%arg0: i32, %arg1: i32) -> (i32, i32, i32) {
    %c0_i32 = arith.constant 0 : i32
    %c0_i32_0 = arith.constant 0 : i32
    %c0_i32_1 = arith.constant 0 : i32
    return %arg1, %c0_i32, %c0_i32_0 : i32, i32, i32
  }
  func.func @transform_9(%arg0: i32, %arg1: i32) -> (i32, i32, i32) {
    %c0_i32 = arith.constant 0 : i32
    %c0_i32_0 = arith.constant 0 : i32
    %c0_i32_1 = arith.constant 0 : i32
    return %arg1, %c0_i32, %c0_i32_0 : i32, i32, i32
  }
  func.func @transform_10(%arg0: i32, %arg1: i32) -> (i32, i32, i32) {
    %c0_i32 = arith.constant 0 : i32
    %c0_i32_0 = arith.constant 0 : i32
    %c0_i32_1 = arith.constant 0 : i32
    return %arg1, %c0_i32, %c0_i32_0 : i32, i32, i32
  }
  func.func @transform_11(%arg0: i32, %arg1: i32) -> (i32, i32, i32) {
    %c0_i32 = arith.constant 0 : i32
    %c0_i32_0 = arith.constant 0 : i32
    %c0_i32_1 = arith.constant 0 : i32
    return %arg1, %c0_i32, %c0_i32_0 : i32, i32, i32
  }
  func.func @transform_12(%arg0: i32, %arg1: i32) -> (i32, i32, i32) {
    %c0_i32 = arith.constant 0 : i32
    %c0_i32_0 = arith.constant 0 : i32
    %c0_i32_1 = arith.constant 0 : i32
    return %arg1, %c0_i32, %c0_i32_0 : i32, i32, i32
  }
  func.func @transform_13(%arg0: i32, %arg1: i32) -> (i32, i32) {
    %c0_i32 = arith.constant 0 : i32
    %c0_i32_0 = arith.constant 0 : i32
    %c0_i32_1 = arith.constant 0 : i32
    return %c0_i32, %c0_i32_0 : i32, i32
  }
  func.func @transform_14(%arg0: i32, %arg1: i32) -> (i32, i32) {
    %c0_i32 = arith.constant 0 : i32
    %c0_i32_0 = arith.constant 0 : i32
    %c0_i32_1 = arith.constant 0 : i32
    return %c0_i32, %c0_i32_0 : i32, i32
  }
  func.func @transform_15(%arg0: i32, %arg1: i32) -> (i32, i32, i32) {
    %c0_i32 = arith.constant 0 : i32
    %c0_i32_0 = arith.constant 0 : i32
    %c0_i32_1 = arith.constant 0 : i32
    return %arg0, %c0_i32, %c0_i32_0 : i32, i32, i32
  }
}

</mosaic_0001>

<bundles_post_ra>
// kernel: tpu_custom_call.1
= control target key start
LH: loop header
LB: loop body
LE: loop exit
PB: predicated region body
PF: predicated region fallthrough
CT: control target
= control target key end

     0   :  { %s9470_s0 = inlined_call_operand.hbm [shape: f32[2,128,128], index: 0, kind: input, shape index: {}]   ;;  %s9471_s1 = inlined_call_operand.hbm [shape: bf16[2,128,384], index: 1, kind: input, shape index: {}]   ;;  %s9472_s2 = inlined_call_operand.vmem [shape: f32[2,1,384], index: 2, kind: input, shape index: {}]   ;;  %s9473_s3 = inlined_call_operand.hbm [shape: bf16[2,128,128], index: 3, kind: input, shape index: {}]   ;;  %s9474_s4 = inlined_call_operand.vmem [shape: f32[2,1,128], index: 4, kind: input, shape index: {}]   ;;  %s9475_s5 = inlined_call_operand.vmem [shape: f32[2,1,128], index: 5, kind: input, shape index: {}]   ;;  %s9476_s6 = inlined_call_operand.vmem [shape: f32[2,1,128], index: 6, kind: input, shape index: {}]   ;;  %s9477_s7 = inlined_call_operand.hbm [shape: bf16[2,128,256], index: 7, kind: input, shape index: {}]   ;;  %s9478_s8 = inlined_call_operand.vmem [shape: f32[2,1,256], index: 8, kind: input, shape index: {}]   ;;  %s9479_s9 = inlined_call_operand.hbm [shape: bf16[2,256,128], index: 9, kind: input, shape index: {}]   ;;  %s9480_s10 = inlined_call_operand.vmem [shape: f32[2,1,128], index: 10, kind: input, shape index: {}]   ;;  %s9481_s11 = inlined_call_operand.vmem [shape: f32[2,1,128], index: 11, kind: input, shape index: {}]   ;;  %s9482_s12 = inlined_call_operand.vmem [shape: f32[2,1,128], index: 12, kind: input, shape index: {}]   ;;  %s9483_s13 = inlined_call_operand.vmem [shape: f32[1,128], index: 13, kind: input, shape index: {}]   ;;  %s9484_s14 = inlined_call_operand.vmem [shape: f32[1,128], index: 14, kind: input, shape index: {}]   ;;  %s9485_s15 = inlined_call_operand.hbm [shape: f32[2,128,128], index: 15, kind: output, shape index: {}]  }
   0x1   :  { %9533 = sst [smem:[#allocation86_spill]] %s9470_s0 }
   0x2   :  { %9534 = sst [smem:[#allocation87_spill]] %s9471_s1 }
   0x3   :  { %9535 = sst [smem:[#allocation88_spill]] %s9472_s2 }
   0x4   :  { %9536 = sst [smem:[#allocation89_spill]] %s9473_s3 }
   0x5   :  { %9537 = sst [smem:[#allocation90_spill]] %s9474_s4 }
   0x6   :  { %9538 = sst [smem:[#allocation91_spill]] %s9475_s5 }
   0x7   :  { %9539 = sst [smem:[#allocation92_spill]] %s9476_s6 }
   0x8   :  { %9540 = sst [smem:[#allocation93_spill]] %s9477_s7 }
   0x9   :  { %9541 = sst [smem:[#allocation94_spill]] %s9478_s8 }
   0xa   :  { %9542 = sst [smem:[#allocation95_spill]] %s9479_s9 }
   0xb   :  { %9543 = sst [smem:[#allocation96_spill]] %s9480_s10 }
   0xc   :  { %9544 = sst [smem:[#allocation97_spill]] %s9481_s11 }
   0xd   :  { %9545 = sst [smem:[#allocation98_spill]] %s9482_s12 }
   0xe   :  { %9546 = sst [smem:[#allocation99_spill]] %s9483_s13 }
   0xf   :  { %9547 = sst [smem:[#allocation100_spill]] %s9484_s14 }
  0x10   :  { %9548 = sst [smem:[#allocation101_spill]] %s9485_s15 }
  0x11   :  { %20 = vsyncpa [#allocation4], 0 }
  0x12   :  { %22 = vsyncpa [#allocation4 + $0x1], 0 }
  0x13   :  { %23 = vsyncpa [#allocation7], 0 }
  0x14   :  { %25 = vsyncpa [#allocation7 + $0x1], 0 }
  0x15   :  { %26 = vsyncpa [#allocation10], 0 }
  0x16   :  { %28 = vsyncpa [#allocation10 + $0x1], 0 }
  0x17   :  { %29 = vsyncpa [#allocation5], 0 }
  0x18   :  { %31 = vsyncpa [#allocation5 + $0x1], 0  ;;  %s6773_s18 = smov 0   ;;  %s6775_s19 = smov 0  }
  0x19   :  { %s6777_s20 = smov 0   ;;  %s6779_s21 = smov 0  }
  0x1a   :  { %s6781_s22 = smov 0   ;;  %s6783_s23 = smov 0  }
  0x1b   :  { %s6785_s24 = smov 0   ;;  %s6787_s25 = smov 0  }
  0x1c   :  { %s6789_s26 = smov 0   ;;  %s6791_s27 = smov 0  }
  0x1d   :  { %s6793_s28 = smov 0  }
  0x1e LB: > { %9549 = sst [smem:[#allocation17_spill]] %s6637_s19  ;;  %s46_s29 = sadd.s32 1, %s6665_s26  ;;  %s6673_s28 = sphi %s6793_s28, %s37_s28   ;;  %s6669_s27 = sphi %s6791_s27, %s9764_s27   ;;  %s6665_s26 = sphi %s6789_s26, %s9763_s26   ;;  %s6661_s25 = sphi %s6787_s25, %s9762_s25   ;;  %s6657_s24 = sphi %s6785_s24, %s9761_s24   ;;  %s6653_s23 = sphi %s6783_s23, %s9760_s23   ;;  %s6649_s22 = sphi %s6781_s22, %s9759_s22   ;;  %s6645_s21 = sphi %s6779_s21, %s9758_s21   ;;  %s6641_s20 = sphi %s6777_s20, %s9757_s20   ;;  %s6637_s19 = sphi %s6775_s19, %s9756_s19   ;;  %s6633_s18 = sphi %s6773_s18, %s9755_s18  }
  0x1f   : > { %9550 = sst [smem:[#allocation18_spill]] %s6641_s20  ;;  %p9491_p0 = scmp.eq.s32.totalorder %s6673_s28, 0 }
  0x20   : > { %9551 = sst [smem:[#allocation19_spill]] %s6645_s21  ;;  %p6830_p1 = scmp.ge.s32.totalorder %s46_s29, 2 }
  0x21   : > { %9552 = sst [smem:[#allocation20_spill]] %s6649_s22  ;;  %s82_s16 = sadd.s32 1, %s6641_s20 }
  0x22   : > { %9553 = sst [smem:[#allocation21_spill]] %s6653_s23  ;;  %p89_p2 = scmp.ne.s32.totalorder %s6641_s20, %s6637_s19 }
  0x23   : > { %9554 = sst [smem:[#allocation22_spill]] %s6657_s24  ;;  %s9766_s29 = smov (%p6830_p1, %s46_s29), 0 }
  0x24   : > { %9555 = sst [smem:[#allocation23_spill]] %s6661_s25  ;;  %p91_p4 = por %p89_p2, %p9491_p0 }
  0x25   : > { %9556 = sst [smem:[#allocation24_spill]] %s6665_s26  ;;  %s79_s17 = ssub.s32 %s6665_s26, %s9766_s29 }
  0x26   : > { %9557 = sst [smem:[#allocation25_spill]] %s6669_s27  ;;  %p9489_p5 = scmp.lt.s32.totalorder %s6673_s28, 4 }
  0x27   : > { %9558 = sst [smem:[#allocation26_spill]] %s6673_s28  ;;  %p80_p6 = scmp.eq.s32.totalorder %s79_s17, 0 }
  0x28   : > { %s9559_s30 = scalar_select %p6830_p1, 1, 0 }
  0x29   : > { %9560 = sst [smem:[#allocation27_spill]] %s9766_s29  ;;  %s9490_s15 = sand.u32 1, %s6673_s28  }
  0x2a   : > { %s6850_s25 = sand.u32 1, %s6641_s20   ;;  %p6858_p7 = pnand %p9489_p5, %p91_p4 }
  0x2b   : > { %s6853_s14 = scalar_select %p80_p6, %s6641_s20, %s82_s16  }
  0x2c   : > { %s5807_s13 = smul.u32 192, %s6850_s25  ;;  %s9563_s1 = sld [smem:[#allocation87_spill]] }
  0x2d   : > { %9561 = sst [smem:[#allocation28_spill]] %s6853_s14  ;;  %s5808_s11 = smul.u32 3072, %s6665_s26 }
  0x2e   : > { %s9562_s12 = scalar_select %p6858_p7, 1, 0 }
  0x2f   : > { %s504_s17 = scalar_lea.vmem [#allocation6], %s5807_s13  ;;  %s6872_s14 = scalar_lea.sflag [#allocation7], %s9490_s15 }
  0x30   : > { %s511_s16 = sshll.u32 %s504_s17, 4  ;;  %p6878_p9 = pneg %p6858_p7  ;;  %s6868_s16 = int_to_ptr.vmem [resolvable:$true] %s511_s16 }
  0x32   : > { %s6866_s29 = scalar_lea.hbm %s9563_s1, %s5808_s11  ;;  %s6398_s11 = scalar_lea.hbm %s9563_s1, 6144 }
  0x33   : > { %s6393_s20 = scalar_lea.hbm %s6866_s29, 3072  ;;  %p6399_p12 = scmp.lt.u32.totalorder %s6866_s29, %s9563_s1 }
  0x34   : > { %p6394_p8 = scmp.ne.s32.totalorder %s6866_s29, %s6393_s20  ;;  %p6400_p13 = scmp.lt.u32.totalorder %s6398_s11, %s6393_s20 }
  0x35   : > { %p6402_p4 = scmp.lt.u32.totalorder %s6393_s20, %s6866_s29 }
  0x36   : > { %p6396_p10 = pnand %p6878_p9, %p6394_p8  ;;  %p6401_p2 = por %p6400_p13, %p6399_p12 }
  0x38   : > { %p6397_p11 = pneg %p6396_p10  ;;  %p6403_p6 = por %p6402_p4, %p6401_p2 }
  0x3a   : > { %p6404_p5 = pnand %p6403_p6, %p6397_p11 }
  0x3c   : > { %6407 = shalt.err (!%p6404_p5)
}
  0x3d   : > { %s6408_s15 = scalar_lea.vmem %s6868_s16, 3072  ;;  %s6675_s8 = smov [#allocation6]  }
  0x3e   : > { %p6409_p8 = scmp.ne.s32.totalorder %s6868_s16, %s6408_s15  ;;  %s6413_s10 = sshll.u32 %s6675_s8, 4  ;;  %s6414_s10 = int_to_ptr.vmem [resolvable:$false] %s6413_s10 }
  0x3f   : > { %s6415_s13 = scalar_lea.vmem %s6414_s10, 6144  ;;  %p6416_p0 = scmp.lt.s32.totalorder %s6868_s16, %s6414_s10 }
  0x40   : > { %p6411_p10 = pnand %p6409_p8, %p6878_p9  ;;  %p6417_p1 = scmp.lt.s32.totalorder %s6415_s13, %s6408_s15 }
  0x42   : > { %p6412_p3 = pneg %p6411_p10  ;;  %p6418_p12 = por %p6417_p1, %p6416_p0 }
  0x44   : > { %p6419_p13 = pnand %p6418_p12, %p6412_p3 }
  0x46   : > { %6422 = shalt.err (!%p6419_p13)
}
  0x47   : > { %s6676_s20 = smov 192   ;;  %s6677_s11 = smov 12  }
  0x48   : > { %5829 = dma.hbm_to_vmem [thread:$0]  (!%p6858_p7), %s6866_s29, 3072, %s6868_s16, %s6872_s14, %s6676_s20, %s6676_s20, %s6677_s11  }
  0x49   : > { %p5092_p5 = scmp.ge.s32.totalorder %s6673_s28, 1  ;;  %p632_p11 = scmp.lt.s32.totalorder %s6673_s28, 5 }
  0x4a   : > { %s9494_s17 = sshll.u32 %s6850_s25, 7  ;;  %s5212_s8 = sshll.u32 %s6665_s26, 11 }
  0x4b   : > { %p6904_p0 = pnand %p5092_p5, %p632_p11  ;;  %s9567_s7 = sld [smem:[#allocation93_spill]] }
  0x4c   : > { %s571_s6 = scalar_lea.vmem [#allocation9], %s9494_s17  ;;  %s9568_s9 = sld [smem:[#allocation95_spill]] }
  0x4d   : > { %s9565_s15 = scalar_select %p6904_p0, 1, 0 }
  0x4e   : > { %s578_s29 = sshll.u32 %s571_s6, 4  ;;  %s9569_s5 = sand.u32 1, %s6673_s28   ;;  %s6917_s29 = int_to_ptr.vmem [resolvable:$true] %s578_s29 }
  0x4f   : > { %9566 = sst [smem:[#allocation29_spill]] %s9565_s15  ;;  %s6926_s4 = scalar_lea.sflag [#allocation10], %s9569_s5 }
  0x51   : > { %s6913_s1 = scalar_lea.hbm %s9567_s7, %s5212_s8  ;;  %s6428_s17 = scalar_lea.hbm %s9567_s7, 4096 }
  0x52   : > { %s6922_s11 = scalar_lea.hbm %s9568_s9, %s5212_s8  ;;  %s6423_s10 = scalar_lea.hbm %s6913_s1, 2048 }
  0x53   : > { %p6424_p1 = scmp.ne.s32.totalorder %s6913_s1, %s6423_s10  ;;  %p6429_p4 = scmp.lt.u32.totalorder %s6913_s1, %s9567_s7 }
  0x54   : > { %p6430_p6 = scmp.lt.u32.totalorder %s6428_s17, %s6423_s10  ;;  %p6432_p10 = scmp.lt.u32.totalorder %s6423_s10, %s6913_s1 }
  0x55   : > { %p6426_p3 = pnand %p6424_p1, %p6878_p9 }
  0x56   : > { %p6431_p8 = por %p6430_p6, %p6429_p4 }
  0x57   : > { %p6427_p2 = pneg %p6426_p3 }
  0x58   : > { %p6433_p12 = por %p6432_p10, %p6431_p8 }
  0x5a   : > { %p6434_p13 = pnand %p6433_p12, %p6427_p2 }
  0x5c   : > { %6437 = shalt.err (!%p6434_p13)
}
  0x5d   : > { %s6438_s5 = scalar_lea.vmem %s6917_s29, 2048  ;;  %s6678_s24 = smov [#allocation9]  }
  0x5e   : > { %p6439_p5 = scmp.ne.s32.totalorder %s6917_s29, %s6438_s5  ;;  %s6443_s8 = sshll.u32 %s6678_s24, 4  ;;  %s6444_s8 = int_to_ptr.vmem [resolvable:$false] %s6443_s8 }
  0x5f   : > { %s6445_s15 = scalar_lea.vmem %s6444_s8, 4096  ;;  %p6446_p3 = scmp.lt.s32.totalorder %s6917_s29, %s6444_s8 }
  0x60   : > { %p6441_p11 = pnand %p6439_p5, %p6878_p9  ;;  %p6447_p0 = scmp.lt.s32.totalorder %s6445_s15, %s6438_s5 }
  0x62   : > { %p6442_p1 = pneg %p6441_p11  ;;  %p6448_p4 = por %p6447_p0, %p6446_p3 }
  0x64   : > { %p6449_p6 = pnand %p6448_p4, %p6442_p1 }
  0x66   : > { %6452 = shalt.err (!%p6449_p6)
}
  0x67   : > { %s9496_s17 = smov 128   ;;  %s9497_s16 = smov 8  }
  0x68   : > { %5835 = dma.hbm_to_vmem [thread:$0]  (!%p6858_p7), %s6913_s1, 2048, %s6917_s29, %s6926_s4, %s9496_s17, %s9496_s17, %s9497_s16  }
  0x69   : > { %s9570_s20 = sshll.u32 %s6850_s25, 7  ;;  %s6958_s6 = sadd.s32 4294967295, %s6673_s28  }
  0x6a   : > { %s599_s10 = scalar_lea.vmem [#allocation11], %s9570_s20  ;;  %9571 = sst [smem:[#allocation30_spill]] %s6958_s6 }
  0x6b   : > { %s606_s13 = sshll.u32 %s599_s10, 4  ;;  %s5076_s5 = sadd.s32 4294967294, %s6673_s28   ;;  %s6955_s13 = int_to_ptr.vmem [resolvable:$true] %s606_s13 }
  0x6c   : > { %s49_s24 = sadd.s32 1, %s6669_s27  ;;  %s56_s8 = sadd.s32 1, %s6653_s23 }
  0x6d   : > { %p9572_p0 = scmp.ne.s32.totalorder %s9559_s30, 0  ;;  %p63_p2 = scmp.ne.s32.totalorder %s6653_s23, %s6649_s22 }
  0x6e   : > { %p69_p8 = scmp.ne.s32.totalorder %s6649_s22, %s6645_s21  ;;  %p70_p12 = scmp.eq.s32.totalorder %s6958_s6, 0 }
  0x6f   : > { %s9768_s24 = smov (!%p9572_p0, %s49_s24), %s6669_s27  ;;  %p9573_p13 = scmp.eq.s32.totalorder %s6673_s28, 0 }
  0x70   : > { %p51_p10 = scmp.ge.s32.totalorder %s9768_s24, 2  ;;  %p447_p11 = scmp.eq.s32.totalorder %s6958_s6, 3 }
  0x71   : > { %p6973_p5 = por %p9573_p13, %p63_p2  ;;  %p6983_p1 = por %p70_p12, %p69_p8 }
  0x72   : > { %s9770_s24 = smov (%p51_p10, %s9768_s24), 0  ;;  %p9577_p3 = scmp.ne.s32.totalorder %s6637_s19, %s6633_s18 }
  0x73   : > { %9575 = sst [smem:[#allocation31_spill]] %s9770_s24  ;;  %s53_s15 = ssub.s32 %s6669_s27, %s9770_s24 }
  0x74   : > { %s9576_s30 = scalar_select %p6983_p1, 1, 0 }
  0x75   : > { %p6990_p4 = por %p9577_p3, %p70_p12  ;;  %p6996_p6 = por %p447_p11, %p63_p2 }
  0x76   : > { %p54_p0 = scmp.eq.s32.totalorder %s53_s15, 0  ;;  %p453_p10 = scmp.eq.s32.totalorder %s5076_s5, 3 }
  0x77   : > { %s9578_s29 = scalar_select %p6990_p4, 1, 0 }
  0x78   : > { %s9579_s20 = scalar_select %p6996_p6, 1, 0 }
  0x79   : > { %s479_s10 = sand.u32 1, %s6653_s23   ;;  %s5210_s17 = sshll.u32 %s6669_s27, 11 }
  0x7a   : > { %s7003_s16 = scalar_select %p54_p0, %s6653_s23, %s56_s8  }
  0x7b   : > { %p7008_p13 = por %p453_p10, %p69_p8  ;;  %s5079_s18 = sshll.u32 %s479_s10, 7 }
  0x7c   : > { %9580 = sst [smem:[#allocation32_spill]] %s7003_s16  ;;  %s9583_s0 = sld [smem:[#allocation86_spill]] }
  0x7d   : > { %s9581_s7 = scalar_select %p7008_p13, 1, 0 }
  0x7e   : > { %p9584_p2 = scmp.lt.s32.totalorder %s6673_s28, 4  ;;  %s483_s8 = scalar_lea.vmem [#allocation3], %s5079_s18 }
  0x7f   : > { %9582 = sst [smem:[#allocation33_spill]] %s9581_s7  ;;  %s490_s15 = sshll.u32 %s483_s8, 4  ;;  %s7026_s15 = int_to_ptr.vmem [resolvable:$true] %s490_s15 }
  0x80   : > { %p7021_p12 = pnand %p9584_p2, %p6973_p5  ;;  %s5083_s27 = sshll.u32 %s6850_s25, 6 }
  0x81   : > { %s7028_s19 = scalar_lea.sflag [#allocation4], %s479_s10 }
  0x82   : > { %s7015_s24 = scalar_lea.hbm %s9583_s0, %s5210_s17  ;;  %p6455_p11 = pneg %p7021_p12 }
  0x83   : > { %s6453_s17 = scalar_lea.hbm %s7015_s24, 2048  ;;  %s6458_s16 = scalar_lea.hbm %s9583_s0, 4096 }
  0x84   : > { %p6454_p8 = scmp.ne.s32.totalorder %s7015_s24, %s6453_s17  ;;  %p6459_p0 = scmp.lt.u32.totalorder %s7015_s24, %s9583_s0 }
  0x85   : > { %p6460_p10 = scmp.lt.u32.totalorder %s6458_s16, %s6453_s17  ;;  %p6462_p13 = scmp.lt.u32.totalorder %s6453_s17, %s7015_s24 }
  0x86   : > { %p6456_p3 = pnand %p6455_p11, %p6454_p8 }
  0x87   : > { %p6461_p2 = por %p6460_p10, %p6459_p0 }
  0x88   : > { %p6457_p5 = pneg %p6456_p3 }
  0x89   : > { %p6463_p6 = por %p6462_p13, %p6461_p2 }
  0x8b   : > { %p6464_p4 = pnand %p6463_p6, %p6457_p5 }
  0x8d   : > { %6467 = shalt.err (!%p6464_p4)
}
  0x8e   : > { %s6468_s10 = scalar_lea.vmem %s7026_s15, 2048  ;;  %s6681_s8 = smov [#allocation3]  }
  0x8f   : > { %p6469_p8 = scmp.ne.s32.totalorder %s7026_s15, %s6468_s10  ;;  %s6473_s6 = sshll.u32 %s6681_s8, 4  ;;  %s6474_s6 = int_to_ptr.vmem [resolvable:$false] %s6473_s6 }
  0x90   : > { %s6475_s23 = scalar_lea.vmem %s6474_s6, 4096  ;;  %p6476_p7 = scmp.lt.s32.totalorder %s7026_s15, %s6474_s6 }
  0x91   : > { %p6471_p3 = pnand %p6469_p8, %p6455_p11  ;;  %p6477_p0 = scmp.lt.s32.totalorder %s6475_s23, %s6468_s10 }
  0x93   : > { %p6472_p1 = pneg %p6471_p3  ;;  %p6478_p10 = por %p6477_p0, %p6476_p7 }
  0x95   : > { %p6479_p13 = pnand %p6478_p10, %p6472_p1 }
  0x97   : > { %6482 = shalt.err (!%p6479_p13)
}
  0x98   : > { %s9586_s16 = smov 8   ;;  %s9587_s17 = smov 128  }
  0x99   : > { %5826 = dma.hbm_to_vmem [thread:$0]  (!%p7021_p12), %s7015_s24, 2048, %s7026_s15, %s7028_s19, %s9587_s17, %s9587_s17, %s9586_s16  }
  0x9a   : > { %s5211_s1 = sshll.u32 %s6665_s26, 10  ;;  %s9588_s3 = sld [smem:[#allocation89_spill]] }
  0x9b   : > { %s532_s5 = scalar_lea.vmem [#allocation8], %s5083_s27 }
  0x9c   : > { %s539_s6 = sshll.u32 %s532_s5, 4  ;;  %s7067_s6 = int_to_ptr.vmem [resolvable:$true] %s539_s6 }
  0xa0   : > { %s7063_s10 = scalar_lea.hbm %s9588_s3, %s5211_s1  ;;  %s6488_s19 = scalar_lea.hbm %s9588_s3, 2048 }
  0xa1   : > { %s6483_s23 = scalar_lea.hbm %s7063_s10, 1024  ;;  %p6489_p6 = scmp.lt.u32.totalorder %s7063_s10, %s9588_s3 }
  0xa2   : > { %p6484_p7 = scmp.ne.s32.totalorder %s7063_s10, %s6483_s23  ;;  %p6490_p12 = scmp.lt.u32.totalorder %s6488_s19, %s6483_s23 }
  0xa3   : > { %p6492_p5 = scmp.lt.u32.totalorder %s6483_s23, %s7063_s10 }
  0xa4   : > { %p6486_p1 = pnand %p6484_p7, %p6878_p9  ;;  %p6491_p11 = por %p6490_p12, %p6489_p6 }
  0xa6   : > { %p6487_p4 = pneg %p6486_p1  ;;  %p6493_p2 = por %p6492_p5, %p6491_p11 }
  0xa8   : > { %p6494_p8 = pnand %p6493_p2, %p6487_p4 }
  0xaa   : > { %6497 = shalt.err (!%p6494_p8)
}
  0xab   : > { %s6498_s25 = scalar_lea.vmem %s7067_s6, 1024  ;;  %s6682_s27 = smov [#allocation8]  }
  0xac   : > { %p6499_p3 = scmp.ne.s32.totalorder %s7067_s6, %s6498_s25  ;;  %s6503_s1 = sshll.u32 %s6682_s27, 4  ;;  %s6504_s1 = int_to_ptr.vmem [resolvable:$false] %s6503_s1 }
  0xad   : > { %s6505_s18 = scalar_lea.vmem %s6504_s1, 2048  ;;  %p6506_p13 = scmp.lt.s32.totalorder %s7067_s6, %s6504_s1 }
  0xae   : > { %p6501_p0 = pnand %p6499_p3, %p6878_p9  ;;  %p6507_p7 = scmp.lt.s32.totalorder %s6505_s18, %s6498_s25 }
  0xb0   : > { %p6502_p10 = pneg %p6501_p0  ;;  %p6508_p1 = por %p6507_p7, %p6506_p13 }
  0xb2   : > { %p6509_p6 = pnand %p6508_p1, %p6502_p10 }
  0xb4   : > { %6512 = shalt.err (!%p6509_p6)
}
  0xb5   : > { %s6683_s8 = smov 64   ;;  %s6684_s5 = smov 4  }
  0xb6   : > { %p9589_p4 = scmp.ne.s32.totalorder %s9562_s12, 0  ;;  %s6513_s23 = scalar_lea.hbm %s6922_s11, 2048 }
  0xb7   : > { %p6514_p12 = scmp.ne.s32.totalorder %s6922_s11, %s6513_s23  ;;  %s6518_s19 = scalar_lea.hbm %s9568_s9, 4096 }
  0xb8   : > { %5832 = dma.hbm_to_vmem [thread:$0]  (!%p9589_p4), %s7063_s10, 1024, %s7067_s6, %s6872_s14, %s6683_s8, %s6683_s8, %s6684_s5  }
  0xb9   : > { %p6516_p11 = pnand %p6514_p12, %p6878_p9  ;;  %p6519_p2 = scmp.lt.u32.totalorder %s6922_s11, %s9568_s9 }
  0xba   : > { %p6520_p8 = scmp.lt.u32.totalorder %s6518_s19, %s6513_s23  ;;  %p6522_p0 = scmp.lt.u32.totalorder %s6513_s23, %s6922_s11 }
  0xbb   : > { %p6517_p5 = pneg %p6516_p11 }
  0xbc   : > { %p6521_p3 = por %p6520_p8, %p6519_p2 }
  0xbe   : > { %p6523_p10 = por %p6522_p0, %p6521_p3 }
  0xc0   : > { %p6524_p13 = pnand %p6523_p10, %p6517_p5 }
  0xc2   : > { %6527 = shalt.err (!%p6524_p13)
}
  0xc3   : > { %s6528_s14 = scalar_lea.vmem %s6955_s13, 2048  ;;  %s6685_s10 = smov [#allocation11]  }
  0xc4   : > { %p6529_p7 = scmp.ne.s32.totalorder %s6955_s13, %s6528_s14  ;;  %s6533_s6 = sshll.u32 %s6685_s10, 4  ;;  %s6534_s6 = int_to_ptr.vmem [resolvable:$false] %s6533_s6 }
  0xc5   : > { %s6535_s25 = scalar_lea.vmem %s6534_s6, 4096  ;;  %p6536_p12 = scmp.lt.s32.totalorder %s6955_s13, %s6534_s6 }
  0xc6   : > { %p6531_p1 = pnand %p6529_p7, %p6878_p9  ;;  %p6537_p11 = scmp.lt.s32.totalorder %s6535_s25, %s6528_s14 }
  0xc8   : > { %p6532_p6 = pneg %p6531_p1  ;;  %p6538_p2 = por %p6537_p11, %p6536_p12 }
  0xca   : > { %p6539_p8 = pnand %p6538_p2, %p6532_p6 }
  0xcc   : > { %6542 = shalt.err (!%p6539_p8)
}
  0xcd   : > { %5838 = dma.hbm_to_vmem [thread:$0]  (!%p9589_p4), %s6922_s11, 2048, %s6955_s13, %s6926_s4, %s6683_s8, %s6683_s8, %s6684_s5  }
  0xce   : > { %s9590_s2 = sld [smem:[#allocation29_spill]] }
  0xd4   : > { %p9591_p9 = scmp.ne.s32.totalorder %s9590_s2, 0 }
  0xd6   : > { %636 = sbr.rel (%p9591_p9) target bundleno = 4490 (0x118a), region = 80 }
  0xdd   : > { %s7122_s27 = sand.u32 1, %s6649_s22   ;;  %p9592_p5 = scmp.ne.s32.totalorder %s9576_s30, 0 }
  0xde   : > { %s9508_s1 = sshll.u32 %s7122_s27, 7  ;;  %s639_s18 = scalar_lea.sflag [#allocation4], %s7122_s27 }
  0xdf   : > { %s7128_s12 = scalar_lea.vmem [#allocation3], %s9508_s1 }
  0xe0   : > { %6616 = dma.done.wait (%p9592_p5), %s639_s18, 2048  }
  0xe1   : > { %6618 = vsyncadd (%p9592_p5), %s639_s18, 4294965248  ;;  %s9593_s4 = sld [smem:[#allocation30_spill]]  ;;  %s9594_s11 = sld [smem:[#allocation17_spill]] }
  0xe2   : > { %p9595_p4 = scmp.ne.s32.totalorder %s9578_s29, 0 }
  0xe7   : > { %s647_s13 = sand.u32 1, %s9593_s4   ;;  %s649_s8 = sand.u32 1, %s9594_s11  }
  0xe8   : > { %s5809_s5 = smul.u32 192, %s649_s8  ;;  %s648_s23 = scalar_lea.sflag [#allocation7], %s647_s13 }
  0xea   : > { %s7136_s24 = scalar_lea.vmem [#allocation6], %s5809_s5 }
  0xeb   : > { %6620 = dma.done.wait (%p9595_p4), %s648_s23, 4096  }
  0xec   : > { %6622 = vsyncadd (%p9595_p4), %s648_s23, 4294963200  ;;  %s5094_s15 = sshll.u32 %s649_s8, 6  ;;  %s5095_s19 = sshll.u32 %s649_s8, 7 }
  0xed   : > { %s7142_s16 = scalar_lea.vmem [#allocation8], %s5094_s15  ;;  %s666_s30 = scalar_lea.sflag [#allocation10], %s647_s13 }
  0xee   : > { %s7144_s17 = scalar_lea.vmem [#allocation9], %s5095_s19 }
  0xef   : > { %6624 = dma.done.wait (%p9595_p4), %s666_s30, 4096  }
  0xf0   : > { %6626 = vsyncadd (%p9595_p4), %s666_s30, 4294963200  ;;  %s9596_s14 = sld [smem:[#allocation22_spill]]  ;;  %s9597_s18 = sld [smem:[#allocation90_spill]] }
  0xf1   : > { %s9600_s3 = sld [smem:[#allocation88_spill]]  ;;  %s9601_s21 = sld [smem:[#allocation94_spill]] }
  0xf2   : > { %s9603_s8 = sld [smem:[#allocation97_spill]]  ;;  %s9604_s30 = sld [smem:[#allocation98_spill]] }
  0xf3   : > { %s9605_s1 = sshll.u32 %s7122_s27, 7 }
  0xf6   : > { %p771_p3 = scmp.lt.s32.totalorder %s9596_s14, 1  ;;  %p5099_p0 = scmp.ne.s32.totalorder %s9596_s14, 0 }
  0xf7   : > { %v802_v0 = vld [vmem:[%s7128_s12] sm:$0xff] (!%p5099_p0)  ;;  %v803_v1 = vld [vmem:[%s7128_s12 + $0x8] sm:$0xff] (!%p5099_p0)  ;;  %v804_v2 = vld [vmem:[%s7128_s12 + $0x10] sm:$0xff] (!%p5099_p0) }
  0xf8   : > { %s7152_s10 = scalar_select %p771_p3, %s9596_s14, 1 }
  0xf9   : > { %v805_v3 = vld [vmem:[%s7128_s12 + $0x18] sm:$0xff] (!%p5099_p0)  ;;  %v806_v4 = vld [vmem:[%s7128_s12 + $0x20] sm:$0xff] (!%p5099_p0)  ;;  %v807_v5 = vld [vmem:[%s7128_s12 + $0x28] sm:$0xff] (!%p5099_p0) }
  0xfa   : > { %s5810_s6 = smul.u32 3, %s7152_s10  ;;  %s777_s29 = scalar_lea.vmem %s9597_s18, %s7152_s10  ;;  %v808_v6 = vld [vmem:[%s7128_s12 + $0x30] sm:$0xff] (!%p5099_p0)  ;;  %v809_v7 = vld [vmem:[%s7128_s12 + $0x38] sm:$0xff] (!%p5099_p0)  ;;  %v810_v8 = vld [vmem:[%s7128_s12 + $0x40] sm:$0xff] (!%p5099_p0) }
  0xfb   : > { %s5098_s26 = sshll.u32 %s7152_s10, 1  ;;  %s9602_s18 = sld [smem:[#allocation96_spill]]  ;;  %v811_v9 = vld [vmem:[%s7128_s12 + $0x48] sm:$0xff] (!%p5099_p0)  ;;  %v812_v10 = vld [vmem:[%s7128_s12 + $0x50] sm:$0xff] (!%p5099_p0)  ;;  %v813_v11 = vld [vmem:[%s7128_s12 + $0x58] sm:$0xff] (!%p5099_p0) }
  0xfc   : > { %s7170_s9 = scalar_lea.vmem %s9600_s3, %s5810_s6  ;;  %s7176_s28 = scalar_lea.vmem %s9601_s21, %s5098_s26  ;;  %v814_v12 = vld [vmem:[%s7128_s12 + $0x60] sm:$0xff] (!%p5099_p0)  ;;  %v815_v13 = vld [vmem:[%s7128_s12 + $0x68] sm:$0xff] (!%p5099_p0)  ;;  %v816_v14 = vld [vmem:[%s7128_s12 + $0x70] sm:$0xff] (!%p5099_p0) }
  0xfd   : > { %s793_s5 = scalar_lea.vmem %s9603_s8, %s7152_s10  ;;  %s796_s0 = scalar_lea.vmem %s9604_s30, %s7152_s10  ;;  %v817_v15 = vld [vmem:[%s7128_s12 + $0x78] sm:$0xff] (!%p5099_p0) }
  0xfe   : > { %s7190_s3 = scalar_lea.vmem [#allocation11], %s5095_s19  ;;  %s7194_s6 = scalar_lea.vmem [#allocation12], %s9605_s1 }
  0xff   : > { %801 = sbr.rel (%p5099_p0) target bundleno = 263 (0x107), region = 104  ;;  %818 = vst [vmem:[%s7194_s6] sm:$0xff] (!%p5099_p0), %v802_v0  ;;  %819 = vst [vmem:[%s7194_s6 + $0x8] sm:$0xff] (!%p5099_p0), %v803_v1 }
 0x100   : > { %820 = vst [vmem:[%s7194_s6 + $0x10] sm:$0xff] (!%p5099_p0), %v804_v2  ;;  %821 = vst [vmem:[%s7194_s6 + $0x18] sm:$0xff] (!%p5099_p0), %v805_v3 }
 0x101   : > { %s790_s4 = scalar_lea.vmem %s9602_s18, %s7152_s10  ;;  %822 = vst [vmem:[%s7194_s6 + $0x20] sm:$0xff] (!%p5099_p0), %v806_v4  ;;  %823 = vst [vmem:[%s7194_s6 + $0x28] sm:$0xff] (!%p5099_p0), %v807_v5 }
 0x102   : > { %824 = vst [vmem:[%s7194_s6 + $0x30] sm:$0xff] (!%p5099_p0), %v808_v6  ;;  %825 = vst [vmem:[%s7194_s6 + $0x38] sm:$0xff] (!%p5099_p0), %v809_v7 }
 0x103   : > { %826 = vst [vmem:[%s7194_s6 + $0x40] sm:$0xff] (!%p5099_p0), %v810_v8  ;;  %827 = vst [vmem:[%s7194_s6 + $0x48] sm:$0xff] (!%p5099_p0), %v811_v9 }
 0x104   : > { %828 = vst [vmem:[%s7194_s6 + $0x50] sm:$0xff] (!%p5099_p0), %v812_v10  ;;  %829 = vst [vmem:[%s7194_s6 + $0x58] sm:$0xff] (!%p5099_p0), %v813_v11 }
 0x105   : > { %830 = vst [vmem:[%s7194_s6 + $0x60] sm:$0xff] (!%p5099_p0), %v814_v12  ;;  %831 = vst [vmem:[%s7194_s6 + $0x68] sm:$0xff] (!%p5099_p0), %v815_v13 }
 0x106   : > { %832 = vst [vmem:[%s7194_s6 + $0x70] sm:$0xff] %v816_v14  ;;  %833 = vst [vmem:[%s7194_s6 + $0x78] sm:$0xff] %v817_v15 }
 0x107 PF: > { %v5945_v16 = vld [vmem:[%s7136_s24 + $0x4] ss:$12 sps:$4 sm:$0xff]   ;;  %v5947_v17 = vld [vmem:[%s7136_s24] ss:$12 sps:$4 sm:$0xff]   ;;  %v9517_v18 = vmov 0   ;;  %v892_v1 = vlaneseq  ;;  %vm1261_vm0 = vcmask 261120  }
 0x108   : > { %1067 = vmatprep.mubr.bf16.mxu0 %v9517_v18  ;;  %1035 = vmatprep.subr.bf16.mxu0 %v5945_v16  ;;  %v5948_v19 = vld [vmem:[%s7136_s24 + $0x1c] ss:$12 sps:$4 sm:$0xff]   ;;  %v5950_v20 = vld [vmem:[%s7136_s24 + $0x18] ss:$12 sps:$4 sm:$0xff]   ;;  %v5951_v21 = vld [vmem:[%s7136_s24 + $0x34] ss:$12 sps:$4 sm:$0xff]  }
 0x109   : > { %1036 = vmatpush1.bf16.msra.mxu0 %v5947_v17  ;;  %v5953_v22 = vld [vmem:[%s7136_s24 + $0x30] ss:$12 sps:$4 sm:$0xff]   ;;  %v5954_v23 = vld [vmem:[%s7136_s24 + $0x4c] ss:$12 sps:$4 sm:$0xff]   ;;  %v834_v24 = vld [vmem:[%s7194_s6] sm:$0xff]  ;;  %v7277_v2 = vshrl.u32 %v892_v1, 7 }
 0x10a   : > { %1037 = vmatprep.subr.bf16.mxu0 %v5948_v19  ;;  %v5956_v25 = vld [vmem:[%s7136_s24 + $0x48] ss:$12 sps:$4 sm:$0xff]   ;;  %v5957_v27 = vld [vmem:[%s7136_s24 + $0x64] ss:$12 sps:$4 sm:$0xff]   ;;  %v5959_v29 = vld [vmem:[%s7136_s24 + $0x60] ss:$12 sps:$4 sm:$0xff]  }
 0x10b   : > { %v835_v26 = vld [vmem:[%s7194_s6 + $0x8] sm:$0xff]  ;;  %v5962_v33 = vld [vmem:[%s7136_s24 + $0x78] ss:$12 sps:$4 sm:$0xff]   ;;  %v5963_v34 = vld [vmem:[%s7136_s24 + $0x94] ss:$12 sps:$4 sm:$0xff]   ;;  %9606 = vst [vmem:[#allocation34_spill] sm:$0xff] %v7277_v2 }
 0x10c   : > { %v850_v28 = vpack.c.bf16 %v835_v26, %v834_v24  ;;  %v5960_v30 = vld [vmem:[%s7136_s24 + $0x7c] ss:$12 sps:$4 sm:$0xff]   ;;  %v5970_v32 = vld [vmem:[%s7136_s24 + $0x20] ss:$12 sps:$4 sm:$0xff]   ;;  %v5971_v35 = vld [vmem:[%s7136_s24 + $0x38] ss:$12 sps:$4 sm:$0xff]  }
 0x10d   : > { %1038 = vmatpush1.bf16.msra.mxu0 %v5950_v20  ;;  %v5969_v31 = vld [vmem:[%s7136_s24 + $0x8] ss:$12 sps:$4 sm:$0xff]   ;;  %v5965_v36 = vld [vmem:[%s7136_s24 + $0x90] ss:$12 sps:$4 sm:$0xff]   ;;  %v5966_v37 = vld [vmem:[%s7136_s24 + $0xac] ss:$12 sps:$4 sm:$0xff]  }
 0x10e   : > { %1039 = vmatprep.subr.bf16.mxu0 %v5951_v21  ;;  %5455 = vmatprep.mubr.bf16.mxu1 %v850_v28  ;;  %v5972_v38 = vld [vmem:[%s7136_s24 + $0x50] ss:$12 sps:$4 sm:$0xff]   ;;  %v5968_v39 = vld [vmem:[%s7136_s24 + $0xa8] ss:$12 sps:$4 sm:$0xff]   ;;  %v5974_v41 = vld [vmem:[%s7136_s24 + $0x80] ss:$12 sps:$4 sm:$0xff]  }
 0x10f   : > { %5439 = vmatprep.subr.bf16.mxu1 %v5969_v31  ;;  %v5973_v40 = vld [vmem:[%s7136_s24 + $0x68] ss:$12 sps:$4 sm:$0xff]   ;;  %v837_v43 = vld [vmem:[%s7194_s6 + $0x18] sm:$0xff]  ;;  %v838_v47 = vld [vmem:[%s7194_s6 + $0x20] sm:$0xff]  ;;  %v9516_v3 = vsub.s32 0, %v7277_v2  ;;  %v9515_v5 = vsub.s32 1, %v7277_v2 }
 0x110   : > { %5440 = vmatpush3.bf16.msra.mxu1 %v5969_v31  ;;  %v836_v42 = vld [vmem:[%s7194_s6 + $0x10] sm:$0xff]  ;;  %v5975_v44 = vld [vmem:[%s7136_s24 + $0x98] ss:$12 sps:$4 sm:$0xff]   ;;  %v839_v48 = vld [vmem:[%s7194_s6 + $0x28] sm:$0xff]  ;;  %s6687_s7 = smov 96   ;;  %v902_v24 = vsub.s32 2, %v7277_v2 }
 0x111   : > { %1040 = vmatpush1.bf16.msra.mxu0 %v5953_v22  ;;  %5441 = vmatprep.subr.bf16.mxu1 %v5970_v32  ;;  %v851_v45 = vpack.c.bf16 %v837_v43, %v836_v42  ;;  %v5976_v46 = vld [vmem:[%s7136_s24 + $0xb0] ss:$12 sps:$4 sm:$0xff]   ;;  %v852_v49 = vpack.c.bf16 %v839_v48, %v838_v47  ;;  %v842_v53 = vld [vmem:[%s7194_s6 + $0x40] sm:$0xff]  ;;  %v843_v54 = vld [vmem:[%s7194_s6 + $0x48] sm:$0xff]  ;;  %s6689_s21 = smov 32   ;;  %vm2290_vm1 = vcmask 523520  }
 0x112   : > { %1041 = vmatprep.subr.bf16.mxu0 %v5954_v23  ;;  %v840_v50 = vld [vmem:[%s7194_s6 + $0x30] sm:$0xff]  ;;  %v841_v51 = vld [vmem:[%s7194_s6 + $0x38] sm:$0xff]  ;;  %v854_v55 = vpack.c.bf16 %v843_v54, %v842_v53  ;;  %v846_v58 = vld [vmem:[%s7194_s6 + $0x60] sm:$0xff]  ;;  %vm2837_vm2 = vcmask 785920   ;;  %vm3384_vm3 = vcmask 1048320   ;;  %s9735_s8 = sld [smem:[#allocation92_spill]] }
 0x113   : > { %v853_v52 = vpack.c.bf16 %v841_v51, %v840_v50  ;;  %v844_v56 = vld [vmem:[%s7194_s6 + $0x50] sm:$0xff]  ;;  %v845_v57 = vld [vmem:[%s7194_s6 + $0x58] sm:$0xff]  ;;  %v847_v59 = vld [vmem:[%s7194_s6 + $0x68] sm:$0xff] }
 0x114   : > { %5442 = vmatpush3.bf16.msra.mxu1 %v5970_v32  ;;  %v855_v60 = vpack.c.bf16 %v845_v57, %v844_v56  ;;  %v856_v61 = vpack.c.bf16 %v847_v59, %v846_v58  ;;  %v848_v62 = vld [vmem:[%s7194_s6 + $0x70] sm:$0xff]  ;;  %v849_v63 = vld [vmem:[%s7194_s6 + $0x78] sm:$0xff]  ;;  %v890_v4 = vld [vmem:[%s7170_s9] sm:$0x7]  ;;  %s6688_s9 = smov 64  }
 0x115   : > { %1042 = vmatpush1.bf16.msra.mxu0 %v5956_v25  ;;  %5443 = vmatprep.subr.bf16.mxu1 %v5971_v35  ;;  %v857_v0 = vpack.c.bf16 %v849_v63, %v848_v62  ;;  %v7284_v6 = vrot.slane %v890_v4, %v9516_v3  ;;  %v7288_v8 = vrot.slane %v890_v4, %v9515_v5 }
 0x116   : > { %1043 = vmatprep.subr.bf16.mxu0 %v5957_v27  ;;  %v7315_v31 = vrot.slane %v890_v4, %v902_v24 }
 0x118   : > { %5444 = vmatpush3.bf16.msra.mxu1 %v5971_v35  ;;  %s9736_s30 = scalar_lea.vmem %s9735_s8, %s7152_s10 }
 0x119   : > { %1044 = vmatpush1.bf16.msra.mxu0 %v5959_v29  ;;  %5445 = vmatprep.subr.bf16.mxu1 %v5972_v38 }
 0x11a   : > { %1045 = vmatprep.subr.bf16.mxu0 %v5960_v30 }
 0x11c   : > { %5446 = vmatpush3.bf16.msra.mxu1 %v5972_v38 }
 0x11d   : > { %1046 = vmatpush1.bf16.msra.mxu0 %v5962_v33  ;;  %5447 = vmatprep.subr.bf16.mxu1 %v5973_v40 }
 0x11e   : > { %1047 = vmatprep.subr.bf16.mxu0 %v5963_v34 }
 0x120   : > { %5448 = vmatpush3.bf16.msra.mxu1 %v5973_v40 }
 0x121   : > { %1048 = vmatpush1.bf16.msra.mxu0 %v5965_v36  ;;  %5449 = vmatprep.subr.bf16.mxu1 %v5974_v41 }
 0x122   : > { %1049 = vmatprep.subr.bf16.mxu0 %v5966_v37 }
 0x124   : > { %5450 = vmatpush3.bf16.msra.mxu1 %v5974_v41 }
 0x125   : > { %1050 = vmatpush1.bf16.msra.mxu0 %v5968_v39  ;;  %5451 = vmatprep.subr.bf16.mxu1 %v5975_v44 }
 0x128   : > { %1068 = vmatmul.mubr.bf16.vlgmr.msra.gmra.mrb[0].mxu0 %v850_v28  ;;  %5452 = vmatpush3.bf16.msra.mxu1 %v5975_v44 }
 0x129   : > { %1077 = vmatprep.mubr.bf16.mxu0 %v9517_v18  ;;  %5453 = vmatprep.subr.bf16.mxu1 %v5976_v46 }
 0x12c   : > { %5454 = vmatpush3.bf16.msra.mxu1 %v5976_v46 }
 0x12f   : > { %5456 = vmatmul.mubr.bf16.vlgmr.msra.gmra.mrb[0].mxu1 %v851_v45 }
 0x130   : > { %1078 = vmatmul.mubr.bf16.gmra.mrb[4].mxu0 %v851_v45  ;;  %5459 = vmatprep.mubr.bf16.mxu1 %v852_v49 }
 0x131   : > { %1087 = vmatprep.mubr.bf16.mxu0 %v9517_v18 }
 0x137   : > { %5460 = vmatmul.mubr.bf16.gmra.mrb[4].mxu1 %v853_v52 }
 0x138   : > { %1088 = vmatmul.mubr.bf16.gmra.mrb[8].mxu0 %v852_v49  ;;  %5463 = vmatprep.mubr.bf16.mxu1 %v854_v55 }
 0x139   : > { %1097 = vmatprep.mubr.bf16.mxu0 %v9517_v18 }
 0x13f   : > { %5464 = vmatmul.mubr.bf16.gmra.mrb[8].mxu1 %v855_v60 }
 0x140   : > { %1098 = vmatmul.mubr.bf16.gmra.mrb[12].mxu0 %v853_v52  ;;  %5467 = vmatprep.mubr.bf16.mxu1 %v856_v61 }
 0x141   : > { %1107 = vmatprep.mubr.bf16.mxu0 %v9517_v18 }
 0x147   : > { %5468 = vmatmul.mubr.bf16.gmra.mrb[12].mxu1 %v857_v0 }
 0x148   : > { %1108 = vmatmul.mubr.bf16.gmra.mrb[16].mxu0 %v854_v55 }
 0x149   : > { %1117 = vmatprep.mubr.bf16.mxu0 %v9517_v18 }
 0x150   : > { %1118 = vmatmul.mubr.bf16.gmra.mrb[20].mxu0 %v855_v60 }
 0x151   : > { %1127 = vmatprep.mubr.bf16.mxu0 %v9517_v18 }
 0x158   : > { %1128 = vmatmul.mubr.bf16.gmra.mrb[24].mxu0 %v856_v61 }
 0x159   : > { %1137 = vmatprep.mubr.bf16.mxu0 %v9517_v18 }
 0x160   : > { %1138 = vmatmul.mubr.bf16.gmra.mrb[28].mxu0 %v857_v0 }
 0x1fb   : > { %v1069_v7 = vpop.f32.mrb[0].mxu0 }
 0x1fc   : > { %v1071_v9 = vpop.f32.mrb[1].mxu0  ;;  %v1070_v11 = vadd.f32 %v1069_v7, %v7284_v6 }
 0x1fd   : > { %v1073_v10 = vpop.f32.mrb[2].mxu0  ;;  %v1072_v14 = vadd.f32 %v1071_v9, %v7288_v8 }
 0x1fe   : > { %v1074_v12 = vadd.f32 %v1073_v10, %v7284_v6  ;;  %v1075_v13 = vpop.f32.mrb[3].mxu0 }
 0x1ff   : > { %v1076_v15 = vadd.f32 %v1075_v13, %v7288_v8 }
 0x200   : > { %v7294_v16 = vpack.c.bf16 %v1074_v12, %v1070_v11 }
 0x201   : > { %v7296_v17 = vpack.c.bf16 %v1076_v15, %v1072_v14 }
 0x202   : > { %5487 = vmatprep.mubr.msk.bf16.mxu0 %vm1261_vm0, %v7294_v16  ;;  %v5457_v34 = vpop.f32.mrb[0].mxu1 }
 0x203   : > { %v1079_v19 = vpop.f32.mrb[4].mxu0  ;;  %1760 = vrot.lane.b32.xlu0 %v7296_v17, %s6687_s7  ;;  %5775 = vmatprep.subr.msk.bf16.mxu0 %vm1261_vm0, %v7296_v17  ;;  %v1287_v20 = vsel %vm1261_vm0, %v7296_v17, 0  ;;  %v1191_v37 = vadd.f32 %v5457_v34, %v7315_v31  ;;  %v1182_v38 = vpop.f32.mrb[1].mxu1 }
 0x204   : > { %v1080_v21 = vadd.f32 %v1079_v19, %v7284_v6  ;;  %v1081_v22 = vpop.f32.mrb[5].mxu0  ;;  %5472 = vmatpush3.bf16.xpose.msra.mxu0 %v1287_v20  ;;  %v1183_v40 = vadd.f32 %v1182_v38, %v7315_v31  ;;  %v5458_v41 = vpop.f32.mrb[2].mxu1 }
 0x205   : > { %v1083_v23 = vpop.f32.mrb[6].mxu0  ;;  %v1082_v27 = vadd.f32 %v1081_v22, %v7288_v8  ;;  %v1194_v44 = vadd.f32 %v5458_v41, %v7315_v31  ;;  %v1185_v45 = vpop.f32.mrb[3].mxu1 }
 0x206   : > { %v1084_v25 = vadd.f32 %v1083_v23, %v7284_v6  ;;  %v1085_v26 = vpop.f32.mrb[7].mxu0  ;;  %v1186_v48 = vadd.f32 %v1185_v45, %v7315_v31 }
 0x207   : > { %v1086_v28 = vadd.f32 %v1085_v26, %v7288_v8  ;;  %v7333_v50 = vpack.c.bf16 %v1194_v44, %v1191_v37 }
 0x208   : > { %v7311_v29 = vpack.c.bf16 %v1084_v25, %v1080_v21  ;;  %v7337_v52 = vpack.c.bf16 %v1186_v48, %v1183_v40 }
 0x209   : > { %v7313_v30 = vpack.c.bf16 %v1086_v28, %v1082_v27 }
 0x20a   : > { %v5461_v55 = vpop.f32.mrb[4].mxu1  ;;  %5503 = vmatprep.subr.bf16.mxu1 %v7337_v52 }
 0x20b   : > { %v1089_v32 = vpop.f32.mrb[8].mxu0  ;;  %1762 = vrot.lane.b32.xlu1 %v7313_v30, %s6687_s7  ;;  %5776 = vmatprep.subr.msk.bf16.mxu0 %vm1261_vm0, %v7313_v30  ;;  %v1290_v33 = vsel %vm1261_vm0, %v7313_v30, 0  ;;  %v1207_v58 = vadd.f32 %v5461_v55, %v7315_v31  ;;  %v1198_v59 = vpop.f32.mrb[5].mxu1 }
 0x20c   : > { %v1090_v35 = vadd.f32 %v1089_v32, %v7284_v6  ;;  %v1091_v36 = vpop.f32.mrb[9].mxu0  ;;  %5474 = vmatpush3.bf16.xpose.msra.mxu0 %v1290_v33  ;;  %v1199_v61 = vadd.f32 %v1198_v59, %v7315_v31  ;;  %5504 = vmatpush3.bf16.msra.mxu1 %v7337_v52  ;;  %v5462_v62 = vpop.f32.mrb[6].mxu1 }
 0x20d   : > { %v1093_v39 = vpop.f32.mrb[10].mxu0  ;;  %v1092_v46 = vadd.f32 %v1091_v36, %v7288_v8  ;;  %v1210_v1 = vadd.f32 %v5462_v62, %v7315_v31  ;;  %v1201_v4 = vpop.f32.mrb[7].mxu1  ;;  %5505 = vmatprep.subr.bf16.mxu1 %v7333_v50 }
 0x20e   : > { %v1094_v42 = vadd.f32 %v1093_v39, %v7284_v6  ;;  %v1095_v43 = vpop.f32.mrb[11].mxu0  ;;  %v1202_v10 = vadd.f32 %v1201_v4, %v7315_v31 }
 0x20f   : > { %v1096_v47 = vadd.f32 %v1095_v43, %v7288_v8  ;;  %v7358_v12 = vpack.c.bf16 %v1210_v1, %v1207_v58 }
 0x210   : > { %v7331_v49 = vpack.c.bf16 %v1094_v42, %v1090_v35  ;;  %v7362_v14 = vpack.c.bf16 %v1202_v10, %v1199_v61  ;;  %5506 = vmatpush3.bf16.msra.mxu1 %v7333_v50 }
 0x211   : > { %v7335_v51 = vpack.c.bf16 %v1096_v47, %v1092_v46 }
 0x212   : > { %v5465_v20 = vpop.f32.mrb[8].mxu1  ;;  %5507 = vmatprep.subr.bf16.mxu1 %v7362_v14 }
 0x213   : > { %v1099_v53 = vpop.f32.mrb[12].mxu0  ;;  %1764 = vrot.lane.b32.xlu0 %v7335_v51, %s6687_s7  ;;  %5777 = vmatprep.subr.msk.bf16.mxu0 %vm1261_vm0, %v7335_v51  ;;  %v1293_v54 = vsel %vm1261_vm0, %v7335_v51, 0  ;;  %v1223_v23 = vadd.f32 %v5465_v20, %v7315_v31  ;;  %v1214_v24 = vpop.f32.mrb[9].mxu1 }
 0x214   : > { %v1100_v56 = vadd.f32 %v1099_v53, %v7284_v6  ;;  %v1101_v57 = vpop.f32.mrb[13].mxu0  ;;  %5476 = vmatpush3.bf16.xpose.msra.mxu0 %v1293_v54  ;;  %v1215_v26 = vadd.f32 %v1214_v24, %v7315_v31  ;;  %5508 = vmatpush3.bf16.msra.mxu1 %v7362_v14  ;;  %v5466_v27 = vpop.f32.mrb[10].mxu1 }
 0x215   : > { %v1103_v60 = vpop.f32.mrb[14].mxu0  ;;  %v1102_v7 = vadd.f32 %v1101_v57, %v7288_v8  ;;  %v1226_v33 = vadd.f32 %v5466_v27, %v7315_v31  ;;  %v1217_v34 = vpop.f32.mrb[11].mxu1  ;;  %5509 = vmatprep.subr.bf16.mxu1 %v7358_v12 }
 0x216   : > { %v1104_v63 = vadd.f32 %v1103_v60, %v7284_v6  ;;  %v1105_v0 = vpop.f32.mrb[15].mxu0  ;;  %v1218_v37 = vadd.f32 %v1217_v34, %v7315_v31 }
 0x217   : > { %v1106_v9 = vadd.f32 %v1105_v0, %v7288_v8  ;;  %v7382_v39 = vpack.c.bf16 %v1226_v33, %v1223_v23 }
 0x218   : > { %v7356_v11 = vpack.c.bf16 %v1104_v63, %v1100_v56  ;;  %v7386_v41 = vpack.c.bf16 %v1218_v37, %v1215_v26  ;;  %5510 = vmatpush3.bf16.msra.mxu1 %v7358_v12 }
 0x219   : > { %v7360_v13 = vpack.c.bf16 %v1106_v9, %v1102_v7 }
 0x21a   : > { %v5469_v44 = vpop.f32.mrb[12].mxu1  ;;  %5511 = vmatprep.subr.bf16.mxu1 %v7386_v41 }
 0x21b   : > { %v1109_v15 = vpop.f32.mrb[16].mxu0  ;;  %5778 = vmatprep.subr.msk.bf16.mxu0 %vm1261_vm0, %v7360_v13  ;;  %v1296_v19 = vsel %vm1261_vm0, %v7360_v13, 0  ;;  %v1239_v47 = vadd.f32 %v5469_v44, %v7315_v31  ;;  %v1230_v48 = vpop.f32.mrb[13].mxu1 }
 0x21c   : > { %v1110_v21 = vadd.f32 %v1109_v15, %v7284_v6  ;;  %v1111_v22 = vpop.f32.mrb[17].mxu0  ;;  %5478 = vmatpush3.bf16.xpose.msra.mxu0 %v1296_v19  ;;  %v1231_v54 = vadd.f32 %v1230_v48, %v7315_v31  ;;  %5512 = vmatpush3.bf16.msra.mxu1 %v7386_v41  ;;  %v5470_v55 = vpop.f32.mrb[14].mxu1 }
 0x21d   : > { %v1113_v25 = vpop.f32.mrb[18].mxu0  ;;  %v1112_v35 = vadd.f32 %v1111_v22, %v7288_v8  ;;  %v1242_v58 = vadd.f32 %v5470_v55, %v7315_v31  ;;  %v1233_v59 = vpop.f32.mrb[15].mxu1  ;;  %5513 = vmatprep.subr.bf16.mxu1 %v7382_v39 }
 0x21e   : > { %v1114_v28 = vadd.f32 %v1113_v25, %v7284_v6  ;;  %v1115_v32 = vpop.f32.mrb[19].mxu0  ;;  %v1234_v62 = vadd.f32 %v1233_v59, %v7315_v31 }
 0x21f   : > { %v1116_v36 = vadd.f32 %v1115_v32, %v7288_v8  ;;  %v7406_v0 = vpack.c.bf16 %v1242_v58, %v1239_v47 }
 0x220   : > { %v7380_v38 = vpack.c.bf16 %v1114_v28, %v1110_v21  ;;  %v7410_v4 = vpack.c.bf16 %v1234_v62, %v1231_v54  ;;  %5514 = vmatpush3.bf16.msra.mxu1 %v7382_v39 }
 0x221   : > { %v7384_v40 = vpack.c.bf16 %v1116_v36, %v1112_v35 }
 0x222   : > { %5515 = vmatprep.subr.bf16.mxu1 %v7410_v4 }
 0x223   : > { %v1119_v42 = vpop.f32.mrb[20].mxu0  ;;  %5779 = vmatprep.subr.msk.bf16.mxu0 %vm1261_vm0, %v7384_v40  ;;  %v1299_v43 = vsel %vm1261_vm0, %v7384_v40, 0 }
 0x224   : > { %v1120_v45 = vadd.f32 %v1119_v42, %v7284_v6  ;;  %v1121_v46 = vpop.f32.mrb[21].mxu0  ;;  %5480 = vmatpush3.bf16.xpose.msra.mxu0 %v1299_v43  ;;  %5516 = vmatpush3.bf16.msra.mxu1 %v7410_v4 }
 0x225   : > { %v1123_v53 = vpop.f32.mrb[22].mxu0  ;;  %v1122_v60 = vadd.f32 %v1121_v46, %v7288_v8  ;;  %5517 = vmatprep.subr.bf16.mxu1 %v7406_v0 }
 0x226   : > { %v1124_v56 = vadd.f32 %v1123_v53, %v7284_v6  ;;  %v1125_v57 = vpop.f32.mrb[23].mxu0 }
 0x227   : > { %v1126_v61 = vadd.f32 %v1125_v57, %v7288_v8 }
 0x228   : > { %v7404_v63 = vpack.c.bf16 %v1124_v56, %v1120_v45  ;;  %5518 = vmatpush3.bf16.msra.mxu1 %v7406_v0 }
 0x229   : > { %v7408_v1 = vpack.c.bf16 %v1126_v61, %v1122_v60 }
 0x22b   : > { %v1129_v7 = vpop.f32.mrb[24].mxu0  ;;  %5780 = vmatprep.subr.msk.bf16.mxu0 %vm1261_vm0, %v7408_v1  ;;  %v1302_v9 = vsel %vm1261_vm0, %v7408_v1, 0 }
 0x22c   : > { %v1130_v31 = vadd.f32 %v1129_v7, %v7284_v6  ;;  %v1131_v10 = vpop.f32.mrb[25].mxu0  ;;  %5482 = vmatpush3.bf16.xpose.msra.mxu0 %v1302_v9 }
 0x22d   : > { %v1133_v15 = vpop.f32.mrb[26].mxu0  ;;  %v1132_v21 = vadd.f32 %v1131_v10, %v7288_v8 }
 0x22e   : > { %v1134_v19 = vadd.f32 %v1133_v15, %v7284_v6  ;;  %v1135_v20 = vpop.f32.mrb[27].mxu0 }
 0x22f   : > { %v1136_v22 = vadd.f32 %v1135_v20, %v7288_v8 }
 0x230   : > { %v7424_v23 = vpack.c.bf16 %v1134_v19, %v1130_v31 }
 0x231   : > { %v7426_v24 = vpack.c.bf16 %v1136_v22, %v1132_v21 }
 0x233   : > { %v1139_v25 = vpop.f32.mrb[28].mxu0  ;;  %5781 = vmatprep.subr.msk.bf16.mxu0 %vm1261_vm0, %v7426_v24  ;;  %v1305_v26 = vsel %vm1261_vm0, %v7426_v24, 0 }
 0x234   : > { %v1140_v27 = vadd.f32 %v1139_v25, %v7284_v6  ;;  %v1141_v28 = vpop.f32.mrb[29].mxu0  ;;  %5484 = vmatpush3.bf16.xpose.msra.mxu0 %v1305_v26 }
 0x235   : > { %v1143_v32 = vpop.f32.mrb[30].mxu0  ;;  %v1142_v35 = vadd.f32 %v1141_v28, %v7288_v8 }
 0x236   : > { %v1144_v33 = vadd.f32 %v1143_v32, %v7284_v6  ;;  %v1145_v34 = vpop.f32.mrb[31].mxu0 }
 0x237   : > { %v1146_v36 = vadd.f32 %v1145_v34, %v7288_v8 }
 0x238   : > { %v7437_v37 = vpack.c.bf16 %v1144_v33, %v1140_v27 }
 0x239   : > { %v7439_v42 = vpack.c.bf16 %v1146_v36, %v1142_v35 }
 0x23b   : > { %5782 = vmatprep.subr.msk.bf16.mxu0 %vm1261_vm0, %v7439_v42  ;;  %v1308_v43 = vsel %vm1261_vm0, %v7439_v42, 0 }
 0x23c   : > { %5486 = vmatpush3.bf16.xpose.msra.mxu0 %v1308_v43 }
 0x243   : > { %5488 = vmatmul.mubr.msk.bf16.vlgmr.msra.gmra.mrb[32].mxu0 %vm1261_vm0, %v7311_v29 }
 0x244   : > { %5491 = vmatprep.mubr.msk.bf16.mxu0 %vm1261_vm0, %v7331_v49 }
 0x24b   : > { %5492 = vmatmul.mubr.msk.bf16.gmra.mrb[36].mxu0 %vm1261_vm0, %v7356_v11 }
 0x24c   : > { %5495 = vmatprep.mubr.msk.bf16.mxu0 %vm1261_vm0, %v7380_v38 }
 0x253   : > { %5496 = vmatmul.mubr.msk.bf16.gmra.mrb[40].mxu0 %vm1261_vm0, %v7404_v63 }
 0x254   : > { %5499 = vmatprep.mubr.msk.bf16.mxu0 %vm1261_vm0, %v7424_v23 }
 0x25b   : > { %5500 = vmatmul.mubr.msk.bf16.gmra.mrb[44].mxu0 %vm1261_vm0, %v7437_v37 }
 0x275   : > { %v7459_v6 = vpop.permute.xlu0 %1760 }
 0x276   : > { %5783 = vmatprep.subr.msk.bf16.mxu1 %vm1261_vm0, %v7459_v6 }
 0x27d   : > { %v1763_v7 = vpop.permute.xlu1 %1762 }
 0x285   : > { %v1765_v9 = vpop.permute.xlu0 %1764 }
 0x316   : > { %v7463_v8 = vpop.f32.mrb[32].mxu0 }
 0x317   : > { %1411 = vmax.xlane.f32.xlu1 %v7463_v8  ;;  %v1344_v44 = vpop.f32.mrb[33].mxu0 }
 0x318   : > { %1407 = vmax.xlane.f32.xlu0 %v1344_v44  ;;  %v7466_v45 = vpop.f32.mrb[34].mxu0 }
 0x319   : > { %v7468_v46 = vpop.f32.mrb[35].mxu0 }
 0x31b   : > { %1413 = vmax.xlane.f32.xlu1 %v7466_v45 }
 0x31c   : > { %1409 = vmax.xlane.f32.xlu0 %v7468_v46 }
 0x31e   : > { %v7472_v47 = vpop.f32.mrb[36].mxu0 }
 0x31f   : > { %v7474_v48 = vpop.f32.mrb[37].mxu0 }
 0x320   : > { %v7476_v53 = vpop.f32.mrb[38].mxu0 }
 0x321   : > { %v7478_v54 = vpop.f32.mrb[39].mxu0 }
 0x326   : > { %v7480_v55 = vpop.f32.mrb[40].mxu0 }
 0x327   : > { %v7482_v56 = vpop.f32.mrb[41].mxu0 }
 0x328   : > { %v7484_v57 = vpop.f32.mrb[42].mxu0 }
 0x329   : > { %v7486_v58 = vpop.f32.mrb[43].mxu0 }
 0x32c   : > { %1766 = vrot.lane.b32.xlu1 %v7360_v13, %s6687_s7 }
 0x32e   : > { %v7490_v59 = vpop.f32.mrb[44].mxu0 }
 0x32f   : > { %v7492_v60 = vpop.f32.mrb[45].mxu0 }
 0x330   : > { %v7494_v61 = vpop.f32.mrb[46].mxu0 }
 0x331   : > { %v7496_v62 = vpop.f32.mrb[47].mxu0 }
 0x332   : > { %1768 = vrot.lane.b32.xlu0 %v7384_v40, %s6687_s7 }
 0x350   : > { %1415 = vmax.xlane.f32.xlu1 %v7474_v48 }
 0x351   : > { %1419 = vmax.xlane.f32.xlu0 %v7472_v47 }
 0x354   : > { %1421 = vmax.xlane.f32.xlu1 %v7476_v53 }
 0x355   : > { %1423 = vmax.xlane.f32.xlu0 %v7482_v56 }
 0x358   : > { %1417 = vmax.xlane.f32.xlu1 %v7478_v54 }
 0x359   : > { %1425 = vmax.xlane.f32.xlu0 %v7486_v58 }
 0x35c   : > { %1427 = vmax.xlane.f32.xlu1 %v7480_v55 }
 0x35d   : > { %1435 = vmax.xlane.f32.xlu0 %v7490_v59 }
 0x360   : > { %1429 = vmax.xlane.f32.xlu1 %v7484_v57 }
 0x364   : > { %1431 = vmax.xlane.f32.xlu1 %v7492_v60 }
 0x368   : > { %1437 = vmax.xlane.f32.xlu1 %v7494_v61 }
 0x36c   : > { %1433 = vmax.xlane.f32.xlu1 %v7496_v62 }
 0x373   : > { %1772 = vrot.lane.b32.xlu0 %v7426_v24, %s6687_s7 }
 0x377   : > { %1774 = vrot.lane.b32.xlu0 %v7439_v42, %s6687_s7 }
 0x37b   : > { %1736 = vrot.lane.b32.xlu0 %v7294_v16, %s6687_s7 }
 0x37d   : > { %1770 = vrot.lane.b32.xlu1 %v7408_v1, %s6687_s7 }
 0x37f   : > { %1740 = vrot.lane.b32.xlu0 %v7331_v49, %s6687_s7 }
 0x381   : > { %1738 = vrot.lane.b32.xlu1 %v7311_v29, %s6687_s7 }
 0x383   : > { %1744 = vrot.lane.b32.xlu0 %v7380_v38, %s6687_s7 }
 0x385   : > { %1742 = vrot.lane.b32.xlu1 %v7356_v11, %s6687_s7 }
 0x387   : > { %1748 = vrot.lane.b32.xlu0 %v7424_v23, %s6687_s7 }
 0x389   : > { %1746 = vrot.lane.b32.xlu1 %v7404_v63, %s6687_s7 }
 0x38b   : > { %2113 = vrot.lane.b32.xlu0 %v7337_v52, %s6687_s7 }
 0x38d   : > { %1750 = vrot.lane.b32.xlu1 %v7437_v37, %s6687_s7 }
 0x38f   : > { %2117 = vrot.lane.b32.xlu0 %v7362_v14, %s6687_s7 }
 0x391   : > { %2115 = vrot.lane.b32.xlu1 %v7333_v50, %s6687_s7 }
 0x393   : > { %2125 = vrot.lane.b32.xlu0 %v7410_v4, %s6687_s7 }
 0x395   : > { %2119 = vrot.lane.b32.xlu1 %v7358_v12, %s6687_s7 }
 0x397   : > { %2315 = vrot.lane.b32.xlu0 %v7296_v17, %s6688_s9 }
 0x399   : > { %2121 = vrot.lane.b32.xlu1 %v7386_v41, %s6687_s7 }
 0x39b   : > { %2317 = vrot.lane.b32.xlu0 %v7313_v30, %s6688_s9 }
 0x39d   : > { %2123 = vrot.lane.b32.xlu1 %v7382_v39, %s6687_s7 }
 0x39f   : > { %2321 = vrot.lane.b32.xlu0 %v7360_v13, %s6688_s9 }
 0x3a1   : > { %2127 = vrot.lane.b32.xlu1 %v7406_v0, %s6687_s7 }
 0x3a4   : > { %v1412_v31 = vpop.xlane.xlu1 %1411 }
 0x3a5   : > { %v1408_v10 = vpop.xlane.xlu0 %1407  ;;  %2319 = vrot.lane.b32.xlu1 %v7335_v51, %s6688_s9  ;;  %v1441_v19 = vsub.f32 %v7463_v8, %v1412_v31 }
 0x3a6   : > { %v1439_v15 = vsub.f32 %v1344_v44, %v1408_v10  ;;  %v1801_v44 = vsel %vm1261_vm0, %v7459_v6, 0 }
 0x3a7   : > { %v1459_v27 = vmul.f32 1.442695, %v1441_v19 }
 0x3a8   : > { %v1455_v20 = vmul.f32 1.442695, %v1439_v15  ;;  %v1414_v21 = vpop.xlane.xlu1 %1413 }
 0x3a9   : > { %v1442_v22 = vsub.f32 %v7466_v45, %v1414_v21  ;;  %v1410_v25 = vpop.xlane.xlu0 %1409  ;;  %v1804_v45 = vsel %vm1261_vm0, %v1763_v7, 0 }
 0x3aa   : > { %v1440_v26 = vsub.f32 %v7468_v46, %v1410_v25  ;;  %6025 = vpow2.f32 %v1455_v20  ;;  %v1807_v46 = vsel %vm1261_vm0, %v1765_v9, 0 }
 0x3ab   : > { %v1461_v28 = vmul.f32 1.442695, %v1442_v22 }
 0x3ac   : > { %v1457_v32 = vmul.f32 1.442695, %v1440_v26  ;;  %v1767_v31 = vpop.permute.xlu1 %1766 }
 0x3ad   : > { %6027 = vpow2.f32 %v1461_v28  ;;  %v1810_v10 = vsel %vm1261_vm0, %v1767_v31, 0  ;;  %v1769_v15 = vpop.permute.xlu0 %1768 }
 0x3ae   : > { %6029 = vpow2.f32 %v1457_v32  ;;  %v1813_v6 = vsel %vm1261_vm0, %v1769_v15, 0 }
 0x3af   : > { %6031 = vpow2.f32 %v1459_v27 }
 0x3b4   : > { %v7561_v33 = vpop.eup %6025 }
 0x3b7   : > { %v7563_v34 = vpop.eup %6027 }
 0x3b8   : > { %v7565_v35 = vpop.eup %6029 }
 0x3b9   : > { %v7567_v36 = vpop.eup %6031  ;;  %v1583_v43 = vpack.c.bf16 %v7565_v35, %v7561_v33 }
 0x3ba   : > { %v1584_v8 = vpack.c.bf16 %v7563_v34, %v7567_v36 }
 0x3bb   : > { %5519 = vmatprep.mubr.bf16.mxu1 %v1583_v43 }
 0x3bc   : > { %5520 = vmatmul.mubr.bf16.vlgmr.msra.gmra.mrb[16].mxu1 %v1584_v8 }
 0x3bd   : > { %5536 = vmatpush3.bf16.xpose.msra.mxu1 %v1801_v44 }
 0x3be   : > { %5784 = vmatprep.subr.msk.bf16.mxu1 %vm1261_vm0, %v1763_v7 }
 0x3c5   : > { %5538 = vmatpush3.bf16.xpose.msra.mxu1 %v1804_v45 }
 0x3c6   : > { %5785 = vmatprep.subr.msk.bf16.mxu1 %vm1261_vm0, %v1765_v9 }
 0x3cd   : > { %5540 = vmatpush3.bf16.xpose.msra.mxu1 %v1807_v46 }
 0x3ce   : > { %5786 = vmatprep.subr.msk.bf16.mxu1 %vm1261_vm0, %v1767_v31 }
 0x3d5   : > { %5542 = vmatpush3.bf16.xpose.msra.mxu1 %v1810_v10 }
 0x3d6   : > { %5787 = vmatprep.subr.msk.bf16.mxu1 %vm1261_vm0, %v1769_v15 }
 0x3dd   : > { %5544 = vmatpush3.bf16.xpose.msra.mxu1 %v1813_v6  ;;  %v1416_v19 = vpop.xlane.xlu1 %1415 }
 0x3de   : > { %v1443_v7 = vsub.f32 %v7474_v48, %v1416_v19  ;;  %v1420_v20 = vpop.xlane.xlu0 %1419 }
 0x3df   : > { %v1445_v21 = vsub.f32 %v7472_v47, %v1420_v20 }
 0x3e0   : > { %v1463_v22 = vmul.f32 1.442695, %v1443_v7 }
 0x3e1   : > { %v1422_v9 = vpop.xlane.xlu1 %1421  ;;  %v1467_v27 = vmul.f32 1.442695, %v1445_v21 }
 0x3e2   : > { %v1446_v25 = vsub.f32 %v7476_v53, %v1422_v9  ;;  %v1424_v26 = vpop.xlane.xlu0 %1423  ;;  %6033 = vpow2.f32 %v1463_v22 }
 0x3e3   : > { %v1447_v28 = vsub.f32 %v7482_v56, %v1424_v26  ;;  %6035 = vpow2.f32 %v1467_v27 }
 0x3e4   : > { %v1469_v32 = vmul.f32 1.442695, %v1446_v25 }
 0x3e5   : > { %v1471_v43 = vmul.f32 1.442695, %v1447_v28  ;;  %v1418_v8 = vpop.xlane.xlu1 %1417 }
 0x3e6   : > { %v1444_v44 = vsub.f32 %v7478_v54, %v1418_v8  ;;  %v1426_v45 = vpop.xlane.xlu0 %1425  ;;  %6037 = vpow2.f32 %v1469_v32 }
 0x3e7   : > { %v1448_v48 = vsub.f32 %v7486_v58, %v1426_v45  ;;  %6039 = vpow2.f32 %v1471_v43 }
 0x3e8   : > { %v1465_v47 = vmul.f32 1.442695, %v1444_v44 }
 0x3e9   : > { %v1473_v46 = vmul.f32 1.442695, %v1448_v48  ;;  %v1428_v31 = vpop.xlane.xlu1 %1427 }
 0x3ea   : > { %6041 = vpow2.f32 %v1465_v47  ;;  %v1449_v53 = vsub.f32 %v7480_v55, %v1428_v31  ;;  %v1436_v10 = vpop.xlane.xlu0 %1435 }
 0x3eb   : > { %6043 = vpow2.f32 %v1473_v46  ;;  %v1453_v44 = vsub.f32 %v7490_v59, %v1436_v10 }
 0x3ec   : > { %v1475_v56 = vmul.f32 1.442695, %v1449_v53  ;;  %v7591_v54 = vpop.eup %6033 }
 0x3ed   : > { %v1430_v15 = vpop.xlane.xlu1 %1429  ;;  %v7593_v20 = vpop.eup %6035 }
 0x3ee   : > { %v1450_v6 = vsub.f32 %v7484_v57, %v1430_v15  ;;  %v1773_v19 = vpop.permute.xlu0 %1772  ;;  %6045 = vpow2.f32 %v1475_v56 }
 0x3f0   : > { %v1477_v7 = vmul.f32 1.442695, %v1450_v6  ;;  %v7595_v21 = vpop.eup %6037 }
 0x3f1   : > { %v1432_v58 = vpop.xlane.xlu1 %1431  ;;  %v7597_v22 = vpop.eup %6039  ;;  %v1586_v43 = vpack.c.bf16 %v7595_v21, %v7593_v20 }
 0x3f2   : > { %6047 = vpow2.f32 %v1477_v7  ;;  %v1775_v9 = vpop.permute.xlu0 %1774  ;;  %9607 = vst [vmem:[#allocation35_spill] sm:$0xff] %v7597_v22  ;;  %v1451_v25 = vsub.f32 %v7492_v60, %v1432_v58 }
 0x3f4   : > { %v7599_v55 = vpop.eup %6041  ;;  %v1479_v45 = vmul.f32 1.442695, %v1451_v25 }
 0x3f5   : > { %v7602_v26 = vpop.eup %6043  ;;  %v1438_v57 = vpop.xlane.xlu1 %1437  ;;  %v1585_v27 = vpack.c.bf16 %v7599_v55, %v7591_v54 }
 0x3f6   : > { %v1454_v28 = vsub.f32 %v7494_v61, %v1438_v57  ;;  %v1737_v32 = vpop.permute.xlu0 %1736  ;;  %v1587_v8 = vpack.c.bf16 %v7602_v26, %v7597_v22  ;;  %v1483_v61 = vmul.f32 1.442695, %v1453_v44  ;;  %6049 = vpow2.f32 %v1479_v45 }
 0x3f7   : > { %5523 = vmatprep.mubr.bf16.mxu1 %v1585_v27  ;;  %v1819_v27 = vsel %vm1261_vm0, %v1773_v19, 0 }
 0x3f8   : > { %5524 = vmatmul.mubr.bf16.gmra.mrb[20].mxu1 %v1586_v43  ;;  %v1485_v60 = vmul.f32 1.442695, %v1454_v28  ;;  %v7613_v31 = vpop.eup %6045 }
 0x3f9   : > { %5527 = vmatprep.mubr.bf16.mxu1 %v1587_v8  ;;  %v1434_v48 = vpop.xlane.xlu1 %1433  ;;  %9608 = vst [vmem:[#allocation36_spill] sm:$0xff] %v7613_v31 }
 0x3fa   : > { %v1452_v47 = vsub.f32 %v7496_v62, %v1434_v48  ;;  %v1741_v46 = vpop.permute.xlu0 %1740  ;;  %6051 = vpow2.f32 %v1485_v60  ;;  %v1822_v48 = vsel %vm1261_vm0, %v1775_v9, 0 }
 0x3fc   : > { %v7615_v53 = vpop.eup %6047  ;;  %v1481_v56 = vmul.f32 1.442695, %v1452_v47 }
 0x3fd   : > { %9609 = vst [vmem:[#allocation37_spill] sm:$0xff] %v7615_v53  ;;  %v1771_v15 = vpop.permute.xlu1 %1770  ;;  %v1588_v59 = vpack.c.bf16 %v7615_v53, %v7613_v31 }
 0x3fe   : > { %6053 = vpow2.f32 %v1481_v56  ;;  %v1745_v10 = vpop.permute.xlu0 %1744  ;;  %5788 = vmatprep.subr.msk.bf16.mxu1 %vm1261_vm0, %v1771_v15  ;;  %v1816_v6 = vsel %vm1261_vm0, %v1771_v15, 0 }
 0x3ff   : > { %6055 = vpow2.f32 %v1483_v61  ;;  %5546 = vmatpush3.bf16.xpose.msra.mxu1 %v1816_v6 }
 0x400   : > { %5528 = vmatmul.mubr.bf16.gmra.mrb[24].mxu1 %v1588_v59  ;;  %5789 = vmatprep.subr.msk.bf16.mxu1 %vm1261_vm0, %v1773_v19  ;;  %v7622_v25 = vpop.eup %6049 }
 0x401   : > { %v1739_v62 = vpop.permute.xlu1 %1738  ;;  %9610 = vst [vmem:[#allocation38_spill] sm:$0xff] %v7622_v25 }
 0x402   : > { %v1749_v7 = vpop.permute.xlu0 %1748 }
 0x404   : > { %v7625_v28 = vpop.eup %6051 }
 0x405   : > { %v1743_v58 = vpop.permute.xlu1 %1742  ;;  %9611 = vst [vmem:[#allocation39_spill] sm:$0xff] %v7625_v28 }
 0x406   : > { %v2114_v57 = vpop.permute.xlu0 %2113 }
 0x407   : > { %5548 = vmatpush3.bf16.xpose.msra.mxu1 %v1819_v27  ;;  %5567 = vmatprep.subr.bf16.mxu0 %v2114_v57 }
 0x408   : > { %v7627_v43 = vpop.eup %6053  ;;  %5790 = vmatprep.subr.msk.bf16.mxu1 %vm1261_vm0, %v1775_v9  ;;  %5568 = vmatpush3.bf16.msra.mxu0 %v2114_v57 }
 0x409   : > { %9612 = vst [vmem:[#allocation40_spill] sm:$0xff] %v7627_v43  ;;  %v7630_v8 = vpop.eup %6055  ;;  %v1747_v44 = vpop.permute.xlu1 %1746  ;;  %v1589_v45 = vpack.c.bf16 %v7627_v43, %v7622_v25 }
 0x40a   : > { %9613 = vst [vmem:[#allocation41_spill] sm:$0xff] %v7630_v8  ;;  %v1590_v60 = vpack.c.bf16 %v7625_v28, %v7630_v8  ;;  %v2118_v61 = vpop.permute.xlu0 %2117 }
 0x40b   : > { %5531 = vmatprep.mubr.bf16.mxu1 %v1589_v45 }
 0x40c   : > { %5532 = vmatmul.mubr.bf16.gmra.mrb[28].mxu1 %v1590_v60 }
 0x40d   : > { %5551 = vmatprep.mubr.msk.bf16.mxu1 %vm1261_vm0, %v1737_v32  ;;  %v1751_v19 = vpop.permute.xlu1 %1750 }
 0x40e   : > { %v2126_v9 = vpop.permute.xlu0 %2125 }
 0x40f   : > { %5550 = vmatpush3.bf16.xpose.msra.mxu1 %v1822_v48 }
 0x411   : > { %v2116_v47 = vpop.permute.xlu1 %2115 }
 0x412   : > { %5569 = vmatprep.subr.bf16.mxu0 %v2116_v47 }
 0x413   : > { %5570 = vmatpush3.bf16.msra.mxu0 %v2116_v47 }
 0x414   : > { %5571 = vmatprep.subr.bf16.mxu0 %v2118_v61 }
 0x415   : > { %v2120_v56 = vpop.permute.xlu1 %2119 }
 0x416   : > { %5552 = vmatmul.mubr.msk.bf16.vlgmr.msra.gmra.mrb[32].mxu1 %vm1261_vm0, %v1739_v62 }
 0x417   : > { %5555 = vmatprep.mubr.msk.bf16.mxu1 %vm1261_vm0, %v1741_v46  ;;  %5572 = vmatpush3.bf16.msra.mxu0 %v2118_v61  ;;  %v7644_v46 = vpop.permute.xlu0 %2315 }
 0x418   : > { %5573 = vmatprep.subr.bf16.mxu0 %v2120_v56 }
 0x419   : > { %v2122_v15 = vpop.permute.xlu1 %2121 }
 0x41b   : > { %5574 = vmatpush3.bf16.msra.mxu0 %v2120_v56 }
 0x41c   : > { %5575 = vmatprep.subr.bf16.mxu0 %v2122_v15 }
 0x41d   : > { %v2124_v32 = vpop.permute.xlu1 %2123 }
 0x41e   : > { %5556 = vmatmul.mubr.msk.bf16.gmra.mrb[36].mxu1 %vm1261_vm0, %v1743_v58 }
 0x41f   : > { %5559 = vmatprep.mubr.msk.bf16.mxu1 %vm1261_vm0, %v1745_v10  ;;  %5576 = vmatpush3.bf16.msra.mxu0 %v2122_v15 }
 0x420   : > { %5577 = vmatprep.subr.bf16.mxu0 %v2124_v32 }
 0x421   : > { %v2128_v59 = vpop.permute.xlu1 %2127 }
 0x423   : > { %5578 = vmatpush3.bf16.msra.mxu0 %v2124_v32 }
 0x424   : > { %5579 = vmatprep.subr.bf16.mxu0 %v2126_v9 }
 0x426   : > { %5560 = vmatmul.mubr.msk.bf16.gmra.mrb[40].mxu1 %vm1261_vm0, %v1747_v44 }
 0x427   : > { %5563 = vmatprep.mubr.msk.bf16.mxu1 %vm1261_vm0, %v1749_v7  ;;  %5580 = vmatpush3.bf16.msra.mxu0 %v2126_v9 }
 0x428   : > { %5581 = vmatprep.subr.bf16.mxu0 %v2128_v59 }
 0x42b   : > { %5582 = vmatpush3.bf16.msra.mxu0 %v2128_v59 }
 0x42c   : > { %5791 = vmatprep.subr.msk.bf16.mxu0 %vm1261_vm0, %v7644_v46 }
 0x42e   : > { %5564 = vmatmul.mubr.msk.bf16.gmra.mrb[44].mxu1 %vm1261_vm0, %v1751_v19 }
 0x48f   : > { %v7649_v10 = vpop.f32.mrb[16].mxu1 }
 0x490   : > { %9614 = vst [vmem:[#allocation42_spill] sm:$0xff] %v7649_v10  ;;  %v7651_v6 = vpop.f32.mrb[17].mxu1 }
 0x491   : > { %9615 = vst [vmem:[#allocation43_spill] sm:$0xff] %v7651_v6  ;;  %v7653_v62 = vpop.f32.mrb[18].mxu1 }
 0x492   : > { %9616 = vst [vmem:[#allocation44_spill] sm:$0xff] %v7653_v62  ;;  %v7655_v58 = vpop.f32.mrb[19].mxu1 }
 0x493   : > { %9617 = vst [vmem:[#allocation45_spill] sm:$0xff] %v7655_v58 }
 0x4cb   : > { %v7657_v57 = vpop.f32.mrb[20].mxu1 }
 0x4cc   : > { %9618 = vst [vmem:[#allocation46_spill] sm:$0xff] %v7657_v57  ;;  %v7659_v7 = vpop.f32.mrb[21].mxu1  ;;  %v7774_v57 = vpop.permute.xlu1 %2319 }
 0x4cd   : > { %9619 = vst [vmem:[#allocation47_spill] sm:$0xff] %v7659_v7  ;;  %v7661_v27 = vpop.f32.mrb[22].mxu1 }
 0x4ce   : > { %9620 = vst [vmem:[#allocation48_spill] sm:$0xff] %v7661_v27  ;;  %v7663_v44 = vpop.f32.mrb[23].mxu1 }
 0x4cf   : > { %9621 = vst [vmem:[#allocation49_spill] sm:$0xff] %v7663_v44 }
 0x4d3   : > { %v7665_v45 = vpop.f32.mrb[24].mxu1 }
 0x4d4   : > { %9622 = vst [vmem:[#allocation50_spill] sm:$0xff] %v7665_v45  ;;  %v7667_v60 = vpop.f32.mrb[25].mxu1 }
 0x4d5   : > { %9623 = vst [vmem:[#allocation51_spill] sm:$0xff] %v7667_v60  ;;  %v7669_v19 = vpop.f32.mrb[26].mxu1 }
 0x4d6   : > { %9624 = vst [vmem:[#allocation52_spill] sm:$0xff] %v7669_v19  ;;  %v7671_v48 = vpop.f32.mrb[27].mxu1 }
 0x4d7   : > { %9625 = vst [vmem:[#allocation53_spill] sm:$0xff] %v7671_v48 }
 0x4df   : > { %v7673_v47 = vpop.f32.mrb[28].mxu1 }
 0x4e0   : > { %9626 = vst [vmem:[#allocation54_spill] sm:$0xff] %v7673_v47  ;;  %v7675_v61 = vpop.f32.mrb[29].mxu1 }
 0x4e1   : > { %9627 = vst [vmem:[#allocation55_spill] sm:$0xff] %v7675_v61  ;;  %v7677_v56 = vpop.f32.mrb[30].mxu1 }
 0x4e2   : > { %9628 = vst [vmem:[#allocation56_spill] sm:$0xff] %v7677_v56  ;;  %v7679_v15 = vpop.f32.mrb[31].mxu1 }
 0x4e3   : > { %9629 = vst [vmem:[#allocation57_spill] sm:$0xff] %v7679_v15 }
 0x4e9   : > { %v7681_v32 = vpop.f32.mrb[32].mxu1 }
 0x4ea   : > { %1925 = vmax.xlane.f32.xlu0 %v7681_v32  ;;  %v7684_v9 = vpop.f32.mrb[33].mxu1 }
 0x4eb   : > { %v7686_v59 = vpop.f32.mrb[34].mxu1 }
 0x4ec   : > { %v1861_v5 = vpop.f32.mrb[35].mxu1 }
 0x4ed   : > { %1923 = vmax.xlane.f32.xlu1 %v1861_v5 }
 0x4ee   : > { %1921 = vmax.xlane.f32.xlu0 %v7684_v9 }
 0x4f1   : > { %v7689_v3 = vpop.f32.mrb[36].mxu1 }
 0x4f2   : > { %1927 = vmax.xlane.f32.xlu0 %v7686_v59  ;;  %1933 = vmax.xlane.f32.xlu1 %v7689_v3  ;;  %v7693_v18 = vpop.f32.mrb[37].mxu1 }
 0x4f3   : > { %v7695_v2 = vpop.f32.mrb[38].mxu1 }
 0x4f4   : > { %v7697_v56 = vpop.f32.mrb[39].mxu1 }
 0x4f6   : > { %1929 = vmax.xlane.f32.xlu1 %v7693_v18  ;;  %1931 = vmax.xlane.f32.xlu0 %v7697_v56 }
 0x4f9   : > { %v7701_v47 = vpop.f32.mrb[40].mxu1 }
 0x4fa   : > { %1935 = vmax.xlane.f32.xlu1 %v7695_v2  ;;  %1941 = vmax.xlane.f32.xlu0 %v7701_v47  ;;  %v7705_v15 = vpop.f32.mrb[41].mxu1 }
 0x4fb   : > { %v7707_v61 = vpop.f32.mrb[42].mxu1 }
 0x4fc   : > { %v7709_v28 = vpop.f32.mrb[43].mxu1 }
 0x4fe   : > { %1937 = vmax.xlane.f32.xlu1 %v7705_v15 }
 0x501   : > { %v7712_v43 = vpop.f32.mrb[44].mxu1 }
 0x502   : > { %1943 = vmax.xlane.f32.xlu1 %v7707_v61  ;;  %v7715_v45 = vpop.f32.mrb[45].mxu1 }
 0x503   : > { %1945 = vmax.xlane.f32.xlu0 %v7715_v45  ;;  %v7718_v19 = vpop.f32.mrb[46].mxu1 }
 0x504   : > { %v7720_v60 = vpop.f32.mrb[47].mxu1 }
 0x506   : > { %1939 = vmax.xlane.f32.xlu1 %v7709_v28 }
 0x50a   : > { %1949 = vmax.xlane.f32.xlu1 %v7712_v43 }
 0x50e   : > { %1951 = vmax.xlane.f32.xlu1 %v7718_v19 }
 0x519   : > { %2325 = vrot.lane.b32.xlu0 %v7408_v1, %s6688_s9 }
 0x51f   : > { %2323 = vrot.lane.b32.xlu1 %v7384_v40, %s6688_s9 }
 0x523   : > { %2301 = vrot.lane.b32.xlu1 %v7311_v29, %s6688_s9 }
 0x527   : > { %2305 = vrot.lane.b32.xlu1 %v7356_v11, %s6688_s9 }
 0x52b   : > { %2309 = vrot.lane.b32.xlu1 %v7404_v63, %s6688_s9 }
 0x52f   : > { %2313 = vrot.lane.b32.xlu1 %v7437_v37, %s6688_s9 }
 0x533   : > { %2662 = vrot.lane.b32.xlu1 %v7333_v50, %s6688_s9 }
 0x537   : > { %2666 = vrot.lane.b32.xlu1 %v7358_v12, %s6688_s9 }
 0x538   : > { %1947 = vmax.xlane.f32.xlu0 %v7720_v60 }
 0x53b   : > { %2668 = vrot.lane.b32.xlu1 %v7386_v41, %s6688_s9 }
 0x53f   : > { %2670 = vrot.lane.b32.xlu1 %v7382_v39, %s6688_s9 }
 0x543   : > { %2674 = vrot.lane.b32.xlu1 %v7406_v0, %s6688_s9 }
 0x547   : > { %2866 = vrot.lane.b32.xlu1 %v7335_v51, %s6689_s21  ;;  %v7766_v51 = vpop.permute.xlu0 %2317 }
 0x54b   : > { %v7772_v48 = vpop.permute.xlu0 %2321 }
 0x54e   : > { %2327 = vrot.lane.b32.xlu0 %v7426_v24, %s6688_s9 }
 0x552   : > { %2329 = vrot.lane.b32.xlu0 %v7439_v42, %s6688_s9 }
 0x556   : > { %2299 = vrot.lane.b32.xlu0 %v7294_v16, %s6688_s9 }
 0x55a   : > { %2303 = vrot.lane.b32.xlu0 %v7331_v49, %s6688_s9 }
 0x55e   : > { %2307 = vrot.lane.b32.xlu0 %v7380_v38, %s6688_s9 }
 0x562   : > { %2311 = vrot.lane.b32.xlu0 %v7424_v23, %s6688_s9 }
 0x566   : > { %2660 = vrot.lane.b32.xlu0 %v7337_v52, %s6688_s9 }
 0x56a   : > { %2664 = vrot.lane.b32.xlu0 %v7362_v14, %s6688_s9 }
 0x56e   : > { %2672 = vrot.lane.b32.xlu0 %v7410_v4, %s6688_s9 }
 0x572   : > { %2862 = vrot.lane.b32.xlu0 %v7296_v17, %s6689_s21 }
 0x576   : > { %2864 = vrot.lane.b32.xlu0 %v7313_v30, %s6689_s21 }
 0x577   : > { %v1926_v27 = vpop.xlane.xlu0 %1925 }
 0x578   : > { %v1955_v7 = vsub.f32 %v7681_v32, %v1926_v27 }
 0x57a   : > { %2868 = vrot.lane.b32.xlu0 %v7360_v13, %s6689_s21  ;;  %v1924_v8 = vpop.xlane.xlu1 %1923  ;;  %v1973_v6 = vmul.f32 1.442695, %v1955_v7 }
 0x57b   : > { %v1954_v44 = vsub.f32 %v1861_v5, %v1924_v8  ;;  %v1922_v25 = vpop.xlane.xlu0 %1921 }
 0x57c   : > { %v1953_v10 = vsub.f32 %v7684_v9, %v1922_v25 }
 0x57d   : > { %v1971_v62 = vmul.f32 1.442695, %v1954_v44 }
 0x57e   : > { %v1969_v17 = vmul.f32 1.442695, %v1953_v10 }
 0x57f   : > { %6057 = vpow2.f32 %v1971_v62  ;;  %v1928_v58 = vpop.xlane.xlu0 %1927  ;;  %v1934_v31 = vpop.xlane.xlu1 %1933 }
 0x580   : > { %6059 = vpow2.f32 %v1969_v17  ;;  %v1956_v30 = vsub.f32 %v7686_v59, %v1928_v58  ;;  %v1959_v27 = vsub.f32 %v7689_v3, %v1934_v31 }
 0x581   : > { %6061 = vpow2.f32 %v1973_v6 }
 0x582   : > { %v1975_v53 = vmul.f32 1.442695, %v1956_v30  ;;  %v1981_v62 = vmul.f32 1.442695, %v1959_v27  ;;  %v2356_v30 = vsel %vm1261_vm0, %v7644_v46, 0 }
 0x583   : > { %v1932_v22 = vpop.xlane.xlu0 %1931  ;;  %v1930_v13 = vpop.xlane.xlu1 %1929 }
 0x584   : > { %6063 = vpow2.f32 %v1975_v53  ;;  %v1958_v5 = vsub.f32 %v7697_v56, %v1932_v22  ;;  %v1957_v25 = vsub.f32 %v7693_v18, %v1930_v13 }
 0x586   : > { %v1979_v8 = vmul.f32 1.442695, %v1958_v5  ;;  %v1977_v10 = vmul.f32 1.442695, %v1957_v25 }
 0x587   : > { %v1936_v7 = vpop.xlane.xlu1 %1935  ;;  %v1942_v31 = vpop.xlane.xlu0 %1941 }
 0x588   : > { %6065 = vpow2.f32 %v1979_v8  ;;  %v1960_v44 = vsub.f32 %v7695_v2, %v1936_v7  ;;  %v1963_v17 = vsub.f32 %v7701_v47, %v1942_v31  ;;  %v2362_v31 = vsel %vm1261_vm0, %v7774_v57, 0 }
 0x589   : > { %v7787_v32 = vpop.eup %6057  ;;  %6067 = vpow2.f32 %v1977_v10 }
 0x58a   : > { %v7789_v6 = vpop.eup %6059  ;;  %v1983_v58 = vmul.f32 1.442695, %v1960_v44  ;;  %6069 = vpow2.f32 %v1981_v62 }
 0x58b   : > { %v1938_v53 = vpop.xlane.xlu1 %1937  ;;  %v2097_v3 = vpack.c.bf16 %v7787_v32, %v7789_v6  ;;  %v7793_v22 = vpop.eup %6061 }
 0x58c   : > { %6071 = vpow2.f32 %v1983_v58  ;;  %v1961_v2 = vsub.f32 %v7705_v15, %v1938_v53 }
 0x58d   : > { %5583 = vmatprep.mubr.bf16.mxu0 %v2097_v3 }
 0x58e   : > { %v7795_v18 = vpop.eup %6063  ;;  %v1985_v27 = vmul.f32 1.442695, %v1961_v2 }
 0x58f   : > { %v1944_v56 = vpop.xlane.xlu1 %1943  ;;  %v2098_v9 = vpack.c.bf16 %v7795_v18, %v7793_v22 }
 0x590   : > { %v1964_v59 = vsub.f32 %v7707_v61, %v1944_v56  ;;  %v1989_v61 = vmul.f32 1.442695, %v1963_v17  ;;  %6073 = vpow2.f32 %v1985_v27 }
 0x591   : > { %5584 = vmatmul.mubr.bf16.vlgmr.msra.gmra.mrb[48].mxu0 %v2098_v9 }
 0x592   : > { %v7804_v13 = vpop.eup %6065  ;;  %5600 = vmatpush3.bf16.xpose.msra.mxu0 %v2356_v30  ;;  %v1991_v25 = vmul.f32 1.442695, %v1964_v59  ;;  %v2365_v59 = vsel %vm1261_vm0, %v7772_v48, 0 }
 0x593   : > { %v7806_v5 = vpop.eup %6067  ;;  %5792 = vmatprep.subr.msk.bf16.mxu0 %vm1261_vm0, %v7766_v51  ;;  %v1940_v15 = vpop.xlane.xlu1 %1939 }
 0x594   : > { %v1962_v8 = vsub.f32 %v7709_v28, %v1940_v15  ;;  %v2099_v47 = vpack.c.bf16 %v7804_v13, %v7806_v5  ;;  %v7813_v10 = vpop.eup %6069  ;;  %6075 = vpow2.f32 %v1991_v25  ;;  %v2359_v28 = vsel %vm1261_vm0, %v7766_v51, 0 }
 0x596   : > { %v1987_v46 = vmul.f32 1.442695, %v1962_v8  ;;  %5587 = vmatprep.mubr.bf16.mxu0 %v2099_v47  ;;  %v7815_v7 = vpop.eup %6071 }
 0x597   : > { %v2100_v62 = vpack.c.bf16 %v7815_v7, %v7813_v10  ;;  %v1950_v44 = vpop.xlane.xlu1 %1949 }
 0x598   : > { %6077 = vpow2.f32 %v1987_v46 }
 0x599   : > { %6079 = vpow2.f32 %v1989_v61  ;;  %5588 = vmatmul.mubr.bf16.gmra.mrb[52].mxu0 %v2100_v62 }
 0x59a   : > { %5602 = vmatpush3.bf16.xpose.msra.mxu0 %v2359_v28  ;;  %v7823_v58 = vpop.eup %6073 }
 0x59b   : > { %5793 = vmatprep.subr.msk.bf16.mxu0 %vm1261_vm0, %v7774_v57  ;;  %v1952_v9 = vpop.xlane.xlu1 %1951  ;;  %v1946_v57 = vpop.xlane.xlu0 %1945 }
 0x59c   : > { %v1965_v15 = vsub.f32 %v7715_v45, %v1946_v57  ;;  %v1968_v8 = vsub.f32 %v7718_v19, %v1952_v9 }
 0x59e   : > { %v7825_v53 = vpop.eup %6075  ;;  %v1993_v47 = vmul.f32 1.442695, %v1965_v15  ;;  %v1999_v61 = vmul.f32 1.442695, %v1968_v8 }
 0x59f   : > { %v2324_v17 = vpop.permute.xlu1 %2323  ;;  %v2326_v27 = vpop.permute.xlu0 %2325 }
 0x5a0   : > { %v2368_v30 = vsel %vm1261_vm0, %v2324_v17, 0  ;;  %v2371_v25 = vsel %vm1261_vm0, %v2326_v27, 0  ;;  %6081 = vpow2.f32 %v1993_v47 }
 0x5a1   : > { %6083 = vpow2.f32 %v1999_v61 }
 0x5a2   : > { %v7827_v3 = vpop.eup %6077  ;;  %5604 = vmatpush3.bf16.xpose.msra.mxu0 %v2362_v31 }
 0x5a3   : > { %v7831_v2 = vpop.eup %6079  ;;  %v2101_v51 = vpack.c.bf16 %v7827_v3, %v7823_v58  ;;  %5794 = vmatprep.subr.msk.bf16.mxu0 %vm1261_vm0, %v7772_v48  ;;  %v1967_v48 = vsub.f32 %v7712_v43, %v1950_v44 }
 0x5a4   : > { %v2102_v56 = vpack.c.bf16 %v7825_v53, %v7831_v2 }
 0x5a5   : > { %5591 = vmatprep.mubr.bf16.mxu0 %v2101_v51  ;;  %v1997_v28 = vmul.f32 1.442695, %v1967_v48  ;;  %v2302_v51 = vpop.permute.xlu1 %2301 }
 0x5a6   : > { %5592 = vmatmul.mubr.bf16.gmra.mrb[56].mxu0 %v2102_v56 }
 0x5a9   : > { %v2306_v43 = vpop.permute.xlu1 %2305 }
 0x5aa   : > { %5606 = vmatpush3.bf16.xpose.msra.mxu0 %v2365_v59  ;;  %v7852_v9 = vpop.eup %6081 }
 0x5ab   : > { %5795 = vmatprep.subr.msk.bf16.mxu0 %vm1261_vm0, %v2324_v17  ;;  %v7855_v59 = vpop.eup %6083 }
 0x5b2   : > { %5608 = vmatpush3.bf16.xpose.msra.mxu0 %v2368_v30  ;;  %v2310_v30 = vpop.permute.xlu1 %2309 }
 0x5b3   : > { %5796 = vmatprep.subr.msk.bf16.mxu0 %vm1261_vm0, %v2326_v27 }
 0x5b6   : > { %v2314_v48 = vpop.permute.xlu1 %2313 }
 0x5ba   : > { %5610 = vmatpush3.bf16.xpose.msra.mxu0 %v2371_v25  ;;  %v2663_v61 = vpop.permute.xlu1 %2662 }
 0x5c5   : > { %v1948_v46 = vpop.xlane.xlu0 %1947 }
 0x5c6   : > { %v1966_v62 = vsub.f32 %v7720_v60, %v1948_v46 }
 0x5c8   : > { %v1995_v31 = vmul.f32 1.442695, %v1966_v62  ;;  %v2667_v62 = vpop.permute.xlu1 %2666 }
 0x5c9   : > { %v2328_v56 = vpop.permute.xlu0 %2327 }
 0x5ca   : > { %6085 = vpow2.f32 %v1995_v31  ;;  %5797 = vmatprep.subr.msk.bf16.mxu0 %vm1261_vm0, %v2328_v56  ;;  %v2374_v45 = vsel %vm1261_vm0, %v2328_v56, 0 }
 0x5cb   : > { %6087 = vpow2.f32 %v1997_v28  ;;  %5612 = vmatpush3.bf16.xpose.msra.mxu0 %v2374_v45 }
 0x5cc   : > { %v2669_v31 = vpop.permute.xlu1 %2668 }
 0x5cd   : > { %v2330_v19 = vpop.permute.xlu0 %2329 }
 0x5ce   : > { %5798 = vmatprep.subr.msk.bf16.mxu0 %vm1261_vm0, %v2330_v19  ;;  %v2377_v60 = vsel %vm1261_vm0, %v2330_v19, 0 }
 0x5d1   : > { %v2300_v44 = vpop.permute.xlu0 %2299 }
 0x5d3   : > { %5614 = vmatpush3.bf16.xpose.msra.mxu0 %v2377_v60 }
 0x5d4   : > { %v7857_v17 = vpop.eup %6085 }
 0x5d5   : > { %v7859_v57 = vpop.eup %6087  ;;  %v2304_v27 = vpop.permute.xlu0 %2303  ;;  %v2103_v25 = vpack.c.bf16 %v7857_v17, %v7852_v9 }
 0x5d6   : > { %v2104_v15 = vpack.c.bf16 %v7855_v59, %v7859_v57 }
 0x5d7   : > { %5595 = vmatprep.mubr.bf16.mxu0 %v2103_v25 }
 0x5d8   : > { %5596 = vmatmul.mubr.bf16.gmra.mrb[60].mxu0 %v2104_v15 }
 0x5d9   : > { %v2308_v8 = vpop.permute.xlu0 %2307  ;;  %5615 = vmatprep.mubr.msk.bf16.mxu0 %vm1261_vm0, %v2300_v44 }
 0x5dd   : > { %v2312_v47 = vpop.permute.xlu0 %2311 }
 0x5e0   : > { %5616 = vmatmul.mubr.msk.bf16.vlgmr.msra.gmra.mrb[64].mxu0 %vm1261_vm0, %v2302_v51  ;;  %v2671_v51 = vpop.permute.xlu1 %2670 }
 0x5e1   : > { %v2661_v46 = vpop.permute.xlu0 %2660  ;;  %5619 = vmatprep.mubr.msk.bf16.mxu0 %vm1261_vm0, %v2304_v27 }
 0x5e2   : > { %5631 = vmatprep.subr.bf16.mxu1 %v2661_v46 }
 0x5e3   : > { %5632 = vmatpush3.bf16.msra.mxu1 %v2661_v46 }
 0x5e4   : > { %5633 = vmatprep.subr.bf16.mxu1 %v2663_v61  ;;  %v2675_v45 = vpop.permute.xlu1 %2674 }
 0x5e5   : > { %v2665_v28 = vpop.permute.xlu0 %2664 }
 0x5e7   : > { %5634 = vmatpush3.bf16.msra.mxu1 %v2663_v61 }
 0x5e8   : > { %5620 = vmatmul.mubr.msk.bf16.gmra.mrb[68].mxu0 %vm1261_vm0, %v2306_v43  ;;  %5635 = vmatprep.subr.bf16.mxu1 %v2665_v28 }
 0x5e9   : > { %5623 = vmatprep.mubr.msk.bf16.mxu0 %vm1261_vm0, %v2308_v8  ;;  %v2673_v56 = vpop.permute.xlu0 %2672 }
 0x5eb   : > { %5636 = vmatpush3.bf16.msra.mxu1 %v2665_v28 }
 0x5ec   : > { %5637 = vmatprep.subr.bf16.mxu1 %v2667_v62 }
 0x5ed   : > { %v7873_v19 = vpop.permute.xlu0 %2862 }
 0x5ef   : > { %5638 = vmatpush3.bf16.msra.mxu1 %v2667_v62 }
 0x5f0   : > { %5624 = vmatmul.mubr.msk.bf16.gmra.mrb[72].mxu0 %vm1261_vm0, %v2310_v30  ;;  %5639 = vmatprep.subr.bf16.mxu1 %v2669_v31 }
 0x5f1   : > { %5627 = vmatprep.mubr.msk.bf16.mxu0 %vm1261_vm0, %v2312_v47 }
 0x5f3   : > { %5640 = vmatpush3.bf16.msra.mxu1 %v2669_v31 }
 0x5f4   : > { %5641 = vmatprep.subr.bf16.mxu1 %v2671_v51 }
 0x5f7   : > { %5642 = vmatpush3.bf16.msra.mxu1 %v2671_v51 }
 0x5f8   : > { %5628 = vmatmul.mubr.msk.bf16.gmra.mrb[76].mxu0 %vm1261_vm0, %v2314_v48  ;;  %5643 = vmatprep.subr.bf16.mxu1 %v2673_v56 }
 0x5fb   : > { %5644 = vmatpush3.bf16.msra.mxu1 %v2673_v56 }
 0x5fc   : > { %5645 = vmatprep.subr.bf16.mxu1 %v2675_v45 }
 0x5ff   : > { %5646 = vmatpush3.bf16.msra.mxu1 %v2675_v45 }
 0x600   : > { %5799 = vmatprep.subr.msk.bf16.mxu1 %vm1261_vm0, %v7873_v19 }
 0x664   : > { %v7877_v43 = vpop.f32.mrb[48].mxu0 }
 0x665   : > { %9630 = vst [vmem:[#allocation58_spill] sm:$0xff] %v7877_v43  ;;  %v7879_v44 = vpop.f32.mrb[49].mxu0 }
 0x666   : > { %9631 = vst [vmem:[#allocation59_spill] sm:$0xff] %v7879_v44  ;;  %v7881_v60 = vpop.f32.mrb[50].mxu0 }
 0x667   : > { %9632 = vst [vmem:[#allocation60_spill] sm:$0xff] %v7881_v60  ;;  %v7883_v30 = vpop.f32.mrb[51].mxu0 }
 0x668   : > { %9633 = vst [vmem:[#allocation61_spill] sm:$0xff] %v7883_v30 }
 0x66c   : > { %v7885_v27 = vpop.f32.mrb[52].mxu0 }
 0x66d   : > { %9634 = vst [vmem:[#allocation62_spill] sm:$0xff] %v7885_v27  ;;  %v7887_v25 = vpop.f32.mrb[53].mxu0 }
 0x66e   : > { %9635 = vst [vmem:[#allocation63_spill] sm:$0xff] %v7887_v25  ;;  %v7889_v15 = vpop.f32.mrb[54].mxu0 }
 0x66f   : > { %9636 = vst [vmem:[#allocation64_spill] sm:$0xff] %v7889_v15  ;;  %v7891_v8 = vpop.f32.mrb[55].mxu0 }
 0x670   : > { %9637 = vst [vmem:[#allocation65_spill] sm:$0xff] %v7891_v8 }
 0x679   : > { %v7893_v48 = vpop.f32.mrb[56].mxu0 }
 0x67a   : > { %9638 = vst [vmem:[#allocation66_spill] sm:$0xff] %v7893_v48  ;;  %v7895_v47 = vpop.f32.mrb[57].mxu0 }
 0x67b   : > { %9639 = vst [vmem:[#allocation67_spill] sm:$0xff] %v7895_v47  ;;  %v7897_v61 = vpop.f32.mrb[58].mxu0 }
 0x67c   : > { %9640 = vst [vmem:[#allocation68_spill] sm:$0xff] %v7897_v61  ;;  %v7899_v46 = vpop.f32.mrb[59].mxu0 }
 0x67d   : > { %9641 = vst [vmem:[#allocation69_spill] sm:$0xff] %v7899_v46 }
 0x6ab   : > { %v7901_v62 = vpop.f32.mrb[60].mxu0 }
 0x6ac   : > { %9642 = vst [vmem:[#allocation70_spill] sm:$0xff] %v7901_v62  ;;  %v7903_v28 = vpop.f32.mrb[61].mxu0 }
 0x6ad   : > { %9643 = vst [vmem:[#allocation71_spill] sm:$0xff] %v7903_v28  ;;  %v7905_v31 = vpop.f32.mrb[62].mxu0 }
 0x6ae   : > { %9644 = vst [vmem:[#allocation72_spill] sm:$0xff] %v7905_v31  ;;  %v7907_v51 = vpop.f32.mrb[63].mxu0 }
 0x6af   : > { %9645 = vst [vmem:[#allocation73_spill] sm:$0xff] %v7907_v51 }
 0x6b3   : > { %v5617_v56 = vpop.f32.mrb[64].mxu0 }
 0x6b4   : > { %2480 = vmax.xlane.f32.xlu0 %v5617_v56  ;;  %v2413_v45 = vpop.f32.mrb[65].mxu0 }
 0x6b5   : > { %v7909_v27 = vpop.f32.mrb[66].mxu0 }
 0x6b6   : > { %v2416_v48 = vpop.f32.mrb[67].mxu0 }
 0x6b7   : > { %2478 = vmax.xlane.f32.xlu1 %v2416_v48 }
 0x6b8   : > { %2476 = vmax.xlane.f32.xlu0 %v2413_v45 }
 0x6bb   : > { %v7911_v47 = vpop.f32.mrb[68].mxu0 }
 0x6bc   : > { %2482 = vmax.xlane.f32.xlu0 %v7909_v27  ;;  %2488 = vmax.xlane.f32.xlu1 %v7911_v47  ;;  %v7915_v62 = vpop.f32.mrb[69].mxu0 }
 0x6bd   : > { %v7917_v28 = vpop.f32.mrb[70].mxu0 }
 0x6be   : > { %v2432_v31 = vpop.f32.mrb[71].mxu0 }
 0x6c0   : > { %2484 = vmax.xlane.f32.xlu1 %v7915_v62  ;;  %2486 = vmax.xlane.f32.xlu0 %v2432_v31 }
 0x6c3   : > { %v7920_v51 = vpop.f32.mrb[72].mxu0 }
 0x6c4   : > { %2490 = vmax.xlane.f32.xlu1 %v7917_v28  ;;  %2496 = vmax.xlane.f32.xlu0 %v7920_v51  ;;  %v7924_v61 = vpop.f32.mrb[73].mxu0 }
 0x6c5   : > { %v7926_v46 = vpop.f32.mrb[74].mxu0 }
 0x6c6   : > { %v7928_v15 = vpop.f32.mrb[75].mxu0 }
 0x6c8   : > { %2492 = vmax.xlane.f32.xlu1 %v7924_v61 }
 0x6cb   : > { %v7931_v25 = vpop.f32.mrb[76].mxu0 }
 0x6cc   : > { %2498 = vmax.xlane.f32.xlu1 %v7926_v46  ;;  %v7934_v8 = vpop.f32.mrb[77].mxu0 }
 0x6cd   : > { %2500 = vmax.xlane.f32.xlu0 %v7934_v8  ;;  %v7937_v43 = vpop.f32.mrb[78].mxu0 }
 0x6ce   : > { %v7939_v60 = vpop.f32.mrb[79].mxu0 }
 0x6d0   : > { %2494 = vmax.xlane.f32.xlu1 %v7928_v15 }
 0x6d4   : > { %2504 = vmax.xlane.f32.xlu1 %v7931_v25 }
 0x6d8   : > { %2506 = vmax.xlane.f32.xlu1 %v7937_v43 }
 0x6e3   : > { %2872 = vrot.lane.b32.xlu0 %v7408_v1, %s6689_s21 }
 0x6e9   : > { %2870 = vrot.lane.b32.xlu1 %v7384_v40, %s6689_s21 }
 0x6ed   : > { %2848 = vrot.lane.b32.xlu1 %v7311_v29, %s6689_s21  ;;  %v7975_v29 = vpop.permute.xlu0 %2864 }
 0x6f1   : > { %2852 = vrot.lane.b32.xlu1 %v7356_v11, %s6689_s21 }
 0x6f5   : > { %2856 = vrot.lane.b32.xlu1 %v7404_v63, %s6689_s21 }
 0x6f9   : > { %2860 = vrot.lane.b32.xlu1 %v7437_v37, %s6689_s21 }
 0x6fd   : > { %3209 = vrot.lane.b32.xlu1 %v7333_v50, %s6689_s21 }
 0x702   : > { %2502 = vmax.xlane.f32.xlu0 %v7939_v60 }
 0x718   : > { %2874 = vrot.lane.b32.xlu0 %v7426_v24, %s6689_s21 }
 0x71c   : > { %2876 = vrot.lane.b32.xlu0 %v7439_v42, %s6689_s21 }
 0x720   : > { %2846 = vrot.lane.b32.xlu0 %v7294_v16, %s6689_s21  ;;  %v7981_v16 = vpop.permute.xlu0 %2868 }
 0x724   : > { %2850 = vrot.lane.b32.xlu0 %v7331_v49, %s6689_s21  ;;  %v7983_v49 = vpop.permute.xlu1 %2866 }
 0x728   : > { %2854 = vrot.lane.b32.xlu0 %v7380_v38, %s6689_s21 }
 0x72c   : > { %2858 = vrot.lane.b32.xlu0 %v7424_v23, %s6689_s21 }
 0x730   : > { %3207 = vrot.lane.b32.xlu0 %v7337_v52, %s6689_s21 }
 0x734   : > { %3211 = vrot.lane.b32.xlu0 %v7362_v14, %s6689_s21 }
 0x738   : > { %3213 = vrot.lane.b32.xlu0 %v7358_v12, %s6689_s21 }
 0x73c   : > { %3215 = vrot.lane.b32.xlu0 %v7386_v41, %s6689_s21 }
 0x741   : > { %v2481_v50 = vpop.xlane.xlu0 %2480 }
 0x742   : > { %v2510_v38 = vsub.f32 %v5617_v56, %v2481_v50 }
 0x744   : > { %v2479_v11 = vpop.xlane.xlu1 %2478  ;;  %v2528_v23 = vmul.f32 1.442695, %v2510_v38 }
 0x745   : > { %v2509_v40 = vsub.f32 %v2416_v48, %v2479_v11  ;;  %v2477_v52 = vpop.xlane.xlu0 %2476 }
 0x746   : > { %v2508_v63 = vsub.f32 %v2413_v45, %v2477_v52 }
 0x747   : > { %v2526_v1 = vmul.f32 1.442695, %v2509_v40 }
 0x748   : > { %v2524_v14 = vmul.f32 1.442695, %v2508_v63 }
 0x749   : > { %6089 = vpow2.f32 %v2526_v1  ;;  %v2483_v24 = vpop.xlane.xlu0 %2482  ;;  %v2489_v37 = vpop.xlane.xlu1 %2488 }
 0x74a   : > { %6091 = vpow2.f32 %v2524_v14  ;;  %v2511_v12 = vsub.f32 %v7909_v27, %v2483_v24  ;;  %v2514_v30 = vsub.f32 %v7911_v47, %v2489_v37  ;;  %v2903_v37 = vsel %vm1261_vm0, %v7873_v19, 0 }
 0x74b   : > { %6093 = vpow2.f32 %v2528_v23 }
 0x74c   : > { %v2530_v41 = vmul.f32 1.442695, %v2511_v12  ;;  %v2536_v38 = vmul.f32 1.442695, %v2514_v30 }
 0x74d   : > { %v2487_v42 = vpop.xlane.xlu0 %2486  ;;  %v2485_v44 = vpop.xlane.xlu1 %2484 }
 0x74e   : > { %6095 = vpow2.f32 %v2530_v41  ;;  %v2513_v56 = vsub.f32 %v2432_v31, %v2487_v42  ;;  %v2512_v48 = vsub.f32 %v7915_v62, %v2485_v44 }
 0x750   : > { %v2534_v45 = vmul.f32 1.442695, %v2513_v56  ;;  %v2532_v50 = vmul.f32 1.442695, %v2512_v48 }
 0x751   : > { %v2491_v11 = vpop.xlane.xlu1 %2490  ;;  %v2497_v30 = vpop.xlane.xlu0 %2496 }
 0x752   : > { %6097 = vpow2.f32 %v2534_v45  ;;  %v2515_v40 = vsub.f32 %v7917_v28, %v2491_v11  ;;  %v2518_v24 = vsub.f32 %v7920_v51, %v2497_v30 }
 0x753   : > { %v7989_v52 = vpop.eup %6089  ;;  %6099 = vpow2.f32 %v2532_v50 }
 0x754   : > { %v7991_v27 = vpop.eup %6091  ;;  %v2538_v63 = vmul.f32 1.442695, %v2515_v40  ;;  %6101 = vpow2.f32 %v2536_v38  ;;  %v2544_v51 = vmul.f32 1.442695, %v2518_v24 }
 0x755   : > { %v2493_v1 = vpop.xlane.xlu1 %2492  ;;  %v2652_v47 = vpack.c.bf16 %v7989_v52, %v7991_v27  ;;  %v7995_v31 = vpop.eup %6093 }
 0x756   : > { %6103 = vpow2.f32 %v2538_v63  ;;  %v2516_v62 = vsub.f32 %v7924_v61, %v2493_v1 }
 0x757   : > { %5647 = vmatprep.mubr.bf16.mxu1 %v2652_v47  ;;  %v2909_v47 = vsel %vm1261_vm0, %v7983_v49, 0 }
 0x758   : > { %v7997_v44 = vpop.eup %6095  ;;  %v2540_v41 = vmul.f32 1.442695, %v2516_v62 }
 0x759   : > { %v2499_v28 = vpop.xlane.xlu1 %2498  ;;  %v2653_v14 = vpack.c.bf16 %v7997_v44, %v7995_v31 }
 0x75a   : > { %v2519_v23 = vsub.f32 %v7926_v46, %v2499_v28  ;;  %6105 = vpow2.f32 %v2540_v41 }
 0x75b   : > { %5648 = vmatmul.mubr.bf16.vlgmr.msra.gmra.mrb[48].mxu1 %v2653_v14  ;;  %v2912_v14 = vsel %vm1261_vm0, %v7981_v16, 0 }
 0x75c   : > { %v8006_v12 = vpop.eup %6097  ;;  %5664 = vmatpush3.bf16.xpose.msra.mxu1 %v2903_v37  ;;  %v2546_v56 = vmul.f32 1.442695, %v2519_v23 }
 0x75d   : > { %v8008_v42 = vpop.eup %6099  ;;  %5800 = vmatprep.subr.msk.bf16.mxu1 %vm1261_vm0, %v7975_v29  ;;  %v2495_v61 = vpop.xlane.xlu1 %2494 }
 0x75e   : > { %v2517_v48 = vsub.f32 %v7928_v15, %v2495_v61  ;;  %v2654_v46 = vpack.c.bf16 %v8006_v12, %v8008_v42  ;;  %v8015_v45 = vpop.eup %6101  ;;  %6107 = vpow2.f32 %v2546_v56  ;;  %v2906_v15 = vsel %vm1261_vm0, %v7975_v29, 0 }
 0x760   : > { %v2542_v19 = vmul.f32 1.442695, %v2517_v48  ;;  %5651 = vmatprep.mubr.bf16.mxu1 %v2654_v46  ;;  %v8017_v50 = vpop.eup %6103 }
 0x761   : > { %v2655_v11 = vpack.c.bf16 %v8017_v50, %v8015_v45  ;;  %v2505_v38 = vpop.xlane.xlu1 %2504 }
 0x762   : > { %6109 = vpow2.f32 %v2542_v19 }
 0x763   : > { %6111 = vpow2.f32 %v2544_v51  ;;  %5652 = vmatmul.mubr.bf16.gmra.mrb[52].mxu1 %v2655_v11 }
 0x764   : > { %5666 = vmatpush3.bf16.xpose.msra.mxu1 %v2906_v15  ;;  %v8025_v40 = vpop.eup %6105 }
 0x765   : > { %5801 = vmatprep.subr.msk.bf16.mxu1 %vm1261_vm0, %v7983_v49  ;;  %v2507_v28 = vpop.xlane.xlu1 %2506  ;;  %v2501_v49 = vpop.xlane.xlu0 %2500 }
 0x766   : > { %v2520_v56 = vsub.f32 %v7934_v8, %v2501_v49  ;;  %v2523_v61 = vsub.f32 %v7937_v43, %v2507_v28 }
 0x768   : > { %v8027_v63 = vpop.eup %6107  ;;  %v2548_v48 = vmul.f32 1.442695, %v2520_v56  ;;  %v2554_v46 = vmul.f32 1.442695, %v2523_v61 }
 0x769   : > { %v2871_v23 = vpop.permute.xlu1 %2870  ;;  %v2873_v37 = vpop.permute.xlu0 %2872 }
 0x76a   : > { %v2915_v24 = vsel %vm1261_vm0, %v2871_v23, 0  ;;  %v2918_v41 = vsel %vm1261_vm0, %v2873_v37, 0  ;;  %6113 = vpow2.f32 %v2548_v48 }
 0x76b   : > { %6115 = vpow2.f32 %v2554_v46 }
 0x76c   : > { %v8029_v1 = vpop.eup %6109  ;;  %5668 = vmatpush3.bf16.xpose.msra.mxu1 %v2909_v47 }
 0x76d   : > { %v8033_v30 = vpop.eup %6111  ;;  %v2656_v29 = vpack.c.bf16 %v8029_v1, %v8025_v40  ;;  %5802 = vmatprep.subr.msk.bf16.mxu1 %vm1261_vm0, %v7981_v16  ;;  %v2522_v16 = vsub.f32 %v7931_v25, %v2505_v38  ;;  %v2849_v8 = vpop.permute.xlu1 %2848 }
 0x76e   : > { %v2657_v62 = vpack.c.bf16 %v8027_v63, %v8033_v30 }
 0x76f   : > { %5655 = vmatprep.mubr.bf16.mxu1 %v2656_v29  ;;  %v2552_v11 = vmul.f32 1.442695, %v2522_v16 }
 0x770   : > { %5656 = vmatmul.mubr.bf16.gmra.mrb[56].mxu1 %v2657_v62 }
 0x771   : > { %v2853_v25 = vpop.permute.xlu1 %2852 }
 0x774   : > { %5670 = vmatpush3.bf16.xpose.msra.mxu1 %v2912_v14  ;;  %v8054_v62 = vpop.eup %6113 }
 0x775   : > { %5803 = vmatprep.subr.msk.bf16.mxu1 %vm1261_vm0, %v2871_v23  ;;  %v8057_v28 = vpop.eup %6115 }
 0x77c   : > { %5672 = vmatpush3.bf16.xpose.msra.mxu1 %v2915_v24 }
 0x77d   : > { %5804 = vmatprep.subr.msk.bf16.mxu1 %vm1261_vm0, %v2873_v37 }
 0x784   : > { %5674 = vmatpush3.bf16.xpose.msra.mxu1 %v2918_v41  ;;  %v2857_v41 = vpop.permute.xlu1 %2856 }
 0x788   : > { %v2861_v61 = vpop.permute.xlu1 %2860 }
 0x78c   : > { %v3210_v46 = vpop.permute.xlu1 %3209 }
 0x78f   : > { %v2503_v51 = vpop.xlane.xlu0 %2502 }
 0x790   : > { %v2521_v19 = vsub.f32 %v7939_v60, %v2503_v51 }
 0x792   : > { %v2550_v15 = vmul.f32 1.442695, %v2521_v19 }
 0x793   : > { %v2875_v47 = vpop.permute.xlu0 %2874 }
 0x794   : > { %6117 = vpow2.f32 %v2550_v15  ;;  %5805 = vmatprep.subr.msk.bf16.mxu1 %vm1261_vm0, %v2875_v47  ;;  %v2921_v29 = vsel %vm1261_vm0, %v2875_v47, 0  ;;  %v9646_v15 = vmov 0  }
 0x795   : > { %6119 = vpow2.f32 %v2552_v11  ;;  %5676 = vmatpush3.bf16.xpose.msra.mxu1 %v2921_v29 }
 0x797   : > { %v2877_v43 = vpop.permute.xlu0 %2876 }
 0x798   : > { %5806 = vmatprep.subr.msk.bf16.mxu1 %vm1261_vm0, %v2877_v43  ;;  %v2924_v60 = vsel %vm1261_vm0, %v2877_v43, 0 }
 0x79b   : > { %v2847_v38 = vpop.permute.xlu0 %2846 }
 0x79d   : > { %5678 = vmatpush3.bf16.xpose.msra.mxu1 %v2924_v60 }
 0x79e   : > { %v8059_v14 = vpop.eup %6117 }
 0x79f   : > { %v8061_v23 = vpop.eup %6119  ;;  %v2851_v49 = vpop.permute.xlu0 %2850  ;;  %v2658_v24 = vpack.c.bf16 %v8059_v14, %v8054_v62 }
 0x7a0   : > { %v2659_v37 = vpack.c.bf16 %v8057_v28, %v8061_v23 }
 0x7a1   : > { %5659 = vmatprep.mubr.bf16.mxu1 %v2658_v24 }
 0x7a2   : > { %5660 = vmatmul.mubr.bf16.gmra.mrb[60].mxu1 %v2659_v37 }
 0x7a3   : > { %v2855_v56 = vpop.permute.xlu0 %2854  ;;  %5679 = vmatprep.mubr.msk.bf16.mxu1 %vm1261_vm0, %v2847_v38 }
 0x7a7   : > { %v2859_v16 = vpop.permute.xlu0 %2858 }
 0x7aa   : > { %5680 = vmatmul.mubr.msk.bf16.vlgmr.msra.gmra.mrb[64].mxu1 %vm1261_vm0, %v2849_v8 }
 0x7ab   : > { %v3208_v48 = vpop.permute.xlu0 %3207  ;;  %5683 = vmatprep.mubr.msk.bf16.mxu1 %vm1261_vm0, %v2851_v49 }
 0x7ac   : > { %5695 = vmatprep.subr.bf16.mxu0 %v3208_v48 }
 0x7ad   : > { %5696 = vmatpush3.bf16.msra.mxu0 %v3208_v48 }
 0x7ae   : > { %5697 = vmatprep.subr.bf16.mxu0 %v3210_v46 }
 0x7af   : > { %v3212_v51 = vpop.permute.xlu0 %3211 }
 0x7b1   : > { %5698 = vmatpush3.bf16.msra.mxu0 %v3210_v46 }
 0x7b2   : > { %5684 = vmatmul.mubr.msk.bf16.gmra.mrb[68].mxu1 %vm1261_vm0, %v2853_v25  ;;  %5699 = vmatprep.subr.bf16.mxu0 %v3212_v51 }
 0x7b3   : > { %v3214_v19 = vpop.permute.xlu0 %3213  ;;  %5687 = vmatprep.mubr.msk.bf16.mxu1 %vm1261_vm0, %v2855_v56 }
 0x7b5   : > { %5700 = vmatpush3.bf16.msra.mxu0 %v3212_v51 }
 0x7b6   : > { %5701 = vmatprep.subr.bf16.mxu0 %v3214_v19 }
 0x7b7   : > { %v3216_v11 = vpop.permute.xlu0 %3215 }
 0x7b9   : > { %5702 = vmatpush3.bf16.msra.mxu0 %v3214_v19 }
 0x7ba   : > { %5688 = vmatmul.mubr.msk.bf16.gmra.mrb[72].mxu1 %vm1261_vm0, %v2857_v41  ;;  %5703 = vmatprep.subr.bf16.mxu0 %v3216_v11 }
 0x7bb   : > { %5691 = vmatprep.mubr.msk.bf16.mxu1 %vm1261_vm0, %v2859_v16 }
 0x7bd   : > { %5704 = vmatpush3.bf16.msra.mxu0 %v3216_v11 }
 0x7c2   : > { %5692 = vmatmul.mubr.msk.bf16.gmra.mrb[76].mxu1 %vm1261_vm0, %v2861_v61 }
 0x7c3   : > { %3956 = vmatprep.mubr.bf16.mxu1 %v9646_v15 }
 0x82e   : > { %v8076_v47 = vpop.f32.mrb[48].mxu1 }
 0x82f   : > { %v8078_v29 = vpop.f32.mrb[49].mxu1 }
 0x830   : > { %v8080_v8 = vpop.f32.mrb[50].mxu1 }
 0x831   : > { %v8082_v43 = vpop.f32.mrb[51].mxu1 }
 0x836   : > { %v8084_v25 = vpop.f32.mrb[52].mxu1 }
 0x837   : > { %9647 = vst [vmem:[#allocation74_spill] sm:$0xff] %v8084_v25  ;;  %v8086_v38 = vpop.f32.mrb[53].mxu1 }
 0x838   : > { %9648 = vst [vmem:[#allocation75_spill] sm:$0xff] %v8086_v38  ;;  %v8088_v60 = vpop.f32.mrb[54].mxu1 }
 0x839   : > { %9649 = vst [vmem:[#allocation76_spill] sm:$0xff] %v8088_v60  ;;  %v8090_v49 = vpop.f32.mrb[55].mxu1 }
 0x83a   : > { %9650 = vst [vmem:[#allocation77_spill] sm:$0xff] %v8090_v49 }
 0x843   : > { %v8092_v24 = vpop.f32.mrb[56].mxu1 }
 0x844   : > { %9651 = vst [vmem:[#allocation78_spill] sm:$0xff] %v8092_v24  ;;  %v8094_v37 = vpop.f32.mrb[57].mxu1 }
 0x845   : > { %9652 = vst [vmem:[#allocation79_spill] sm:$0xff] %v8094_v37  ;;  %v8096_v41 = vpop.f32.mrb[58].mxu1 }
 0x846   : > { %9653 = vst [vmem:[#allocation80_spill] sm:$0xff] %v8096_v41  ;;  %v8098_v56 = vpop.f32.mrb[59].mxu1 }
 0x847   : > { %9654 = vst [vmem:[#allocation81_spill] sm:$0xff] %v8098_v56 }
 0x875   : > { %v8100_v61 = vpop.f32.mrb[60].mxu1 }
 0x876   : > { %9655 = vst [vmem:[#allocation82_spill] sm:$0xff] %v8100_v61  ;;  %v8102_v16 = vpop.f32.mrb[61].mxu1 }
 0x877   : > { %9656 = vst [vmem:[#allocation83_spill] sm:$0xff] %v8102_v16  ;;  %v8104_v48 = vpop.f32.mrb[62].mxu1 }
 0x878   : > { %9657 = vst [vmem:[#allocation84_spill] sm:$0xff] %v8104_v48  ;;  %v8106_v46 = vpop.f32.mrb[63].mxu1 }
 0x879   : > { %9658 = vst [vmem:[#allocation85_spill] sm:$0xff] %v8106_v46 }
 0x87d   : > { %v8108_v51 = vpop.f32.mrb[64].mxu1 }
 0x87e   : > { %3027 = vmax.xlane.f32.xlu1 %v8108_v51  ;;  %v8111_v19 = vpop.f32.mrb[65].mxu1 }
 0x87f   : > { %3023 = vmax.xlane.f32.xlu0 %v8111_v19  ;;  %v8114_v11 = vpop.f32.mrb[66].mxu1 }
 0x880   : > { %v8116_v15 = vpop.f32.mrb[67].mxu1 }
 0x882   : > { %3029 = vmax.xlane.f32.xlu1 %v8114_v11 }
 0x885   : > { %v8119_v61 = vpop.f32.mrb[68].mxu1 }
 0x886   : > { %3025 = vmax.xlane.f32.xlu1 %v8116_v15  ;;  %v8122_v48 = vpop.f32.mrb[69].mxu1 }
 0x887   : > { %3031 = vmax.xlane.f32.xlu0 %v8122_v48  ;;  %v8125_v16 = vpop.f32.mrb[70].mxu1 }
 0x888   : > { %v8127_v46 = vpop.f32.mrb[71].mxu1 }
 0x88a   : > { %3035 = vmax.xlane.f32.xlu1 %v8119_v61 }
 0x88d   : > { %v8130_v24 = vpop.f32.mrb[72].mxu1 }
 0x88e   : > { %3037 = vmax.xlane.f32.xlu1 %v8125_v16  ;;  %v8133_v41 = vpop.f32.mrb[73].mxu1 }
 0x88f   : > { %v8135_v37 = vpop.f32.mrb[74].mxu1 }
 0x890   : > { %v8137_v56 = vpop.f32.mrb[75].mxu1 }
 0x892   : > { %3033 = vmax.xlane.f32.xlu1 %v8127_v46 }
 0x895   : > { %v8140_v25 = vpop.f32.mrb[76].mxu1 }
 0x896   : > { %v8142_v60 = vpop.f32.mrb[77].mxu1 }
 0x897   : > { %v8144_v38 = vpop.f32.mrb[78].mxu1 }
 0x898   : > { %v8146_v49 = vpop.f32.mrb[79].mxu1 }
 0x89d   : > { %3219 = vrot.lane.b32.xlu0 %v7410_v4, %s6689_s21 }
 0x8a1   : > { %3221 = vrot.lane.b32.xlu0 %v7406_v0, %s6689_s21 }
 0x8a3   : > { %3217 = vrot.lane.b32.xlu1 %v7382_v39, %s6689_s21 }
 0x8c0   : > { %3039 = vmax.xlane.f32.xlu0 %v8133_v41 }
 0x8c4   : > { %3043 = vmax.xlane.f32.xlu0 %v8130_v24 }
 0x8c7   : > { %3041 = vmax.xlane.f32.xlu1 %v8137_v56 }
 0x8c8   : > { %3045 = vmax.xlane.f32.xlu0 %v8135_v37 }
 0x8cb   : > { %3053 = vmax.xlane.f32.xlu1 %v8144_v38 }
 0x8cc   : > { %3047 = vmax.xlane.f32.xlu0 %v8142_v60 }
 0x8cf   : > { %3049 = vmax.xlane.f32.xlu1 %v8146_v49 }
 0x8d0   : > { %3051 = vmax.xlane.f32.xlu0 %v8140_v25 }
 0x8d3   : > { %2003 = vadd.xlane.f32.xlu1 %v7787_v32 }
 0x8d4   : > { %2001 = vadd.xlane.f32.xlu0 %v7789_v6 }
 0x8d7   : > { %2007 = vadd.xlane.f32.xlu1 %v7795_v18 }
 0x8d8   : > { %2005 = vadd.xlane.f32.xlu0 %v7793_v22 }
 0x8db   : > { %2558 = vadd.xlane.f32.xlu1 %v7989_v52 }
 0x8dc   : > { %2556 = vadd.xlane.f32.xlu0 %v7991_v27 }
 0x8df   : > { %2562 = vadd.xlane.f32.xlu1 %v7997_v44  ;;  %v9660_v44 = vld [vmem:[#allocation37_spill] sm:$0xff] }
 0x8e0   : > { %2560 = vadd.xlane.f32.xlu0 %v7995_v31 }
 0x8e3   : > { %2011 = vadd.xlane.f32.xlu1 %v7804_v13 }
 0x8e4   : > { %2009 = vadd.xlane.f32.xlu0 %v7806_v5 }
 0x8e7   : > { %2015 = vadd.xlane.f32.xlu1 %v7815_v7 }
 0x8e8   : > { %2013 = vadd.xlane.f32.xlu0 %v7813_v10 }
 0x8eb   : > { %2566 = vadd.xlane.f32.xlu1 %v8006_v12  ;;  %v9661_v12 = vld [vmem:[#allocation36_spill] sm:$0xff] }
 0x8ec   : > { %2564 = vadd.xlane.f32.xlu0 %v8008_v42 }
 0x8ef   : > { %2570 = vadd.xlane.f32.xlu1 %v8017_v50 }
 0x8f0   : > { %2568 = vadd.xlane.f32.xlu0 %v8015_v45 }
 0x8f3   : > { %2019 = vadd.xlane.f32.xlu1 %v7827_v3 }
 0x8f4   : > { %2017 = vadd.xlane.f32.xlu0 %v7823_v58 }
 0x8f7   : > { %2023 = vadd.xlane.f32.xlu1 %v7825_v53 }
 0x8f8   : > { %2021 = vadd.xlane.f32.xlu0 %v7831_v2 }
 0x8fb   : > { %2574 = vadd.xlane.f32.xlu1 %v8029_v1 }
 0x8fc   : > { %2572 = vadd.xlane.f32.xlu0 %v8025_v40 }
 0x8ff   : > { %2578 = vadd.xlane.f32.xlu1 %v8027_v63 }
 0x900   : > { %2576 = vadd.xlane.f32.xlu0 %v8033_v30 }
 0x903   : > { %2027 = vadd.xlane.f32.xlu1 %v7857_v17 }
 0x904   : > { %2025 = vadd.xlane.f32.xlu0 %v7852_v9 }
 0x907   : > { %2031 = vadd.xlane.f32.xlu1 %v7855_v59 }
 0x908   : > { %2029 = vadd.xlane.f32.xlu0 %v7859_v57 }
 0x90b   : > { %2582 = vadd.xlane.f32.xlu1 %v8059_v14  ;;  %v3028_v39 = vpop.xlane.xlu1 %3027 }
 0x90c   : > { %v3024_v0 = vpop.xlane.xlu0 %3023  ;;  %2580 = vadd.xlane.f32.xlu0 %v8054_v62  ;;  %v3057_v58 = vsub.f32 %v8108_v51, %v3028_v39 }
 0x90d   : > { %v3055_v4 = vsub.f32 %v8111_v19, %v3024_v0 }
 0x90e   : > { %v3075_v3 = vmul.f32 1.442695, %v3057_v58 }
 0x90f   : > { %2586 = vadd.xlane.f32.xlu1 %v8057_v28  ;;  %v3030_v32 = vpop.xlane.xlu1 %3029  ;;  %v3071_v6 = vmul.f32 1.442695, %v3055_v4 }
 0x910   : > { %2584 = vadd.xlane.f32.xlu0 %v8061_v23  ;;  %v3058_v7 = vsub.f32 %v8114_v11, %v3030_v32 }
 0x911   : > { %6121 = vpow2.f32 %v3071_v6 }
 0x913   : > { %1489 = vadd.xlane.f32.xlu1 %v7565_v35  ;;  %v3026_v22 = vpop.xlane.xlu1 %3025 }
 0x914   : > { %v3056_v18 = vsub.f32 %v8116_v15, %v3026_v22  ;;  %1487 = vadd.xlane.f32.xlu0 %v7561_v33  ;;  %v3032_v10 = vpop.xlane.xlu0 %3031  ;;  %v3077_v33 = vmul.f32 1.442695, %v3058_v7 }
 0x915   : > { %v3059_v35 = vsub.f32 %v8122_v48, %v3032_v10 }
 0x916   : > { %v3073_v13 = vmul.f32 1.442695, %v3056_v18 }
 0x917   : > { %1493 = vadd.xlane.f32.xlu1 %v7563_v34  ;;  %v3036_v5 = vpop.xlane.xlu1 %3035  ;;  %v3079_v2 = vmul.f32 1.442695, %v3059_v35 }
 0x918   : > { %6123 = vpow2.f32 %v3073_v13  ;;  %1491 = vadd.xlane.f32.xlu0 %v7567_v36  ;;  %v3220_v57 = vpop.permute.xlu0 %3219 }
 0x919   : > { %6125 = vpow2.f32 %v3077_v33 }
 0x91a   : > { %6127 = vpow2.f32 %v3075_v3 }
 0x91b   : > { %1497 = vadd.xlane.f32.xlu1 %v7599_v55  ;;  %v3038_v53 = vpop.xlane.xlu1 %3037  ;;  %v8208_v36 = vpop.eup %6121  ;;  %6129 = vpow2.f32 %v3079_v2 }
 0x91c   : > { %1495 = vadd.xlane.f32.xlu0 %v7591_v54  ;;  %v3062_v59 = vsub.f32 %v8125_v16, %v3038_v53  ;;  %v3061_v54 = vsub.f32 %v8119_v61, %v3036_v5  ;;  %v3222_v42 = vpop.permute.xlu0 %3221 }
 0x91e   : > { %v3085_v27 = vmul.f32 1.442695, %v3062_v59  ;;  %v3083_v31 = vmul.f32 1.442695, %v3061_v54 }
 0x91f   : > { %1501 = vadd.xlane.f32.xlu1 %v7595_v21  ;;  %v3034_v34 = vpop.xlane.xlu1 %3033 }
 0x920   : > { %v3060_v9 = vsub.f32 %v8127_v46, %v3034_v34  ;;  %1499 = vadd.xlane.f32.xlu0 %v7593_v20  ;;  %v9659_v20 = vld [vmem:[#allocation35_spill] sm:$0xff] }
 0x922   : > { %v8211_v17 = vpop.eup %6123  ;;  %v3081_v55 = vmul.f32 1.442695, %v3060_v9 }
 0x923   : > { %1505 = vadd.xlane.f32.xlu1 %v7602_v26  ;;  %v3218_v21 = vpop.permute.xlu1 %3217  ;;  %v3199_v52 = vpack.c.bf16 %v8211_v17, %v8208_v36  ;;  %v8220_v26 = vpop.eup %6125 }
 0x924   : > { %6131 = vpow2.f32 %v3081_v55  ;;  %1503 = vadd.xlane.f32.xlu0 %v9659_v20  ;;  %5705 = vmatprep.subr.bf16.mxu0 %v3218_v21  ;;  %v8222_v45 = vpop.eup %6127 }
 0x925   : > { %5706 = vmatpush3.bf16.msra.mxu0 %v3218_v21  ;;  %5711 = vmatprep.mubr.bf16.mxu0 %v3199_v52  ;;  %6133 = vpow2.f32 %v3085_v27  ;;  %v8224_v50 = vpop.eup %6129  ;;  %v3200_v63 = vpack.c.bf16 %v8220_v26, %v8222_v45 }
 0x926   : > { %5707 = vmatprep.subr.bf16.mxu0 %v3220_v57  ;;  %6135 = vpow2.f32 %v3083_v31 }
 0x927   : > { %1509 = vadd.xlane.f32.xlu1 %v9660_v44 }
 0x928   : > { %1507 = vadd.xlane.f32.xlu0 %v9661_v12 }
 0x929   : > { %5708 = vmatpush3.bf16.msra.mxu0 %v3220_v57 }
 0x92a   : > { %5709 = vmatprep.subr.bf16.mxu0 %v3222_v42 }
 0x92d   : > { %5710 = vmatpush3.bf16.msra.mxu0 %v3222_v42 }
 0x92e   : > { %v8226_v40 = vpop.eup %6131 }
 0x92f   : > { %v3201_v1 = vpack.c.bf16 %v8226_v40, %v8224_v50  ;;  %v8232_v30 = vpop.eup %6133 }
 0x930   : > { %5712 = vmatmul.mubr.bf16.vlgmr.msra.gmra.mrb[80].mxu0 %v3200_v63  ;;  %v8234_v62 = vpop.eup %6135 }
 0x931   : > { %5715 = vmatprep.mubr.bf16.mxu0 %v3201_v1  ;;  %v3202_v28 = vpack.c.bf16 %v8232_v30, %v8234_v62 }
 0x938   : > { %5716 = vmatmul.mubr.bf16.gmra.mrb[84].mxu0 %v3202_v28 }
 0x94d   : > { %v3040_v14 = vpop.xlane.xlu0 %3039 }
 0x94e   : > { %v3063_v23 = vsub.f32 %v8133_v41, %v3040_v14 }
 0x950   : > { %v3087_v16 = vmul.f32 1.442695, %v3063_v23 }
 0x951   : > { %v3044_v15 = vpop.xlane.xlu0 %3043 }
 0x952   : > { %v3065_v61 = vsub.f32 %v8130_v24, %v3044_v15  ;;  %6137 = vpow2.f32 %v3087_v16 }
 0x954   : > { %v3091_v48 = vmul.f32 1.442695, %v3065_v61  ;;  %v3042_v46 = vpop.xlane.xlu1 %3041 }
 0x955   : > { %v3064_v51 = vsub.f32 %v8137_v56, %v3042_v46  ;;  %v3046_v19 = vpop.xlane.xlu0 %3045 }
 0x956   : > { %v3066_v11 = vsub.f32 %v8135_v37, %v3046_v19  ;;  %6139 = vpow2.f32 %v3091_v48 }
 0x957   : > { %v3089_v39 = vmul.f32 1.442695, %v3064_v51 }
 0x958   : > { %v3093_v0 = vmul.f32 1.442695, %v3066_v11  ;;  %v3054_v4 = vpop.xlane.xlu1 %3053 }
 0x959   : > { %6141 = vpow2.f32 %v3089_v39  ;;  %v3070_v32 = vsub.f32 %v8144_v38, %v3054_v4  ;;  %v3048_v41 = vpop.xlane.xlu0 %3047  ;;  %v9662_v39 = vld [vmem:[#allocation61_spill] sm:$0xff] }
 0x95a   : > { %6143 = vpow2.f32 %v3093_v0  ;;  %v3067_v24 = vsub.f32 %v8142_v60, %v3048_v41 }
 0x95b   : > { %v3101_v6 = vmul.f32 1.442695, %v3070_v32 }
 0x95c   : > { %v3095_v22 = vmul.f32 1.442695, %v3067_v24  ;;  %v3050_v18 = vpop.xlane.xlu1 %3049  ;;  %v8246_v58 = vpop.eup %6137  ;;  %v9663_v24 = vld [vmem:[#allocation59_spill] sm:$0xff] }
 0x95d   : > { %v3068_v56 = vsub.f32 %v8146_v49, %v3050_v18  ;;  %v3052_v13 = vpop.xlane.xlu0 %3051  ;;  %6145 = vpow2.f32 %v3101_v6 }
 0x95e   : > { %v3069_v37 = vsub.f32 %v8140_v25, %v3052_v13  ;;  %6147 = vpow2.f32 %v3095_v22  ;;  %v9664_v13 = vld [vmem:[#allocation60_spill] sm:$0xff] }
 0x95f   : > { %v3097_v5 = vmul.f32 1.442695, %v3068_v56 }
 0x960   : > { %v3099_v10 = vmul.f32 1.442695, %v3069_v37  ;;  %v2004_v7 = vpop.xlane.xlu1 %2003  ;;  %v8248_v35 = vpop.eup %6139 }
 0x961   : > { %6149 = vpow2.f32 %v3097_v5  ;;  %v2002_v38 = vpop.xlane.xlu0 %2001 }
 0x962   : > { %6151 = vpow2.f32 %v3099_v10 }
 0x963   : > { %v8250_v60 = vpop.eup %6141  ;;  %6153 = vrcp.f32 %v2004_v7 }
 0x964   : > { %v8252_v53 = vpop.eup %6143  ;;  %6155 = vrcp.f32 %v2002_v38  ;;  %v2008_v49 = vpop.xlane.xlu1 %2007  ;;  %v3203_v25 = vpack.c.bf16 %v8250_v60, %v8246_v58 }
 0x965   : > { %6157 = vrcp.f32 %v2008_v49  ;;  %v2006_v33 = vpop.xlane.xlu0 %2005  ;;  %v3204_v3 = vpack.c.bf16 %v8252_v53, %v8248_v35 }
 0x966   : > { %6159 = vrcp.f32 %v2006_v33  ;;  %5719 = vmatprep.mubr.bf16.mxu0 %v3203_v25 }
 0x967   : > { %5720 = vmatmul.mubr.bf16.gmra.mrb[88].mxu0 %v3204_v3  ;;  %v8258_v34 = vpop.eup %6145 }
 0x968   : > { %v2559_v2 = vpop.xlane.xlu1 %2558  ;;  %v8260_v59 = vpop.eup %6147 }
 0x969   : > { %6161 = vrcp.f32 %v2559_v2  ;;  %v2557_v9 = vpop.xlane.xlu0 %2556 }
 0x96a   : > { %6163 = vrcp.f32 %v2557_v9 }
 0x96b   : > { %v8262_v55 = vpop.eup %6149 }
 0x96c   : > { %v8264_v54 = vpop.eup %6151  ;;  %v2563_v57 = vpop.xlane.xlu1 %2562  ;;  %v3205_v21 = vpack.c.bf16 %v8262_v55, %v8260_v59 }
 0x96d   : > { %v6154_v52 = vpop.eup %6153  ;;  %6165 = vrcp.f32 %v2563_v57  ;;  %v2561_v20 = vpop.xlane.xlu0 %2560  ;;  %v3206_v27 = vpack.c.bf16 %v8258_v34, %v8264_v54 }
 0x96e   : > { %v6156_v31 = vpop.eup %6155  ;;  %v2050_v44 = vmul.f32 %v6154_v52, %v2004_v7  ;;  %6167 = vrcp.f32 %v2561_v20  ;;  %5723 = vmatprep.mubr.bf16.mxu0 %v3205_v21  ;;  %v9665_v7 = vld [vmem:[#allocation58_spill] sm:$0xff] }
 0x96f   : > { %v6158_v12 = vpop.eup %6157  ;;  %v2049_v42 = vmul.f32 %v6156_v31, %v2002_v38  ;;  %5724 = vmatmul.mubr.bf16.gmra.mrb[92].mxu0 %v3206_v27 }
 0x970   : > { %v6160_v63 = vpop.eup %6159  ;;  %v2066_v1 = vsub.f32 2.0, %v2050_v44  ;;  %v2052_v28 = vmul.f32 %v6158_v12, %v2008_v49  ;;  %v2012_v14 = vpop.xlane.xlu1 %2011 }
 0x971   : > { %v2065_v23 = vsub.f32 2.0, %v2049_v42  ;;  %v2051_v15 = vmul.f32 %v6160_v63, %v2006_v33  ;;  %6169 = vrcp.f32 %v2012_v14  ;;  %v2010_v61 = vpop.xlane.xlu0 %2009 }
 0x972   : > { %v2082_v16 = vmul.f32 %v6154_v52, %v2066_v1  ;;  %v2068_v48 = vsub.f32 2.0, %v2052_v28  ;;  %6171 = vrcp.f32 %v2010_v61 }
 0x973   : > { %v6162_v46 = vpop.eup %6161  ;;  %v2081_v51 = vmul.f32 %v6156_v31, %v2065_v23  ;;  %v2067_v19 = vsub.f32 2.0, %v2051_v15 }
 0x974   : > { %v6164_v11 = vpop.eup %6163  ;;  %v2235_v0 = vmul.f32 %v9662_v39, %v2082_v16  ;;  %v2084_v4 = vmul.f32 %v6158_v12, %v2068_v48  ;;  %v2605_v32 = vmul.f32 %v6162_v46, %v2559_v2  ;;  %v2016_v41 = vpop.xlane.xlu1 %2015 }
 0x975   : > { %v2234_v6 = vmul.f32 %v9663_v24, %v2081_v51  ;;  %v2083_v22 = vmul.f32 %v6160_v63, %v2067_v19  ;;  %v2604_v18 = vmul.f32 %v6164_v11, %v2557_v9  ;;  %6173 = vrcp.f32 %v2016_v41  ;;  %v2014_v56 = vpop.xlane.xlu0 %2013 }
 0x976   : > { %v2237_v37 = vmul.f32 %v9664_v13, %v2084_v4  ;;  %v2621_v5 = vsub.f32 2.0, %v2605_v32  ;;  %6175 = vrcp.f32 %v2014_v56  ;;  %v9667_v13 = vld [vmem:[#allocation63_spill] sm:$0xff] }
 0x977   : > { %v6166_v10 = vpop.eup %6165  ;;  %v2236_v38 = vmul.f32 %v9665_v7, %v2083_v22  ;;  %v2620_v49 = vsub.f32 2.0, %v2604_v18  ;;  %v2250_v25 = vpack.c.bf16 %v2235_v0, %v2234_v6  ;;  %v9666_v6 = vld [vmem:[#allocation65_spill] sm:$0xff] }
 0x978   : > { %v6168_v33 = vpop.eup %6167  ;;  %v2637_v3 = vmul.f32 %v6162_v46, %v2621_v5  ;;  %v2607_v21 = vmul.f32 %v6166_v10, %v2563_v57  ;;  %v2567_v2 = vpop.xlane.xlu1 %2566 }
 0x979   : > { %v2636_v52 = vmul.f32 %v6164_v11, %v2620_v49  ;;  %v2606_v27 = vmul.f32 %v6168_v33, %v2561_v20  ;;  %2266 = vrot.lane.b32.xlu0 %v2250_v25, %s6689_s21  ;;  %6177 = vrcp.f32 %v2567_v2  ;;  %v2565_v9 = vpop.xlane.xlu0 %2564  ;;  %v2251_v31 = vpack.c.bf16 %v2237_v37, %v2236_v38 }
 0x97a   : > { %v2782_v44 = vmul.f32 %v8082_v43, %v2637_v3  ;;  %v2623_v12 = vsub.f32 2.0, %v2607_v21  ;;  %6179 = vrcp.f32 %v2565_v9  ;;  %v9668_v3 = vld [vmem:[#allocation64_spill] sm:$0xff] }
 0x97b   : > { %v6170_v42 = vpop.eup %6169  ;;  %v2781_v63 = vmul.f32 %v8078_v29, %v2636_v52  ;;  %v2622_v1 = vsub.f32 2.0, %v2606_v27  ;;  %2268 = vrot.lane.b32.xlu1 %v2251_v31, %s6689_s21  ;;  %v9669_v31 = vld [vmem:[#allocation62_spill] sm:$0xff] }
 0x97c   : > { %v6172_v28 = vpop.eup %6171  ;;  %v2639_v57 = vmul.f32 %v6166_v10, %v2623_v12  ;;  %v2054_v23 = vmul.f32 %v6170_v42, %v2012_v14  ;;  %v2571_v15 = vpop.xlane.xlu1 %2570 }
 0x97d   : > { %v2638_v20 = vmul.f32 %v6168_v33, %v2622_v1  ;;  %v2053_v16 = vmul.f32 %v6172_v28, %v2010_v61  ;;  %6181 = vrcp.f32 %v2571_v15  ;;  %v2569_v48 = vpop.xlane.xlu0 %2568  ;;  %v2797_v46 = vpack.c.bf16 %v2782_v44, %v2781_v63 }
 0x97e   : > { %v8279_v51 = vmul.f32 %v8080_v8, %v2639_v57  ;;  %v2070_v43 = vsub.f32 2.0, %v2054_v23  ;;  %6183 = vrcp.f32 %v2569_v48 }
 0x97f   : > { %v6174_v19 = vpop.eup %6173  ;;  %v8282_v29 = vmul.f32 %v8076_v47, %v2638_v20  ;;  %v2069_v11 = vsub.f32 2.0, %v2053_v16  ;;  %2813 = vrot.lane.b32.xlu1 %v2797_v46, %s6688_s9  ;;  %v9670_v20 = vld [vmem:[#allocation77_spill] sm:$0xff] }
 0x980   : > { %v6176_v39 = vpop.eup %6175  ;;  %v2086_v14 = vmul.f32 %v6170_v42, %v2070_v43  ;;  %v2056_v0 = vmul.f32 %v6174_v19, %v2016_v41  ;;  %v2020_v4 = vpop.xlane.xlu1 %2019 }
 0x981   : > { %v2085_v61 = vmul.f32 %v6172_v28, %v2069_v11  ;;  %v2055_v32 = vmul.f32 %v6176_v39, %v2014_v56  ;;  %6185 = vrcp.f32 %v2020_v4  ;;  %v2018_v24 = vpop.xlane.xlu0 %2017  ;;  %v2798_v8 = vpack.c.bf16 %v8279_v51, %v8282_v29 }
 0x982   : > { %v8288_v22 = vmul.f32 %v9666_v6, %v2086_v14  ;;  %v2072_v18 = vsub.f32 2.0, %v2056_v0  ;;  %6187 = vrcp.f32 %v2018_v24 }
 0x983   : > { %v6178_v47 = vpop.eup %6177  ;;  %v8291_v37 = vmul.f32 %v9667_v13, %v2085_v61  ;;  %v2071_v5 = vsub.f32 2.0, %v2055_v32 }
 0x984   : > { %v6180_v10 = vpop.eup %6179  ;;  %v2088_v41 = vmul.f32 %v6174_v19, %v2072_v18  ;;  %v2609_v7 = vmul.f32 %v6178_v47, %v2567_v2  ;;  %v2024_v38 = vpop.xlane.xlu1 %2023  ;;  %v9671_v19 = vld [vmem:[#allocation75_spill] sm:$0xff] }
 0x985   : > { %v2087_v56 = vmul.f32 %v6176_v39, %v2071_v5  ;;  %v2608_v49 = vmul.f32 %v6180_v10, %v2565_v9  ;;  %6189 = vrcp.f32 %v2024_v38  ;;  %v2022_v25 = vpop.xlane.xlu0 %2021 }
 0x986   : > { %v8296_v21 = vmul.f32 %v9668_v3, %v2088_v41  ;;  %v2625_v52 = vsub.f32 2.0, %v2609_v7  ;;  %6191 = vrcp.f32 %v2022_v25  ;;  %v9673_v41 = vld [vmem:[#allocation74_spill] sm:$0xff] }
 0x987   : > { %v6182_v27 = vpop.eup %6181  ;;  %v8299_v44 = vmul.f32 %v9669_v31, %v2087_v56  ;;  %v2624_v12 = vsub.f32 2.0, %v2608_v49 }
 0x988   : > { %v6184_v42 = vpop.eup %6183  ;;  %v2641_v2 = vmul.f32 %v6178_v47, %v2625_v52  ;;  %v2611_v63 = vmul.f32 %v6182_v27, %v2571_v15  ;;  %v2575_v1 = vpop.xlane.xlu1 %2574  ;;  %v9672_v47 = vld [vmem:[#allocation76_spill] sm:$0xff] }
 0x989   : > { %v2640_v9 = vmul.f32 %v6180_v10, %v2624_v12  ;;  %v2610_v28 = vmul.f32 %v6184_v42, %v2569_v48  ;;  %6193 = vrcp.f32 %v2575_v1  ;;  %v2573_v57 = vpop.xlane.xlu0 %2572 }
 0x98a   : > { %v8304_v16 = vmul.f32 %v9670_v20, %v2641_v2  ;;  %v2627_v46 = vsub.f32 2.0, %v2611_v63  ;;  %6195 = vrcp.f32 %v2573_v57 }
 0x98b   : > { %v6186_v43 = vpop.eup %6185  ;;  %v8307_v11 = vmul.f32 %v9671_v19, %v2640_v9  ;;  %v2626_v39 = vsub.f32 2.0, %v2610_v28  ;;  %v9675_v28 = vld [vmem:[#allocation67_spill] sm:$0xff] }
 0x98c   : > { %v6188_v14 = vpop.eup %6187  ;;  %v2643_v15 = vmul.f32 %v6182_v27, %v2627_v46  ;;  %v2058_v0 = vmul.f32 %v6186_v43, %v2020_v4  ;;  %v2579_v61 = vpop.xlane.xlu1 %2578 }
 0x98d   : > { %v2642_v48 = vmul.f32 %v6184_v42, %v2626_v39  ;;  %v2057_v32 = vmul.f32 %v6188_v14, %v2018_v24  ;;  %6197 = vrcp.f32 %v2579_v61  ;;  %v2577_v6 = vpop.xlane.xlu0 %2576  ;;  %v9674_v42 = vld [vmem:[#allocation69_spill] sm:$0xff] }
 0x98e   : > { %v8312_v13 = vmul.f32 %v9672_v47, %v2643_v15  ;;  %v2074_v5 = vsub.f32 2.0, %v2058_v0  ;;  %6199 = vrcp.f32 %v2577_v6 }
 0x98f   : > { %v6190_v10 = vpop.eup %6189  ;;  %v8315_v7 = vmul.f32 %v9673_v41, %v2642_v48  ;;  %v2073_v56 = vsub.f32 2.0, %v2057_v32  ;;  %v9676_v48 = vld [vmem:[#allocation68_spill] sm:$0xff]  ;;  %v9677_v41 = vld [vmem:[#allocation66_spill] sm:$0xff] }
 0x990   : > { %v6192_v49 = vpop.eup %6191  ;;  %v2090_v4 = vmul.f32 %v6186_v43, %v2074_v5  ;;  %v2060_v3 = vmul.f32 %v6190_v10, %v2024_v38  ;;  %v2028_v52 = vpop.xlane.xlu1 %2027 }
 0x991   : > { %v2089_v24 = vmul.f32 %v6188_v14, %v2073_v56  ;;  %v2059_v27 = vmul.f32 %v6192_v49, %v2022_v25  ;;  %6201 = vrcp.f32 %v2028_v52  ;;  %v2026_v31 = vpop.xlane.xlu0 %2025 }
 0x992   : > { %v8320_v2 = vmul.f32 %v9674_v42, %v2090_v4  ;;  %v2076_v63 = vsub.f32 2.0, %v2060_v3  ;;  %6203 = vrcp.f32 %v2026_v31 }
 0x993   : > { %v6194_v9 = vpop.eup %6193  ;;  %v8323_v20 = vmul.f32 %v9675_v28, %v2089_v24  ;;  %v2075_v46 = vsub.f32 2.0, %v2059_v27 }
 0x994   : > { %v6196_v43 = vpop.eup %6195  ;;  %v2092_v38 = vmul.f32 %v6190_v10, %v2076_v63  ;;  %v2613_v19 = vmul.f32 %v6194_v9, %v2575_v1  ;;  %v2032_v39 = vpop.xlane.xlu1 %2031  ;;  %v9678_v63 = vld [vmem:[#allocation81_spill] sm:$0xff] }
 0x995   : > { %v2091_v25 = vmul.f32 %v6192_v49, %v2075_v46  ;;  %v2612_v14 = vmul.f32 %v6196_v43, %v2573_v57  ;;  %6205 = vrcp.f32 %v2032_v39  ;;  %v2030_v15 = vpop.xlane.xlu0 %2029 }
 0x996   : > { %v8328_v32 = vmul.f32 %v9676_v48, %v2092_v38  ;;  %v2629_v47 = vsub.f32 2.0, %v2613_v19  ;;  %6207 = vrcp.f32 %v2030_v15  ;;  %v9679_v19 = vld [vmem:[#allocation79_spill] sm:$0xff] }
 0x997   : > { %v6198_v5 = vpop.eup %6197  ;;  %v8331_v56 = vmul.f32 %v9677_v41, %v2091_v25  ;;  %v2628_v4 = vsub.f32 2.0, %v2612_v14 }
 0x998   : > { %v6200_v10 = vpop.eup %6199  ;;  %v2645_v1 = vmul.f32 %v6194_v9, %v2629_v47  ;;  %v2615_v3 = vmul.f32 %v6198_v5, %v2579_v61  ;;  %3107 = vadd.xlane.f32.xlu0 %v8222_v45  ;;  %v2583_v57 = vpop.xlane.xlu1 %2582 }
 0x999   : > { %v2644_v49 = vmul.f32 %v6196_v43, %v2628_v4  ;;  %v2614_v24 = vmul.f32 %v6200_v10, %v2577_v6  ;;  %6209 = vrcp.f32 %v2583_v57  ;;  %v2581_v27 = vpop.xlane.xlu0 %2580  ;;  %v9681_v4 = vld [vmem:[#allocation80_spill] sm:$0xff] }
 0x99a   : > { %v8337_v28 = vmul.f32 %v9678_v63, %v2645_v1  ;;  %v2631_v46 = vsub.f32 2.0, %v2615_v3  ;;  %6211 = vrcp.f32 %v2581_v27 }
 0x99b   : > { %v6202_v38 = vpop.eup %6201  ;;  %v8340_v25 = vmul.f32 %v9679_v19, %v2644_v49  ;;  %v2630_v61 = vsub.f32 2.0, %v2614_v24  ;;  %v9682_v24 = vld [vmem:[#allocation78_spill] sm:$0xff] }
 0x99c   : > { %v6204_v9 = vpop.eup %6203  ;;  %v2647_v45 = vmul.f32 %v6198_v5, %v2631_v46  ;;  %v2062_v14 = vmul.f32 %v6202_v38, %v2028_v52  ;;  %3103 = vadd.xlane.f32.xlu0 %v8208_v36  ;;  %v2587_v6 = vpop.xlane.xlu1 %2586 }
 0x99d   : > { %9680 = vst [vmem:[#allocation35_spill] sm:$0xff] %v8340_v25  ;;  %v2646_v43 = vmul.f32 %v6200_v10, %v2630_v61  ;;  %v2061_v48 = vmul.f32 %v6204_v9, %v2026_v31  ;;  %6213 = vrcp.f32 %v2587_v6  ;;  %v2585_v47 = vpop.xlane.xlu0 %2584 }
 0x99e   : > { %v8346_v1 = vmul.f32 %v9681_v4, %v2647_v45  ;;  %v2078_v3 = vsub.f32 2.0, %v2062_v14  ;;  %6215 = vrcp.f32 %v2585_v47  ;;  %v9683_v14 = vld [vmem:[#allocation73_spill] sm:$0xff] }
 0x99f   : > { %v6206_v49 = vpop.eup %6205  ;;  %v8349_v63 = vmul.f32 %v9682_v24, %v2646_v43  ;;  %v2077_v52 = vsub.f32 2.0, %v2061_v48  ;;  %v9685_v48 = vld [vmem:[#allocation71_spill] sm:$0xff] }
 0x9a0   : > { %v6208_v5 = vpop.eup %6207  ;;  %v2094_v36 = vmul.f32 %v6202_v38, %v2078_v3  ;;  %v2064_v46 = vmul.f32 %v6206_v49, %v2032_v39  ;;  %3115 = vadd.xlane.f32.xlu0 %v8234_v62  ;;  %v1490_v31 = vpop.xlane.xlu1 %1489 }
 0x9a1   : > { %v2093_v10 = vmul.f32 %v6204_v9, %v2077_v52  ;;  %v2063_v19 = vmul.f32 %v6208_v5, %v2030_v15  ;;  %6217 = vrcp.f32 %v1490_v31  ;;  %v1488_v61 = vpop.xlane.xlu0 %1487 }
 0x9a2   : > { %v8355_v4 = vmul.f32 %v9683_v14, %v2094_v36  ;;  %v2080_v41 = vsub.f32 2.0, %v2064_v46  ;;  %6219 = vrcp.f32 %v1488_v61  ;;  %v9687_v14 = vld [vmem:[#allocation72_spill] sm:$0xff] }
 0x9a3   : > { %v6210_v43 = vpop.eup %6209  ;;  %v8358_v24 = vmul.f32 %v9685_v48, %v2093_v10  ;;  %v2079_v39 = vsub.f32 2.0, %v2063_v19  ;;  %3109 = vadd.xlane.f32.xlu1 %v8220_v26  ;;  %v9688_v26 = vld [vmem:[#allocation70_spill] sm:$0xff] }
 0x9a4   : > { %9684 = vst [vmem:[#allocation37_spill] sm:$0xff] %v8355_v4  ;;  %v6212_v62 = vpop.eup %6211  ;;  %v2096_v38 = vmul.f32 %v6206_v49, %v2080_v41  ;;  %v2617_v15 = vmul.f32 %v6210_v43, %v2583_v57  ;;  %3111 = vadd.xlane.f32.xlu0 %v8224_v50  ;;  %v1494_v9 = vpop.xlane.xlu1 %1493 }
 0x9a5   : > { %9686 = vst [vmem:[#allocation36_spill] sm:$0xff] %v8358_v24  ;;  %v2095_v3 = vmul.f32 %v6208_v5, %v2079_v39  ;;  %v2616_v52 = vmul.f32 %v6212_v62, %v2581_v27  ;;  %6221 = vrcp.f32 %v1494_v9  ;;  %v1492_v36 = vpop.xlane.xlu0 %1491 }
 0x9a6   : > { %v8365_v0 = vmul.f32 %v9687_v14, %v2096_v38  ;;  %v2633_v10 = vsub.f32 2.0, %v2617_v15  ;;  %6223 = vrcp.f32 %v1492_v36  ;;  %v9689_v14 = vld [vmem:[#allocation85_spill] sm:$0xff] }
 0x9a7   : > { %v6214_v19 = vpop.eup %6213  ;;  %v8368_v48 = vmul.f32 %v9688_v26, %v2095_v3  ;;  %v2632_v57 = vsub.f32 2.0, %v2616_v52  ;;  %3105 = vadd.xlane.f32.xlu1 %v8211_v17  ;;  %v9691_v17 = vld [vmem:[#allocation83_spill] sm:$0xff] }
 0x9a8   : > { %v6216_v50 = vpop.eup %6215  ;;  %v2649_v41 = vmul.f32 %v6210_v43, %v2633_v10  ;;  %v2619_v27 = vmul.f32 %v6214_v19, %v2587_v6  ;;  %3123 = vadd.xlane.f32.xlu0 %v8248_v35  ;;  %v1498_v49 = vpop.xlane.xlu1 %1497 }
 0x9a9   : > { %v2648_v5 = vmul.f32 %v6212_v62, %v2632_v57  ;;  %v2618_v39 = vmul.f32 %v6216_v50, %v2585_v47  ;;  %6225 = vrcp.f32 %v1498_v49  ;;  %v1496_v38 = vpop.xlane.xlu0 %1495 }
 0x9aa   : > { %v8375_v46 = vmul.f32 %v9689_v14, %v2649_v41  ;;  %v2635_v3 = vsub.f32 2.0, %v2619_v27  ;;  %6227 = vrcp.f32 %v1496_v38  ;;  %v9693_v14 = vld [vmem:[#allocation84_spill] sm:$0xff] }
 0x9ab   : > { %v6218_v52 = vpop.eup %6217  ;;  %v8378_v26 = vmul.f32 %v9691_v17, %v2648_v5  ;;  %v2634_v6 = vsub.f32 2.0, %v2618_v39  ;;  %3117 = vadd.xlane.f32.xlu1 %v8232_v30  ;;  %v9694_v30 = vld [vmem:[#allocation82_spill] sm:$0xff] }
 0x9ac   : > { %9690 = vst [vmem:[#allocation61_spill] sm:$0xff] %v8375_v46  ;;  %v6220_v35 = vpop.eup %6219  ;;  %v2651_v43 = vmul.f32 %v6214_v19, %v2635_v3  ;;  %v1536_v47 = vmul.f32 %v6218_v52, %v1490_v31  ;;  %3119 = vadd.xlane.f32.xlu0 %v8246_v58  ;;  %v1502_v62 = vpop.xlane.xlu1 %1501 }
 0x9ad   : > { %9692 = vst [vmem:[#allocation59_spill] sm:$0xff] %v8378_v26  ;;  %v2650_v10 = vmul.f32 %v6216_v50, %v2634_v6  ;;  %v1535_v57 = vmul.f32 %v6220_v35, %v1488_v61  ;;  %6229 = vrcp.f32 %v1502_v62  ;;  %v1500_v41 = vpop.xlane.xlu0 %1499 }
 0x9ae   : > { %v8385_v33 = vmul.f32 %v9693_v14, %v2651_v43  ;;  %v1552_v5 = vsub.f32 2.0, %v1536_v47  ;;  %6231 = vrcp.f32 %v1500_v41 }
 0x9af   : > { %v6222_v39 = vpop.eup %6221  ;;  %v8388_v17 = vmul.f32 %v9694_v30, %v2650_v10  ;;  %v1551_v31 = vsub.f32 2.0, %v1535_v57  ;;  %3113 = vadd.xlane.f32.xlu1 %v8226_v40  ;;  %v9695_v10 = vld [vmem:[#allocation45_spill] sm:$0xff]  ;;  %v9696_v40 = vld [vmem:[#allocation43_spill] sm:$0xff] }
 0x9b0   : > { %v6224_v58 = vpop.eup %6223  ;;  %v1568_v19 = vmul.f32 %v6218_v52, %v1552_v5  ;;  %v1538_v61 = vmul.f32 %v6222_v39, %v1494_v9  ;;  %3131 = vadd.xlane.f32.xlu0 %v8264_v54  ;;  %v1506_v50 = vpop.xlane.xlu1 %1505 }
 0x9b1   : > { %v1567_v3 = vmul.f32 %v6220_v35, %v1551_v31  ;;  %v1537_v6 = vmul.f32 %v6224_v58, %v1492_v36  ;;  %6233 = vrcp.f32 %v1506_v50  ;;  %v1504_v43 = vpop.xlane.xlu0 %1503 }
 0x9b2   : > { %v1554_v14 = vsub.f32 2.0, %v1538_v61  ;;  %6235 = vrcp.f32 %v1504_v43  ;;  %v1697_v30 = vmul.f32 %v9695_v10, %v1568_v19  ;;  %v9697_v19 = vld [vmem:[#allocation44_spill] sm:$0xff] }
 0x9b3   : > { %v6226_v57 = vpop.eup %6225  ;;  %v1553_v27 = vsub.f32 2.0, %v1537_v6  ;;  %3125 = vadd.xlane.f32.xlu1 %v8252_v53  ;;  %v1696_v9 = vmul.f32 %v9696_v40, %v1567_v3  ;;  %v9698_v53 = vld [vmem:[#allocation42_spill] sm:$0xff]  ;;  %v9700_v40 = vld [vmem:[#allocation49_spill] sm:$0xff] }
 0x9b4   : > { %v6228_v52 = vpop.eup %6227  ;;  %v1570_v54 = vmul.f32 %v6222_v39, %v1554_v14  ;;  %v1540_v5 = vmul.f32 %v6226_v57, %v1498_v49  ;;  %3127 = vadd.xlane.f32.xlu0 %v8260_v59  ;;  %v1510_v36 = vpop.xlane.xlu1 %1509 }
 0x9b5   : > { %v1569_v35 = vmul.f32 %v6224_v58, %v1553_v27  ;;  %v1539_v31 = vmul.f32 %v6228_v52, %v1496_v38  ;;  %6237 = vrcp.f32 %v1510_v36  ;;  %v1508_v47 = vpop.xlane.xlu0 %1507  ;;  %v1712_v61 = vpack.c.bf16 %v1697_v30, %v1696_v9  ;;  %v9699_v27 = vld [vmem:[#allocation38_spill] sm:$0xff] }
 0x9b6   : > { %v1556_v15 = vsub.f32 2.0, %v1540_v5  ;;  %6239 = vrcp.f32 %v1508_v47  ;;  %v1699_v10 = vmul.f32 %v9697_v19, %v1570_v54  ;;  %v9703_v19 = vld [vmem:[#allocation48_spill] sm:$0xff] }
 0x9b7   : > { %v6230_v6 = vpop.eup %6229  ;;  %v1555_v45 = vsub.f32 2.0, %v1539_v31  ;;  %3121 = vadd.xlane.f32.xlu1 %v8250_v60  ;;  %1720 = vst.msk [vmem:[#allocation2] sm:$0xff] %vm1261_vm0, %v1712_v61  ;;  %v1698_v49 = vmul.f32 %v9698_v53, %v1569_v35  ;;  %v9701_v60 = vld [vmem:[#allocation47_spill] sm:$0xff] }
 0x9b8   : > { %v6232_v39 = vpop.eup %6231  ;;  %v1572_v59 = vmul.f32 %v6226_v57, %v1556_v15  ;;  %v1542_v3 = vmul.f32 %v6230_v6, %v1502_v62  ;;  %1511 = vadd.xlane.f32.xlu0 %v9699_v27  ;;  %v9702_v62 = vld [vmem:[#allocation41_spill] sm:$0xff] }
 0x9b9   : > { %v1571_v38 = vmul.f32 %v6228_v52, %v1555_v45  ;;  %v1541_v58 = vmul.f32 %v6232_v39, %v1500_v41  ;;  %v1713_v14 = vpack.c.bf16 %v1699_v10, %v1698_v49 }
 0x9ba   : > { %v1558_v30 = vsub.f32 2.0, %v1542_v3  ;;  %v1701_v9 = vmul.f32 %v9700_v40, %v1572_v59  ;;  %v9706_v40 = vld [vmem:[#allocation51_spill] sm:$0xff] }
 0x9bb   : > { %v6234_v54 = vpop.eup %6233  ;;  %v1557_v5 = vsub.f32 2.0, %v1541_v58  ;;  %3133 = vadd.xlane.f32.xlu1 %v8258_v34  ;;  %1721 = vst.msk [vmem:[#allocation2 + $0x8] sm:$0xff] %vm1261_vm0, %v1713_v14  ;;  %v1700_v31 = vmul.f32 %v9701_v60, %v1571_v38  ;;  %v9704_v34 = vld [vmem:[#allocation46_spill] sm:$0xff] }
 0x9bc   : > { %v6236_v35 = vpop.eup %6235  ;;  %v1574_v61 = vmul.f32 %v6230_v6, %v1558_v30  ;;  %v1544_v15 = vmul.f32 %v6234_v54, %v1506_v50  ;;  %1515 = vadd.xlane.f32.xlu0 %v9702_v62 }
 0x9bd   : > { %v1573_v57 = vmul.f32 %v6232_v39, %v1557_v5  ;;  %v1543_v45 = vmul.f32 %v6236_v35, %v1504_v43  ;;  %v1714_v41 = vpack.c.bf16 %v1701_v9, %v1700_v31  ;;  %v9705_v43 = vld [vmem:[#allocation53_spill] sm:$0xff]  ;;  %v9707_v31 = vld [vmem:[#allocation52_spill] sm:$0xff] }
 0x9be   : > { %v1560_v52 = vsub.f32 2.0, %v1544_v15  ;;  %v1703_v10 = vmul.f32 %v9703_v19, %v1574_v61  ;;  %v9708_v15 = vld [vmem:[#allocation50_spill] sm:$0xff] }
 0x9bf   : > { %v6238_v53 = vpop.eup %6237  ;;  %v1559_v49 = vsub.f32 2.0, %v1543_v45  ;;  %3129 = vadd.xlane.f32.xlu1 %v8262_v55  ;;  %v1702_v59 = vmul.f32 %v9704_v34, %v1573_v57  ;;  %1722 = vst.msk [vmem:[#allocation2 + $0x10] sm:$0xff] %vm1261_vm0, %v1714_v41  ;;  %v9709_v57 = vld [vmem:[#allocation40_spill] sm:$0xff] }
 0x9c0   : > { %v6240_v3 = vpop.eup %6239  ;;  %v1576_v27 = vmul.f32 %v6234_v54, %v1560_v52  ;;  %v1546_v6 = vmul.f32 %v6238_v53, %v1510_v36  ;;  %v5979_v34 = vld [vmem:[%s7142_s16 + $0x10] sm:$0xff]  }
 0x9c1   : > { %v1575_v50 = vmul.f32 %v6236_v35, %v1559_v49  ;;  %v1545_v38 = vmul.f32 %v6240_v3, %v1508_v47  ;;  %v1715_v58 = vpack.c.bf16 %v1703_v10, %v1702_v59  ;;  %v5978_v49 = vld [vmem:[%s7142_s16 + $0x8] sm:$0xff]   ;;  %v5980_v59 = vld [vmem:[%s7142_s16 + $0x18] sm:$0xff]  }
 0x9c2   : > { %v1562_v39 = vsub.f32 2.0, %v1546_v6  ;;  %v1705_v14 = vmul.f32 %v9705_v43, %v1576_v27  ;;  %v5981_v27 = vld [vmem:[%s7142_s16 + $0x20] sm:$0xff]  }
 0x9c3   : > { %v1561_v30 = vsub.f32 2.0, %v1545_v38  ;;  %1723 = vst.msk [vmem:[#allocation2 + $0x18] sm:$0xff] %vm1261_vm0, %v1715_v58  ;;  %v1704_v9 = vmul.f32 %v9706_v40, %v1575_v50 }
 0x9c4   : > { %v1578_v5 = vmul.f32 %v6238_v53, %v1562_v39  ;;  %v5977_v53 = vld [vmem:[%s7142_s16] sm:$0xff]  }
 0x9c5   : > { %v1577_v55 = vmul.f32 %v6240_v3, %v1561_v30  ;;  %v1716_v60 = vpack.c.bf16 %v1705_v14, %v1704_v9  ;;  %5727 = vmatprep.subr.bf16.mxu0 %v5977_v53 }
 0x9c6   : > { %v1707_v61 = vmul.f32 %v9707_v31, %v1578_v5  ;;  %5728 = vmatpush3.bf16.msra.mxu0 %v5977_v53  ;;  %v5982_v31 = vld [vmem:[%s7142_s16 + $0x28] sm:$0xff]  }
 0x9c7   : > { %v1706_v62 = vmul.f32 %v9708_v15, %v1577_v55  ;;  %1724 = vst.msk [vmem:[#allocation2 + $0x20] sm:$0xff] %vm1261_vm0, %v1716_v60  ;;  %5729 = vmatprep.subr.bf16.mxu0 %v5978_v49 }
 0x9c9   : > { %v1717_v36 = vpack.c.bf16 %v1707_v61, %v1706_v62 }
 0x9ca   : > { %5730 = vmatpush3.bf16.msra.mxu0 %v5978_v49 }
 0x9cb   : > { %1725 = vst.msk [vmem:[#allocation2 + $0x28] sm:$0xff] %vm1261_vm0, %v1717_v36  ;;  %5731 = vmatprep.subr.bf16.mxu0 %v5979_v34 }
 0x9ce   : > { %5732 = vmatpush3.bf16.msra.mxu0 %v5979_v34 }
 0x9cf   : > { %5733 = vmatprep.subr.bf16.mxu0 %v5980_v59 }
 0x9d0   : > { %2815 = vrot.lane.b32.xlu1 %v2798_v8, %s6688_s9 }
 0x9d2   : > { %5734 = vmatpush3.bf16.msra.mxu0 %v5980_v59  ;;  %v5983_v59 = vld [vmem:[%s7142_s16 + $0x30] sm:$0xff]  }
 0x9d3   : > { %5735 = vmatprep.subr.bf16.mxu0 %v5981_v27 }
 0x9d6   : > { %5736 = vmatpush3.bf16.msra.mxu0 %v5981_v27 }
 0x9d7   : > { %5737 = vmatprep.subr.bf16.mxu0 %v5982_v31 }
 0x9da   : > { %5738 = vmatpush3.bf16.msra.mxu0 %v5982_v31 }
 0x9db   : > { %5739 = vmatprep.subr.bf16.mxu0 %v5983_v59 }
 0x9de   : > { %5740 = vmatpush3.bf16.msra.mxu0 %v5983_v59 }
 0x9eb   : > { %v2267_v47 = vpop.permute.xlu0 %2266 }
 0x9ec   : > { %2291 = vst.msk [vmem:[#allocation2] sm:$0xff] %vm2290_vm1, %v2267_v47 }
 0x9ed   : > { %v2269_v54 = vpop.permute.xlu1 %2268 }
 0x9ee   : > { %2292 = vst.msk [vmem:[#allocation2 + $0x8] sm:$0xff] %vm2290_vm1, %v2269_v54 }
 0x9f1   : > { %v2814_v35 = vpop.permute.xlu1 %2813 }
 0x9f2   : > { %2838 = vst.msk [vmem:[#allocation2] sm:$0xff] %vm2837_vm2, %v2814_v35 }
 0x9f4   : > { %1513 = vadd.xlane.f32.xlu1 %v9709_v57 }
 0xa03   : > { %v8427_v45 = vpop.f32.mrb[80].mxu0 }
 0xa04   : > { %v8429_v51 = vpop.f32.mrb[81].mxu0 }
 0xa05   : > { %v8431_v29 = vpop.f32.mrb[82].mxu0 }
 0xa06   : > { %v8433_v8 = vpop.f32.mrb[83].mxu0 }
 0xa0b   : > { %v8435_v41 = vpop.f32.mrb[84].mxu0 }
 0xa0c   : > { %v8437_v52 = vpop.f32.mrb[85].mxu0 }
 0xa0d   : > { %v8439_v19 = vpop.f32.mrb[86].mxu0 }
 0xa0e   : > { %v8441_v10 = vpop.f32.mrb[87].mxu0 }
 0xa25   : > { %v3108_v3 = vpop.xlane.xlu0 %3107 }
 0xa26   : > { %6241 = vrcp.f32 %v3108_v3 }
 0xa29   : > { %v3104_v6 = vpop.xlane.xlu0 %3103 }
 0xa2a   : > { %6243 = vrcp.f32 %v3104_v6 }
 0xa2d   : > { %v3116_v50 = vpop.xlane.xlu0 %3115 }
 0xa2e   : > { %6245 = vrcp.f32 %v3116_v50 }
 0xa30   : > { %v3110_v38 = vpop.xlane.xlu1 %3109  ;;  %v6242_v39 = vpop.eup %6241 }
 0xa31   : > { %v3112_v58 = vpop.xlane.xlu0 %3111  ;;  %6247 = vrcp.f32 %v3110_v38  ;;  %v3153_v14 = vmul.f32 %v6242_v39, %v3108_v3 }
 0xa32   : > { %6249 = vrcp.f32 %v3112_v58 }
 0xa33   : > { %v3169_v5 = vsub.f32 2.0, %v3153_v14 }
 0xa34   : > { %v3106_v43 = vpop.xlane.xlu1 %3105  ;;  %v6244_v40 = vpop.eup %6243 }
 0xa35   : > { %v3124_v30 = vpop.xlane.xlu0 %3123  ;;  %6251 = vrcp.f32 %v3106_v43  ;;  %v3151_v55 = vmul.f32 %v6244_v40, %v3104_v6  ;;  %v3185_v57 = vmul.f32 %v6242_v39, %v3169_v5  ;;  %v5984_v39 = vld [vmem:[%s7142_s16 + $0x38] sm:$0xff]   ;;  %s9733_s16 = sld [smem:[#allocation91_spill]] }
 0xa36   : > { %6253 = vrcp.f32 %v3124_v30  ;;  %5741 = vmatprep.subr.bf16.mxu0 %v5984_v39 }
 0xa37   : > { %v3167_v53 = vsub.f32 2.0, %v3151_v55  ;;  %v3330_v5 = vmul.f32 %v8427_v45, %v3185_v57  ;;  %5742 = vmatpush3.bf16.msra.mxu0 %v5984_v39 }
 0xa38   : > { %v3118_v9 = vpop.xlane.xlu1 %3117  ;;  %v6246_v61 = vpop.eup %6245 }
 0xa39   : > { %v8448_v60 = vpop.xlane.xlu0 %3119  ;;  %6255 = vrcp.f32 %v3118_v9  ;;  %v3157_v27 = vmul.f32 %v6246_v61, %v3116_v50  ;;  %v3183_v55 = vmul.f32 %v6244_v40, %v3167_v53 }
 0xa3a   : > { %v8451_v15 = vpop.f32.mrb[88].mxu0  ;;  %6257 = vrcp.f32 %v8448_v60 }
 0xa3b   : > { %v6248_v62 = vpop.eup %6247  ;;  %v8453_v36 = vpop.f32.mrb[89].mxu0  ;;  %v3173_v23 = vsub.f32 2.0, %v3157_v27 }
 0xa3c   : > { %v3154_v47 = vmul.f32 %v6248_v62, %v3110_v38  ;;  %v8456_v54 = vpop.f32.mrb[90].mxu0  ;;  %v3114_v35 = vpop.xlane.xlu1 %3113 }
 0xa3d   : > { %v8458_v49 = vpop.xlane.xlu0 %3131  ;;  %6259 = vrcp.f32 %v3114_v35  ;;  %v8460_v34 = vpop.f32.mrb[91].mxu0  ;;  %v3189_v27 = vmul.f32 %v6246_v61, %v3173_v23 }
 0xa3e   : > { %v6250_v3 = vpop.eup %6249  ;;  %v3170_v6 = vsub.f32 2.0, %v3154_v47  ;;  %6261 = vrcp.f32 %v8458_v49 }
 0xa3f   : > { %v6252_v14 = vpop.eup %6251  ;;  %v3155_v26 = vmul.f32 %v6250_v3, %v3112_v58  ;;  %v3328_v58 = vmul.f32 %v8429_v51, %v3183_v55  ;;  %v3334_v55 = vmul.f32 %v8435_v41, %v3189_v27 }
 0xa40   : > { %v3186_v38 = vmul.f32 %v6248_v62, %v3170_v6  ;;  %v3152_v42 = vmul.f32 %v6252_v14, %v3106_v43  ;;  %v3126_v12 = vpop.xlane.xlu1 %3125  ;;  %v6254_v18 = vpop.eup %6253 }
 0xa41   : > { %v8466_v31 = vpop.xlane.xlu0 %3127  ;;  %6263 = vrcp.f32 %v3126_v12  ;;  %v3161_v53 = vmul.f32 %v6254_v18, %v3124_v30 }
 0xa42   : > { %v3331_v50 = vmul.f32 %v8431_v29, %v3186_v38  ;;  %v3168_v47 = vsub.f32 2.0, %v3152_v42  ;;  %v8469_v46 = vpop.f32.mrb[92].mxu0  ;;  %6265 = vrcp.f32 %v8466_v31  ;;  %v3171_v38 = vsub.f32 2.0, %v3155_v26 }
 0xa43   : > { %v6256_v43 = vpop.eup %6255  ;;  %v8471_v62 = vpop.f32.mrb[93].mxu0  ;;  %v3177_v39 = vsub.f32 2.0, %v3161_v53 }
 0xa44   : > { %v3184_v59 = vmul.f32 %v6252_v14, %v3168_v47  ;;  %v3158_v6 = vmul.f32 %v6256_v43, %v3118_v9  ;;  %v8474_v45 = vpop.f32.mrb[94].mxu0  ;;  %v3122_v40 = vpop.xlane.xlu1 %3121  ;;  %v3345_v57 = vpack.c.bf16 %v3331_v50, %v3330_v5  ;;  %v3187_v50 = vmul.f32 %v6250_v3, %v3171_v38 }
 0xa45   : > { %6267 = vrcp.f32 %v3122_v40  ;;  %v8477_v42 = vpop.f32.mrb[95].mxu0  ;;  %v6258_v29 = vpop.eup %6257 }
 0xa46   : > { %v3329_v24 = vmul.f32 %v8433_v8, %v3184_v59  ;;  %v3174_v14 = vsub.f32 2.0, %v3158_v6  ;;  %3362 = vrot.lane.b32.xlu1 %v3345_v57, %s6687_s7  ;;  %v3159_v51 = vmul.f32 %v6258_v29, %v8448_v60  ;;  %v9710_v8 = vpack.c.bf16 %v8296_v21, %v8299_v44 }
 0xa47   : > { %v6260_v9 = vpop.eup %6259  ;;  %v3193_v6 = vmul.f32 %v6254_v18, %v3177_v39  ;;  %v3332_v3 = vmul.f32 %v8437_v52, %v3187_v50  ;;  %v9711_v21 = vpack.c.bf16 %v8304_v16, %v8307_v11  ;;  %v9712_v16 = vpack.c.bf16 %v8312_v13, %v8315_v7 }
 0xa48   : > { %v3190_v47 = vmul.f32 %v6256_v43, %v3174_v14  ;;  %v3156_v4 = vmul.f32 %v6260_v9, %v3114_v35  ;;  %v3134_v25 = vpop.xlane.xlu1 %3133  ;;  %v3344_v5 = vpack.c.bf16 %v3329_v24, %v3328_v58  ;;  %v6262_v30 = vpop.eup %6261  ;;  %v3175_v59 = vsub.f32 2.0, %v3159_v51 }
 0xa49   : > { %6269 = vrcp.f32 %v3134_v25  ;;  %v3338_v18 = vmul.f32 %v8451_v15, %v3193_v6 }
 0xa4a   : > { %v3335_v23 = vmul.f32 %v8439_v19, %v3190_v47  ;;  %v3172_v26 = vsub.f32 2.0, %v3156_v4  ;;  %2272 = vrot.lane.b32.xlu1 %v9710_v8, %s6689_s21  ;;  %3360 = vrot.lane.b32.xlu0 %v3344_v5, %s6687_s7  ;;  %v3165_v4 = vmul.f32 %v6262_v30, %v8458_v49  ;;  %v3191_v38 = vmul.f32 %v6258_v29, %v3175_v59  ;;  %v9722_v59 = vld [vmem:[#allocation55_spill] sm:$0xff] }
 0xa4b   : > { %v6264_v61 = vpop.eup %6263 }
 0xa4c   : > { %v3188_v24 = vmul.f32 %v6260_v9, %v3172_v26  ;;  %v3162_v35 = vmul.f32 %v6264_v61, %v3126_v12  ;;  %v3130_v43 = vpop.xlane.xlu1 %3129  ;;  %v3347_v60 = vpack.c.bf16 %v3335_v23, %v3334_v55  ;;  %v6266_v41 = vpop.eup %6265  ;;  %v3181_v52 = vsub.f32 2.0, %v3165_v4 }
 0xa4d   : > { %6271 = vrcp.f32 %v3130_v43  ;;  %v3163_v49 = vmul.f32 %v6266_v41, %v8466_v31  ;;  %v3336_v15 = vmul.f32 %v8453_v36, %v3191_v38  ;;  %v9713_v36 = vpack.c.bf16 %v8328_v32, %v8331_v56  ;;  %v9716_v32 = vld [vmem:[#allocation39_spill] sm:$0xff] }
 0xa4e   : > { %v3333_v19 = vmul.f32 %v8441_v10, %v3188_v24  ;;  %v3178_v57 = vsub.f32 2.0, %v3162_v35  ;;  %2817 = vrot.lane.b32.xlu1 %v9711_v21, %s6688_s9  ;;  %v3197_v5 = vmul.f32 %v6262_v30, %v3181_v52  ;;  %v9717_v56 = vpack.c.bf16 %v8385_v33, %v8388_v17 }
 0xa4f   : > { %v6268_v44 = vpop.eup %6267  ;;  %v3179_v29 = vsub.f32 2.0, %v3163_v49  ;;  %v9719_v33 = vpack.c.bf16 %v8320_v2, %v8323_v20  ;;  %v9724_v2 = vld [vmem:[#allocation37_spill] sm:$0xff]  ;;  %v9725_v20 = vld [vmem:[#allocation36_spill] sm:$0xff] }
 0xa50   : > { %v3194_v12 = vmul.f32 %v6264_v61, %v3178_v57  ;;  %v3160_v58 = vmul.f32 %v6268_v44, %v3122_v40  ;;  %v2816_v53 = vpop.permute.xlu1 %2815  ;;  %v3346_v27 = vpack.c.bf16 %v3333_v19, %v3332_v3  ;;  %v3342_v13 = vmul.f32 %v8469_v46, %v3197_v5  ;;  %v9728_v57 = vld [vmem:[#allocation59_spill] sm:$0xff] }
 0xa51   : > { %2839 = vst.msk [vmem:[#allocation2 + $0x8] sm:$0xff] %vm2837_vm2, %v2816_v53  ;;  %v3195_v7 = vmul.f32 %v6266_v41, %v3179_v29  ;;  %v9714_v61 = vpack.c.bf16 %v8346_v1, %v8349_v63  ;;  %v9718_v1 = vpack.c.bf16 %v8288_v22, %v8291_v37  ;;  %v9723_v41 = vld [vmem:[#allocation57_spill] sm:$0xff]  ;;  %v9726_v4 = vpack.c.bf16 %v9724_v2, %v9725_v20 }
 0xa52   : > { %v3339_v10 = vmul.f32 %v8456_v54, %v3194_v12  ;;  %v3176_v14 = vsub.f32 2.0, %v3160_v58  ;;  %2819 = vrot.lane.b32.xlu1 %v9712_v16, %s6688_s9  ;;  %v6348_v20 = vld [vmem:[%s7194_s6 + $0x18] sm:$0xff] }
 0xa53   : > { %v6270_v11 = vpop.eup %6269  ;;  %v3340_v26 = vmul.f32 %v8471_v62, %v3195_v7  ;;  %v1512_v62 = vpop.xlane.xlu0 %1511 }
 0xa54   : > { %v3192_v40 = vmul.f32 %v6268_v44, %v3176_v14  ;;  %v3166_v9 = vmul.f32 %v6270_v11, %v3134_v25  ;;  %v3349_v47 = vpack.c.bf16 %v3339_v10, %v3338_v18  ;;  %6273 = vrcp.f32 %v1512_v62 }
 0xa56   : > { %v3337_v39 = vmul.f32 %v8460_v34, %v3192_v40  ;;  %v3182_v51 = vsub.f32 2.0, %v3166_v9  ;;  %3366 = vrot.lane.b32.xlu1 %v3347_v60, %s6687_s7 }
 0xa57   : > { %v6272_v54 = vpop.eup %6271  ;;  %v1516_v44 = vpop.xlane.xlu0 %1515 }
 0xa58   : > { %v3198_v31 = vmul.f32 %v6270_v11, %v3182_v51  ;;  %v3164_v55 = vmul.f32 %v6272_v54, %v3130_v43  ;;  %v3348_v50 = vpack.c.bf16 %v3337_v39, %v3336_v15 }
 0xa5a   : > { %v3343_v23 = vmul.f32 %v8474_v45, %v3198_v31  ;;  %v3180_v25 = vsub.f32 2.0, %v3164_v55  ;;  %2276 = vrot.lane.b32.xlu1 %v9713_v36, %s6689_s21  ;;  %v9715_v45 = vpack.c.bf16 %v8365_v0, %v8368_v48 }
 0xa5c   : > { %v3196_v30 = vmul.f32 %v6272_v54, %v3180_v25  ;;  %v3351_v34 = vpack.c.bf16 %v3343_v23, %v3342_v13  ;;  %v9730_v25 = vld [vmem:[#allocation54_spill] sm:$0xff] }
 0xa5e   : > { %v3341_v8 = vmul.f32 %v8477_v42, %v3196_v30  ;;  %2823 = vrot.lane.b32.xlu1 %v9714_v61, %s6688_s9  ;;  %v6274_v0 = vpop.eup %6273  ;;  %v9720_v42 = vld [vmem:[#allocation35_spill] sm:$0xff] }
 0xa5f   : > { %v1547_v48 = vmul.f32 %v6274_v0, %v1512_v62  ;;  %v9721_v24 = vpack.c.bf16 %v8337_v28, %v9720_v42  ;;  %v9727_v28 = vld [vmem:[#allocation61_spill] sm:$0xff] }
 0xa60   : > { %v3350_v46 = vpack.c.bf16 %v3341_v8, %v3340_v26  ;;  %v9729_v21 = vpack.c.bf16 %v9727_v28, %v9728_v57 }
 0xa61   : > { %v1563_v17 = vsub.f32 2.0, %v1547_v48  ;;  %v8584_v48 = vld [vmem:[%s777_s29] ss:$0 sm:$0xff] }
 0xa62   : > { %3370 = vrot.lane.b32.xlu1 %v3349_v47, %s6687_s7 }
 0xa63   : > { %v1579_v37 = vmul.f32 %v6274_v0, %v1563_v17 }
 0xa65   : > { %v1708_v6 = vmul.f32 %v9722_v59, %v1579_v37  ;;  %v6345_v37 = vld [vmem:[%s7194_s6] sm:$0xff]  ;;  %v6346_v59 = vld [vmem:[%s7194_s6 + $0x8] sm:$0xff] }
 0xa66   : > { %2280 = vrot.lane.b32.xlu1 %v9715_v45, %s6689_s21 }
 0xa69   : > { %1517 = vadd.xlane.f32.xlu0 %v9716_v32 }
 0xa6a   : > { %2827 = vrot.lane.b32.xlu1 %v9717_v56, %s6688_s9 }
 0xa6e   : > { %3374 = vrot.lane.b32.xlu1 %v3351_v34, %s6687_s7  ;;  %v9731_v34 = vld [vmem:[#allocation56_spill] sm:$0xff] }
 0xa7f   : > { %2270 = vrot.lane.b32.xlu0 %v9718_v1, %s6689_s21 }
 0xa81   : > { %v1514_v63 = vpop.xlane.xlu1 %1513 }
 0xa82   : > { %6275 = vrcp.f32 %v1514_v63 }
 0xa83   : > { %3364 = vrot.lane.b32.xlu0 %v3346_v27, %s6687_s7  ;;  %6277 = vrcp.f32 %v1516_v44 }
 0xa87   : > { %2274 = vrot.lane.b32.xlu0 %v9719_v33, %s6689_s21 }
 0xa8b   : > { %2821 = vrot.lane.b32.xlu0 %v9721_v24, %s6688_s9 }
 0xa8c   : > { %v6276_v35 = vpop.eup %6275 }
 0xa8d   : > { %v1548_v22 = vmul.f32 %v6276_v35, %v1514_v63  ;;  %v6278_v40 = vpop.eup %6277 }
 0xa8e   : > { %v1549_v47 = vmul.f32 %v6278_v40, %v1516_v44 }
 0xa8f   : > { %v1564_v43 = vsub.f32 2.0, %v1548_v22  ;;  %3368 = vrot.lane.b32.xlu0 %v3348_v50, %s6687_s7 }
 0xa90   : > { %v1565_v29 = vsub.f32 2.0, %v1549_v47 }
 0xa91   : > { %v1580_v60 = vmul.f32 %v6276_v35, %v1564_v43 }
 0xa92   : > { %v1581_v31 = vmul.f32 %v6278_v40, %v1565_v29 }
 0xa93   : > { %v1709_v3 = vmul.f32 %v9723_v41, %v1580_v60  ;;  %2278 = vrot.lane.b32.xlu0 %v9726_v4, %s6689_s21  ;;  %v6347_v41 = vld [vmem:[%s7194_s6 + $0x10] sm:$0xff] }
 0xa94   : > { %v1710_v36 = vmul.f32 %v9730_v25, %v1581_v31  ;;  %v6354_v31 = vld [vmem:[%s7194_s6 + $0x48] sm:$0xff] }
 0xa95   : > { %v1718_v19 = vpack.c.bf16 %v1709_v3, %v1708_v6 }
 0xa97   : > { %2825 = vrot.lane.b32.xlu0 %v9729_v21, %s6688_s9  ;;  %1726 = vst.msk [vmem:[#allocation2 + $0x30] sm:$0xff] %vm1261_vm0, %v1718_v19 }
 0xa9b   : > { %3372 = vrot.lane.b32.xlu0 %v3350_v46, %s6687_s7 }
 0xab8   : > { %v3363_v12 = vpop.permute.xlu1 %3362 }
 0xab9   : > { %3386 = vst.msk [vmem:[#allocation2 + $0x8] sm:$0xff] %vm3384_vm3, %v3363_v12 }
 0xabc   : > { %v3361_v58 = vpop.permute.xlu0 %3360  ;;  %v2273_v53 = vpop.permute.xlu1 %2272 }
 0xabd   : > { %3385 = vst.msk [vmem:[#allocation2] sm:$0xff] %vm3384_vm3, %v3361_v58  ;;  %v6349_v58 = vld [vmem:[%s7194_s6 + $0x20] sm:$0xff] }
 0xabe   : > { %2294 = vst.msk [vmem:[#allocation2 + $0x18] sm:$0xff] %vm2290_vm1, %v2273_v53 }
 0xac0   : > { %v2818_v27 = vpop.permute.xlu1 %2817  ;;  %v3394_v52 = vld [vmem:[#allocation2 + $0x8] sm:$0xff] }
 0xac4   : > { %v2820_v18 = vpop.permute.xlu1 %2819  ;;  %v3393_v38 = vld [vmem:[#allocation2] sm:$0xff] }
 0xac5   : > { %2841 = vst.msk [vmem:[#allocation2 + $0x18] sm:$0xff] %vm2837_vm2, %v2820_v18  ;;  %5743 = vmatprep.mubr.bf16.mxu0 %v3393_v38  ;;  %v6350_v38 = vld [vmem:[%s7194_s6 + $0x28] sm:$0xff] }
 0xac6   : > { %5744 = vmatmul.mubr.bf16.vlgmr.msra.gmra.mrb[96].mxu0 %v3394_v52 }
 0xac8   : > { %v3367_v49 = vpop.permute.xlu1 %3366 }
 0xac9   : > { %3388 = vst.msk [vmem:[#allocation2 + $0x18] sm:$0xff] %vm3384_vm3, %v3367_v49  ;;  %v6351_v49 = vld [vmem:[%s7194_s6 + $0x30] sm:$0xff] }
 0xacc   : > { %v2277_v10 = vpop.permute.xlu1 %2276 }
 0xacd   : > { %2296 = vst.msk [vmem:[#allocation2 + $0x28] sm:$0xff] %vm2290_vm1, %v2277_v10 }
 0xad0   : > { %v2824_v14 = vpop.permute.xlu1 %2823  ;;  %v3396_v23 = vld [vmem:[#allocation2 + $0x18] sm:$0xff] }
 0xad1   : > { %2843 = vst.msk [vmem:[#allocation2 + $0x28] sm:$0xff] %vm2837_vm2, %v2824_v14  ;;  %v6352_v14 = vld [vmem:[%s7194_s6 + $0x38] sm:$0xff] }
 0xad4   : > { %v3371_v16 = vpop.permute.xlu1 %3370 }
 0xad5   : > { %3390 = vst.msk [vmem:[#allocation2 + $0x28] sm:$0xff] %vm3384_vm3, %v3371_v16 }
 0xad8   : > { %v2281_v39 = vpop.permute.xlu1 %2280 }
 0xadc   : > { %v2828_v30 = vpop.permute.xlu1 %2827  ;;  %v3398_v62 = vld [vmem:[#allocation2 + $0x28] sm:$0xff] }
 0xae0   : > { %v3375_v46 = vpop.permute.xlu1 %3374 }
 0xaf6   : > { %v1518_v11 = vpop.xlane.xlu0 %1517 }
 0xaf7   : > { %6279 = vrcp.f32 %v1518_v11 }
 0xafa   : > { %v2271_v9 = vpop.permute.xlu0 %2270 }
 0xafb   : > { %2293 = vst.msk [vmem:[#allocation2 + $0x10] sm:$0xff] %vm2290_vm1, %v2271_v9 }
 0xafc   : > { %2840 = vst.msk [vmem:[#allocation2 + $0x10] sm:$0xff] %vm2837_vm2, %v2818_v27 }
 0xafe   : > { %v3365_v15 = vpop.permute.xlu0 %3364 }
 0xaff   : > { %3387 = vst.msk [vmem:[#allocation2 + $0x10] sm:$0xff] %vm3384_vm3, %v3365_v15 }
 0xb01   : > { %v6280_v5 = vpop.eup %6279 }
 0xb02   : > { %v1550_v51 = vmul.f32 %v6280_v5, %v1518_v11  ;;  %v2275_v54 = vpop.permute.xlu0 %2274 }
 0xb03   : > { %2295 = vst.msk [vmem:[#allocation2 + $0x20] sm:$0xff] %vm2290_vm1, %v2275_v54 }
 0xb04   : > { %v1566_v55 = vsub.f32 2.0, %v1550_v51 }
 0xb06   : > { %v1582_v50 = vmul.f32 %v6280_v5, %v1566_v55  ;;  %v2822_v13 = vpop.permute.xlu0 %2821  ;;  %v3395_v7 = vld [vmem:[#allocation2 + $0x10] sm:$0xff]  ;;  %v6353_v5 = vld [vmem:[%s7194_s6 + $0x40] sm:$0xff] }
 0xb07   : > { %2842 = vst.msk [vmem:[#allocation2 + $0x20] sm:$0xff] %vm2837_vm2, %v2822_v13  ;;  %5747 = vmatprep.mubr.bf16.mxu0 %v3395_v7  ;;  %v6356_v7 = vld [vmem:[%s7194_s6 + $0x58] sm:$0xff] }
 0xb08   : > { %v1711_v26 = vmul.f32 %v9731_v34, %v1582_v50  ;;  %5748 = vmatmul.mubr.bf16.gmra.mrb[100].mxu0 %v3396_v23  ;;  %v6355_v50 = vld [vmem:[%s7194_s6 + $0x50] sm:$0xff] }
 0xb0a   : > { %v1719_v8 = vpack.c.bf16 %v1711_v26, %v1710_v36  ;;  %v3369_v61 = vpop.permute.xlu0 %3368 }
 0xb0b   : > { %3389 = vst.msk [vmem:[#allocation2 + $0x20] sm:$0xff] %vm3384_vm3, %v3369_v61  ;;  %v6357_v61 = vld [vmem:[%s7194_s6 + $0x60] sm:$0xff] }
 0xb0c   : > { %1727 = vst.msk [vmem:[#allocation2 + $0x38] sm:$0xff] %vm1261_vm0, %v1719_v8 }
 0xb0d   : > { %2298 = vst.msk [vmem:[#allocation2 + $0x38] sm:$0xff] %vm2290_vm1, %v2281_v39 }
 0xb0e   : > { %2845 = vst.msk [vmem:[#allocation2 + $0x38] sm:$0xff] %vm2837_vm2, %v2828_v30  ;;  %v2279_v45 = vpop.permute.xlu0 %2278 }
 0xb0f   : > { %3392 = vst.msk [vmem:[#allocation2 + $0x38] sm:$0xff] %vm3384_vm3, %v3375_v46 }
 0xb10   : > { %2297 = vst.msk [vmem:[#allocation2 + $0x30] sm:$0xff] %vm2290_vm1, %v2279_v45 }
 0xb12   : > { %v2826_v32 = vpop.permute.xlu0 %2825  ;;  %v3397_v56 = vld [vmem:[#allocation2 + $0x20] sm:$0xff] }
 0xb13   : > { %2844 = vst.msk [vmem:[#allocation2 + $0x30] sm:$0xff] %vm2837_vm2, %v2826_v32  ;;  %5751 = vmatprep.mubr.bf16.mxu0 %v3397_v56  ;;  %v6358_v56 = vld [vmem:[%s7194_s6 + $0x68] sm:$0xff] }
 0xb14   : > { %5752 = vmatmul.mubr.bf16.gmra.mrb[104].mxu0 %v3398_v62 }
 0xb16   : > { %v3373_v1 = vpop.permute.xlu0 %3372  ;;  %v3400_v0 = vld [vmem:[#allocation2 + $0x38] sm:$0xff] }
 0xb17   : > { %3391 = vst.msk [vmem:[#allocation2 + $0x30] sm:$0xff] %vm3384_vm3, %v3373_v1  ;;  %v6359_v1 = vld [vmem:[%s7194_s6 + $0x70] sm:$0xff] }
 0xb1e   : > { %v3399_v63 = vld [vmem:[#allocation2 + $0x30] sm:$0xff] }
 0xb1f   : > { %5755 = vmatprep.mubr.bf16.mxu0 %v3399_v63 }
 0xb20   : > { %5756 = vmatmul.mubr.bf16.gmra.mrb[108].mxu0 %v3400_v0  ;;  %v6360_v0 = vld [vmem:[%s7194_s6 + $0x78] sm:$0xff] }
 0xb99   : > { %v5745_v33 = vpop.f32.mrb[96].mxu0 }
 0xb9a   : > { %v3506_v17 = vpop.f32.mrb[97].mxu0  ;;  %v3515_v22 = vadd.f32 %v5745_v33, %v8584_v48 }
 0xb9b   : > { %v3507_v42 = vadd.f32 %v8584_v48, %v3506_v17  ;;  %v5746_v24 = vpop.f32.mrb[98].mxu0  ;;  %v5985_v17 = vld [vmem:[%s7144_s17] ss:$8 sps:$4 sm:$0xff]  }
 0xb9c   : > { %v3509_v35 = vpop.f32.mrb[99].mxu0  ;;  %v8597_v3 = vadd.f32 %v6347_v41, %v3515_v22  ;;  %v3518_v2 = vadd.f32 %v5746_v24, %v8584_v48  ;;  %v5988_v24 = vld [vmem:[%s7144_s17 + $0x10] ss:$8 sps:$4 sm:$0xff]  }
 0xb9d   : > { %v8589_v43 = vadd.f32 %v6345_v37, %v3507_v42  ;;  %v3510_v60 = vadd.f32 %v8584_v48, %v3509_v35  ;;  %v5990_v42 = vld [vmem:[%s7144_s17 + $0x14] ss:$8 sps:$4 sm:$0xff]  }
 0xb9e   : > { %v8603_v4 = vadd.f32 %v6348_v20, %v3518_v2 }
 0xb9f   : > { %v8593_v6 = vadd.f32 %v6346_v59, %v3510_v60  ;;  %3587 = vadd.xlane.f32.xlu0 %v8589_v43 }
 0xba1   : > { %3589 = vadd.xlane.f32.xlu1 %v8593_v6 }
 0xba3   : > { %3591 = vadd.xlane.f32.xlu0 %v8597_v3 }
 0xba7   : > { %3593 = vadd.xlane.f32.xlu0 %v8603_v4 }
 0xbdb   : > { %v5749_v19 = vpop.f32.mrb[100].mxu0 }
 0xbdc   : > { %v3522_v28 = vpop.f32.mrb[101].mxu0  ;;  %v3531_v12 = vadd.f32 %v5749_v19, %v8584_v48 }
 0xbdd   : > { %v3523_v57 = vadd.f32 %v8584_v48, %v3522_v28  ;;  %v5750_v21 = vpop.f32.mrb[102].mxu0 }
 0xbde   : > { %v3525_v44 = vpop.f32.mrb[103].mxu0  ;;  %v3534_v18 = vadd.f32 %v5750_v21, %v8584_v48  ;;  %v8618_v10 = vadd.f32 %v6351_v49, %v3531_v12  ;;  %v5993_v12 = vld [vmem:[%s7144_s17 + $0x24] ss:$8 sps:$4 sm:$0xff]   ;;  %v6002_v49 = vld [vmem:[%s7144_s17 + $0x54] ss:$8 sps:$4 sm:$0xff]  }
 0xbdf   : > { %v8609_v53 = vadd.f32 %v6349_v58, %v3523_v57  ;;  %v3526_v27 = vadd.f32 %v8584_v48, %v3525_v44  ;;  %v5991_v58 = vld [vmem:[%s7144_s17 + $0x20] ss:$8 sps:$4 sm:$0xff]  }
 0xbe0   : > { %v8622_v16 = vadd.f32 %v6352_v14, %v3534_v18  ;;  %v5994_v18 = vld [vmem:[%s7144_s17 + $0x30] ss:$8 sps:$4 sm:$0xff]  }
 0xbe1   : > { %v8614_v52 = vadd.f32 %v6350_v38, %v3526_v27  ;;  %3595 = vadd.xlane.f32.xlu0 %v8609_v53  ;;  %v5996_v27 = vld [vmem:[%s7144_s17 + $0x34] ss:$8 sps:$4 sm:$0xff]   ;;  %v5997_v38 = vld [vmem:[%s7144_s17 + $0x40] ss:$8 sps:$4 sm:$0xff]   ;;  %v6000_v14 = vld [vmem:[%s7144_s17 + $0x50] ss:$8 sps:$4 sm:$0xff]  }
 0xbe3   : > { %3597 = vadd.xlane.f32.xlu1 %v8614_v52 }
 0xbe5   : > { %3599 = vadd.xlane.f32.xlu0 %v8618_v10 }
 0xbe7   : > { %3601 = vadd.xlane.f32.xlu1 %v8622_v16  ;;  %v5753_v11 = vpop.f32.mrb[104].mxu0 }
 0xbe8   : > { %v3538_v40 = vpop.f32.mrb[105].mxu0  ;;  %v3547_v29 = vadd.f32 %v5753_v11, %v8584_v48  ;;  %v6005_v11 = vld [vmem:[%s7144_s17 + $0x64] ss:$8 sps:$4 sm:$0xff]  }
 0xbe9   : > { %v3539_v9 = vadd.f32 %v8584_v48, %v3538_v40  ;;  %v5754_v47 = vpop.f32.mrb[106].mxu0  ;;  %v6003_v40 = vld [vmem:[%s7144_s17 + $0x60] ss:$8 sps:$4 sm:$0xff]  }
 0xbea   : > { %v3541_v15 = vpop.f32.mrb[107].mxu0  ;;  %v3550_v54 = vadd.f32 %v5754_v47, %v8584_v48  ;;  %v8638_v13 = vadd.f32 %v6355_v50, %v3547_v29  ;;  %v6006_v47 = vld [vmem:[%s7144_s17 + $0x70] ss:$8 sps:$4 sm:$0xff]  }
 0xbeb   : > { %v8629_v39 = vadd.f32 %v6353_v5, %v3539_v9  ;;  %v3542_v51 = vadd.f32 %v8584_v48, %v3541_v15  ;;  %v6008_v9 = vld [vmem:[%s7144_s17 + $0x74] ss:$8 sps:$4 sm:$0xff]  }
 0xbec   : > { %v8642_v23 = vadd.f32 %v6356_v7, %v3550_v54 }
 0xbed   : > { %v8634_v55 = vadd.f32 %v6354_v31, %v3542_v51  ;;  %3603 = vadd.xlane.f32.xlu0 %v8629_v39 }
 0xbef   : > { %3605 = vadd.xlane.f32.xlu1 %v8634_v55 }
 0xbf1   : > { %3607 = vadd.xlane.f32.xlu0 %v8638_v13 }
 0xbf3   : > { %3609 = vadd.xlane.f32.xlu1 %v8642_v23  ;;  %v5757_v25 = vpop.f32.mrb[108].mxu0 }
 0xbf4   : > { %v3554_v36 = vpop.f32.mrb[109].mxu0  ;;  %v3563_v8 = vadd.f32 %v5757_v25, %v8584_v48 }
 0xbf5   : > { %v3555_v30 = vadd.f32 %v8584_v48, %v3554_v36  ;;  %v5758_v34 = vpop.f32.mrb[110].mxu0 }
 0xbf6   : > { %v3557_v26 = vpop.f32.mrb[111].mxu0  ;;  %v3566_v32 = vadd.f32 %v5758_v34, %v8584_v48  ;;  %v8658_v63 = vadd.f32 %v6359_v1, %v3563_v8 }
 0xbf7   : > { %v8649_v46 = vadd.f32 %v6357_v61, %v3555_v30  ;;  %v3558_v45 = vadd.f32 %v8584_v48, %v3557_v26  ;;  %v5987_v48 = vld [vmem:[%s7144_s17 + $0x4] ss:$8 sps:$4 sm:$0xff]  }
 0xbf8   : > { %v8662_v33 = vadd.f32 %v6360_v0, %v3566_v32  ;;  %3924 = vmatprep.subr.bf16.mxu1 %v5987_v48 }
 0xbf9   : > { %v8654_v62 = vadd.f32 %v6358_v56, %v3558_v45  ;;  %3611 = vadd.xlane.f32.xlu0 %v8649_v46  ;;  %3925 = vmatpush1.bf16.msra.mxu1 %v5985_v17 }
 0xbfa   : > { %3926 = vmatprep.subr.bf16.mxu1 %v5990_v42 }
 0xbfb   : > { %3613 = vadd.xlane.f32.xlu1 %v8654_v62 }
 0xbfd   : > { %3615 = vadd.xlane.f32.xlu0 %v8658_v63  ;;  %3927 = vmatpush1.bf16.msra.mxu1 %v5988_v24 }
 0xbfe   : > { %3928 = vmatprep.subr.bf16.mxu1 %v5993_v12 }
 0xbff   : > { %3617 = vadd.xlane.f32.xlu1 %v8662_v33 }
 0xc01   : > { %3929 = vmatpush1.bf16.msra.mxu1 %v5991_v58 }
 0xc02   : > { %3930 = vmatprep.subr.bf16.mxu1 %v5996_v27 }
 0xc05   : > { %3931 = vmatpush1.bf16.msra.mxu1 %v5994_v18 }
 0xc2c   : > { %v3588_v35 = vpop.xlane.xlu0 %3587 }
 0xc2d   : > { %v3620_v22 = vmul.f32 0.0078125, %v3588_v35 }
 0xc2e   : > { %v3590_v37 = vpop.xlane.xlu1 %3589 }
 0xc2f   : > { %v8671_v60 = vsub.f32 %v8589_v43, %v3620_v22  ;;  %v3621_v59 = vmul.f32 0.0078125, %v3590_v37 }
 0xc30   : > { %v3592_v41 = vpop.xlane.xlu0 %3591 }
 0xc31   : > { %v8674_v2 = vsub.f32 %v8593_v6, %v3621_v59  ;;  %v3622_v20 = vmul.f32 0.0078125, %v3592_v41  ;;  %v3652_v19 = vmul.f32 %v8671_v60, %v8671_v60 }
 0xc33   : > { %v8679_v28 = vsub.f32 %v8597_v3, %v3622_v20  ;;  %3668 = vadd.xlane.f32.xlu0 %v3652_v19  ;;  %v3653_v43 = vmul.f32 %v8674_v2, %v8674_v2 }
 0xc34   : > { %v3594_v57 = vpop.xlane.xlu0 %3593 }
 0xc35   : > { %v3623_v21 = vmul.f32 0.0078125, %v3594_v57  ;;  %3670 = vadd.xlane.f32.xlu1 %v3653_v43  ;;  %v3654_v6 = vmul.f32 %v8679_v28, %v8679_v28 }
 0xc37   : > { %v8686_v44 = vsub.f32 %v8603_v4, %v3623_v21  ;;  %3672 = vadd.xlane.f32.xlu0 %v3654_v6  ;;  %v5999_v4 = vld [vmem:[%s7144_s17 + $0x44] ss:$8 sps:$4 sm:$0xff]   ;;  %s9734_s17 = scalar_lea.vmem %s9733_s16, %s7152_s10  ;;  %s9744_s10 = sld [smem:[#allocation22_spill]] }
 0xc38   : > { %3932 = vmatprep.subr.bf16.mxu1 %v5999_v4 }
 0xc39   : > { %v3655_v3 = vmul.f32 %v8686_v44, %v8686_v44  ;;  %3933 = vmatpush1.bf16.msra.mxu1 %v5997_v38 }
 0xc3a   : > { %3934 = vmatprep.subr.bf16.mxu1 %v6002_v49 }
 0xc3b   : > { %3674 = vadd.xlane.f32.xlu1 %v3655_v3 }
 0xc3d   : > { %3935 = vmatpush1.bf16.msra.mxu1 %v6000_v14  ;;  %v6009_v14 = vld [vmem:[%s7190_s3 + $0x40] sm:$0xff]   ;;  %p5202_p10 = scmp.ne.s32.totalorder %s9744_s10, 1 }
 0xc3e   : > { %3936 = vmatprep.subr.bf16.mxu1 %v6005_v11  ;;  %v6011_v11 = vld [vmem:[%s7190_s3 + $0x48] sm:$0xff]   ;;  %5375 = vmatprep.subr.bf16.mxu0 %v6009_v14  ;;  %s9746_s9 = sld [smem:[#allocation100_spill]] (!%p5202_p10) }
 0xc41   : > { %3937 = vmatpush1.bf16.msra.mxu1 %v6003_v40 }
 0xc42   : > { %3938 = vmatprep.subr.bf16.mxu1 %v6008_v9 }
 0xc45   : > { %3939 = vmatpush1.bf16.msra.mxu1 %v6006_v47 }
 0xc46   : > { %5759 = vmatprep.subr.bf16.mxu1 %v6009_v14 }
 0xc6e   : > { %v3596_v15 = vpop.xlane.xlu0 %3595 }
 0xc6f   : > { %v3624_v29 = vmul.f32 0.0078125, %v3596_v15  ;;  %v6012_v15 = vld [vmem:[%s7190_s3 + $0x8] sm:$0xff]  }
 0xc70   : > { %v3598_v5 = vpop.xlane.xlu1 %3597 }
 0xc71   : > { %v8703_v51 = vsub.f32 %v8609_v53, %v3624_v29  ;;  %v3625_v54 = vmul.f32 0.0078125, %v3598_v5  ;;  %v6013_v5 = vld [vmem:[%s7190_s3 + $0x50] sm:$0xff]  }
 0xc72   : > { %v3600_v31 = vpop.xlane.xlu0 %3599 }
 0xc73   : > { %v8706_v50 = vsub.f32 %v8614_v52, %v3625_v54  ;;  %v3626_v7 = vmul.f32 0.0078125, %v3600_v31  ;;  %v3656_v25 = vmul.f32 %v8703_v51, %v8703_v51 }
 0xc74   : > { %v3602_v36 = vpop.xlane.xlu1 %3601 }
 0xc75   : > { %v8711_v30 = vsub.f32 %v8618_v10, %v3626_v7  ;;  %v3627_v34 = vmul.f32 0.0078125, %v3602_v36  ;;  %3676 = vadd.xlane.f32.xlu0 %v3656_v25  ;;  %v3657_v26 = vmul.f32 %v8706_v50, %v8706_v50  ;;  %v6014_v7 = vld [vmem:[%s7190_s3 + $0x10] sm:$0xff]   ;;  %v6015_v25 = vld [vmem:[%s7190_s3 + $0x58] sm:$0xff]  }
 0xc77   : > { %v8716_v53 = vsub.f32 %v8622_v16, %v3627_v34  ;;  %3678 = vadd.xlane.f32.xlu1 %v3657_v26  ;;  %v3658_v52 = vmul.f32 %v8711_v30, %v8711_v30  ;;  %v8774_v34 = vld [vmem:[%s9734_s17] ss:$0 sm:$0xff]  ;;  %v6016_v26 = vld [vmem:[%s7190_s3 + $0x18] sm:$0xff]  }
 0xc79   : > { %3680 = vadd.xlane.f32.xlu0 %v3658_v52  ;;  %v3659_v8 = vmul.f32 %v8716_v53, %v8716_v53 }
 0xc7a   : > { %v3604_v61 = vpop.xlane.xlu0 %3603 }
 0xc7b   : > { %v3628_v45 = vmul.f32 0.0078125, %v3604_v61  ;;  %3682 = vadd.xlane.f32.xlu1 %v3659_v8  ;;  %v6017_v8 = vld [vmem:[%s7190_s3 + $0x60] sm:$0xff]  }
 0xc7c   : > { %v3606_v10 = vpop.xlane.xlu1 %3605 }
 0xc7d   : > { %v8723_v32 = vsub.f32 %v8629_v39, %v3628_v45  ;;  %v3629_v56 = vmul.f32 0.0078125, %v3606_v10 }
 0xc7e   : > { %v3608_v1 = vpop.xlane.xlu0 %3607 }
 0xc7f   : > { %v8726_v16 = vsub.f32 %v8634_v55, %v3629_v56  ;;  %v3630_v0 = vmul.f32 0.0078125, %v3608_v1  ;;  %v3660_v17 = vmul.f32 %v8723_v32, %v8723_v32  ;;  %v8786_v1 = vld [vmem:[%s9736_s30] ss:$0 sm:$0xff] }
 0xc80   : > { %v3610_v48 = vpop.xlane.xlu1 %3609 }
 0xc81   : > { %v8731_v42 = vsub.f32 %v8638_v13, %v3630_v0  ;;  %v3631_v24 = vmul.f32 0.0078125, %v3610_v48  ;;  %3684 = vadd.xlane.f32.xlu0 %v3660_v17  ;;  %v3661_v35 = vmul.f32 %v8726_v16, %v8726_v16  ;;  %v6018_v0 = vld [vmem:[%s7190_s3 + $0x20] sm:$0xff]  }
 0xc83   : > { %v8736_v39 = vsub.f32 %v8642_v23, %v3631_v24  ;;  %3686 = vadd.xlane.f32.xlu1 %v3661_v35  ;;  %v3662_v55 = vmul.f32 %v8731_v42, %v8731_v42 }
 0xc85   : > { %3688 = vadd.xlane.f32.xlu0 %v3662_v55  ;;  %v3663_v22 = vmul.f32 %v8736_v39, %v8736_v39 }
 0xc86   : > { %v3612_v37 = vpop.xlane.xlu0 %3611 }
 0xc87   : > { %v3632_v59 = vmul.f32 0.0078125, %v3612_v37  ;;  %3690 = vadd.xlane.f32.xlu1 %v3663_v22 }
 0xc88   : > { %v3614_v13 = vpop.xlane.xlu1 %3613 }
 0xc89   : > { %v8743_v41 = vsub.f32 %v8649_v46, %v3632_v59  ;;  %v3633_v20 = vmul.f32 0.0078125, %v3614_v13  ;;  %v9737_v13 = vmov 0  }
 0xc8a   : > { %v3616_v19 = vpop.xlane.xlu0 %3615 }
 0xc8b   : > { %v8746_v23 = vsub.f32 %v8654_v62, %v3633_v20  ;;  %v3634_v43 = vmul.f32 0.0078125, %v3616_v19  ;;  %v3664_v57 = vmul.f32 %v8743_v41, %v8743_v41 }
 0xc8c   : > { %v3618_v21 = vpop.xlane.xlu1 %3617 }
 0xc8d   : > { %v8751_v6 = vsub.f32 %v8658_v63, %v3634_v43  ;;  %v3635_v3 = vmul.f32 0.0078125, %v3618_v21  ;;  %3692 = vadd.xlane.f32.xlu0 %v3664_v57  ;;  %v3665_v46 = vmul.f32 %v8746_v23, %v8746_v23 }
 0xc8f   : > { %v8756_v12 = vsub.f32 %v8662_v33, %v3635_v3  ;;  %3694 = vadd.xlane.f32.xlu1 %v3665_v46  ;;  %v3666_v62 = vmul.f32 %v8751_v6, %v8751_v6  ;;  %v6010_v33 = vld [vmem:[%s7190_s3] sm:$0xff]  }
 0xc90   : > { %5376 = vmatpush3.bf16.msra.mxu0 %v6010_v33 }
 0xc91   : > { %3696 = vadd.xlane.f32.xlu0 %v3666_v62  ;;  %v3667_v63 = vmul.f32 %v8756_v12, %v8756_v12  ;;  %5377 = vmatprep.subr.bf16.mxu0 %v6011_v11 }
 0xc93   : > { %3698 = vadd.xlane.f32.xlu1 %v3667_v63 }
 0xc94   : > { %5378 = vmatpush3.bf16.msra.mxu0 %v6012_v15 }
 0xc95   : > { %5379 = vmatprep.subr.bf16.mxu0 %v6013_v5 }
 0xc98   : > { %5380 = vmatpush3.bf16.msra.mxu0 %v6014_v7 }
 0xc99   : > { %5381 = vmatprep.subr.bf16.mxu0 %v6015_v25 }
 0xc9c   : > { %5382 = vmatpush3.bf16.msra.mxu0 %v6016_v26 }
 0xc9d   : > { %5383 = vmatprep.subr.bf16.mxu0 %v6017_v8 }
 0xca0   : > { %5384 = vmatpush3.bf16.msra.mxu0 %v6018_v0 }
 0xcc0   : > { %v3669_v58 = vpop.xlane.xlu0 %3668 }
 0xcc1   : > { %v3700_v27 = vmul.f32 0.0078125, %v3669_v58 }
 0xcc2   : > { %v3671_v18 = vpop.xlane.xlu1 %3670 }
 0xcc3   : > { %v3716_v4 = vadd.f32 1e-05, %v3700_v27  ;;  %v3701_v38 = vmul.f32 0.0078125, %v3671_v18 }
 0xcc4   : > { %v3673_v49 = vpop.xlane.xlu0 %3672 }
 0xcc5   : > { %6281 = vrsqrt.f32 %v3716_v4  ;;  %v3717_v40 = vadd.f32 1e-05, %v3701_v38  ;;  %v3702_v9 = vmul.f32 0.0078125, %v3673_v49 }
 0xcc7   : > { %6283 = vrsqrt.f32 %v3717_v40  ;;  %v3718_v47 = vadd.f32 1e-05, %v3702_v9 }
 0xcc8   : > { %v3675_v29 = vpop.xlane.xlu1 %3674 }
 0xcc9   : > { %6285 = vrsqrt.f32 %v3718_v47  ;;  %v3703_v54 = vmul.f32 0.0078125, %v3675_v29 }
 0xccb   : > { %v3719_v31 = vadd.f32 1e-05, %v3703_v54 }
 0xccd   : > { %6287 = vrsqrt.f32 %v3719_v31 }
 0xccf   : > { %v6282_v36 = vpop.eup %6281 }
 0xcd0   : > { %v3748_v52 = vmul.f32 %v6282_v36, %v8671_v60  ;;  %v6019_v60 = vld [vmem:[%s7190_s3 + $0x68] sm:$0xff]  }
 0xcd1   : > { %v6284_v61 = vpop.eup %6283  ;;  %5385 = vmatprep.subr.bf16.mxu0 %v6019_v60 }
 0xcd2   : > { %v3770_v45 = vmul.f32 %v8774_v34, %v3748_v52  ;;  %v3749_v10 = vmul.f32 %v6284_v61, %v8674_v2 }
 0xcd3   : > { %v6286_v56 = vpop.eup %6285 }
 0xcd4   : > { %v3771_v17 = vmul.f32 %v8774_v34, %v3749_v10  ;;  %v8792_v48 = vadd.f32 %v8786_v1, %v3770_v45  ;;  %v3750_v2 = vmul.f32 %v6286_v56, %v8679_v28 }
 0xcd6   : > { %v8795_v24 = vadd.f32 %v8786_v1, %v3771_v17  ;;  %v3772_v37 = vmul.f32 %v8774_v34, %v3750_v2 }
 0xcd7   : > { %v6288_v35 = vpop.eup %6287 }
 0xcd8   : > { %v3808_v55 = vpack.c.bf16 %v8795_v24, %v8792_v48  ;;  %v3751_v22 = vmul.f32 %v6288_v35, %v8686_v44  ;;  %v8808_v28 = vadd.f32 %v8786_v1, %v3772_v37 }
 0xcda   : > { %3957 = vmatmul.mubr.bf16.vlgmr.msra.gmra.mrb[80].mxu1 %v3808_v55  ;;  %v3773_v59 = vmul.f32 %v8774_v34, %v3751_v22 }
 0xcdb   : > { %3966 = vmatprep.mubr.bf16.mxu1 %v9737_v13  ;;  %5767 = vmatpush3.bf16.msra.mxu1 %v6010_v33 }
 0xcdc   : > { %v8805_v20 = vadd.f32 %v8786_v1, %v3773_v59  ;;  %5760 = vmatprep.subr.bf16.mxu1 %v6011_v11 }
 0xcde   : > { %v3809_v44 = vpack.c.bf16 %v8805_v20, %v8808_v28 }
 0xcdf   : > { %5768 = vmatpush3.bf16.msra.mxu1 %v6012_v15 }
 0xce0   : > { %5761 = vmatprep.subr.bf16.mxu1 %v6013_v5 }
 0xce2   : > { %3967 = vmatmul.mubr.bf16.gmra.mrb[84].mxu1 %v3809_v44 }
 0xce3   : > { %3976 = vmatprep.mubr.bf16.mxu1 %v9737_v13  ;;  %5769 = vmatpush3.bf16.msra.mxu1 %v6014_v7 }
 0xce4   : > { %5762 = vmatprep.subr.bf16.mxu1 %v6015_v25 }
 0xce7   : > { %5770 = vmatpush3.bf16.msra.mxu1 %v6016_v26 }
 0xce8   : > { %5763 = vmatprep.subr.bf16.mxu1 %v6017_v8 }
 0xceb   : > { %5771 = vmatpush3.bf16.msra.mxu1 %v6018_v0 }
 0xcec   : > { %5764 = vmatprep.subr.bf16.mxu1 %v6019_v60 }
 0xd02   : > { %v3677_v19 = vpop.xlane.xlu0 %3676 }
 0xd03   : > { %v3704_v43 = vmul.f32 0.0078125, %v3677_v19 }
 0xd04   : > { %v3679_v57 = vpop.xlane.xlu1 %3678 }
 0xd05   : > { %v3720_v21 = vadd.f32 1e-05, %v3704_v43  ;;  %v3705_v3 = vmul.f32 0.0078125, %v3679_v57 }
 0xd06   : > { %v3681_v46 = vpop.xlane.xlu0 %3680 }
 0xd07   : > { %6289 = vrsqrt.f32 %v3720_v21  ;;  %v3721_v62 = vadd.f32 1e-05, %v3705_v3  ;;  %v3706_v63 = vmul.f32 0.0078125, %v3681_v46 }
 0xd08   : > { %v3683_v58 = vpop.xlane.xlu1 %3682 }
 0xd09   : > { %6291 = vrsqrt.f32 %v3721_v62  ;;  %v3722_v27 = vadd.f32 1e-05, %v3706_v63  ;;  %v3707_v18 = vmul.f32 0.0078125, %v3683_v58 }
 0xd0b   : > { %6293 = vrsqrt.f32 %v3722_v27  ;;  %v3723_v4 = vadd.f32 1e-05, %v3707_v18 }
 0xd0d   : > { %6295 = vrsqrt.f32 %v3723_v4 }
 0xd0e   : > { %v3685_v38 = vpop.xlane.xlu0 %3684 }
 0xd0f   : > { %v3708_v49 = vmul.f32 0.0078125, %v3685_v38 }
 0xd10   : > { %v3687_v14 = vpop.xlane.xlu1 %3686 }
 0xd11   : > { %v6290_v33 = vpop.eup %6289  ;;  %v3724_v11 = vadd.f32 1e-05, %v3708_v49  ;;  %v3709_v40 = vmul.f32 0.0078125, %v3687_v14 }
 0xd12   : > { %v3689_v9 = vpop.xlane.xlu0 %3688  ;;  %v3752_v47 = vmul.f32 %v6290_v33, %v8703_v51 }
 0xd13   : > { %v6292_v15 = vpop.eup %6291  ;;  %6297 = vrsqrt.f32 %v3724_v11  ;;  %v3725_v29 = vadd.f32 1e-05, %v3709_v40  ;;  %v3710_v5 = vmul.f32 0.0078125, %v3689_v9 }
 0xd14   : > { %v3691_v54 = vpop.xlane.xlu1 %3690  ;;  %v3753_v31 = vmul.f32 %v6292_v15, %v8706_v50  ;;  %v3774_v7 = vmul.f32 %v8774_v34, %v3752_v47  ;;  %v6020_v47 = vld [vmem:[%s7190_s3 + $0x28] sm:$0xff]  }
 0xd15   : > { %v6294_v25 = vpop.eup %6293  ;;  %6299 = vrsqrt.f32 %v3725_v29  ;;  %v3711_v36 = vmul.f32 0.0078125, %v3691_v54  ;;  %v3726_v8 = vadd.f32 1e-05, %v3710_v5  ;;  %5386 = vmatpush3.bf16.msra.mxu0 %v6020_v47  ;;  %5772 = vmatpush3.bf16.msra.mxu1 %v6020_v47  ;;  %v6021_v54 = vld [vmem:[%s7190_s3 + $0x70] sm:$0xff]  }
 0xd16   : > { %v3775_v26 = vmul.f32 %v8774_v34, %v3753_v31  ;;  %v8818_v45 = vadd.f32 %v8786_v1, %v3774_v7  ;;  %v3754_v10 = vmul.f32 %v6294_v25, %v8711_v30  ;;  %v6022_v31 = vld [vmem:[%s7190_s3 + $0x30] sm:$0xff]   ;;  %5387 = vmatprep.subr.bf16.mxu0 %v6021_v54  ;;  %5765 = vmatprep.subr.bf16.mxu1 %v6021_v54 }
 0xd17   : > { %v6296_v52 = vpop.eup %6295  ;;  %v3727_v61 = vadd.f32 1e-05, %v3711_v36 }
 0xd18   : > { %v8821_v51 = vadd.f32 %v8786_v1, %v3775_v26  ;;  %v3755_v50 = vmul.f32 %v6296_v52, %v8716_v53  ;;  %v3776_v35 = vmul.f32 %v8774_v34, %v3754_v10  ;;  %v6023_v26 = vld [vmem:[%s7190_s3 + $0x78] sm:$0xff]  }
 0xd19   : > { %6301 = vrsqrt.f32 %v3727_v61  ;;  %5388 = vmatpush3.bf16.msra.mxu0 %v6022_v31  ;;  %5773 = vmatpush3.bf16.msra.mxu1 %v6022_v31 }
 0xd1a   : > { %v3693_v56 = vpop.xlane.xlu0 %3692  ;;  %v3810_v0 = vpack.c.bf16 %v8821_v51, %v8818_v45  ;;  %v3777_v17 = vmul.f32 %v8774_v34, %v3755_v50  ;;  %6303 = vrsqrt.f32 %v3726_v8  ;;  %v8834_v43 = vadd.f32 %v8786_v1, %v3776_v35  ;;  %5389 = vmatprep.subr.bf16.mxu0 %v6023_v26  ;;  %5766 = vmatprep.subr.bf16.mxu1 %v6023_v26  ;;  %v9738_v35 = vld [vmem:[#allocation34_spill] sm:$0xff] }
 0xd1b   : > { %v3712_v60 = vmul.f32 0.0078125, %v3693_v56 }
 0xd1c   : > { %3977 = vmatmul.mubr.bf16.gmra.mrb[88].mxu1 %v3810_v0  ;;  %v3695_v2 = vpop.xlane.xlu1 %3694  ;;  %v8831_v30 = vadd.f32 %v8786_v1, %v3777_v17 }
 0xd1d   : > { %v6298_v55 = vpop.eup %6297  ;;  %v3713_v22 = vmul.f32 0.0078125, %v3695_v2  ;;  %3986 = vmatprep.mubr.bf16.mxu1 %v9737_v13  ;;  %v3728_v37 = vadd.f32 1e-05, %v3712_v60 }
 0xd1e   : > { %v3697_v44 = vpop.xlane.xlu0 %3696  ;;  %v3756_v57 = vmul.f32 %v6298_v55, %v8723_v32  ;;  %v3811_v46 = vpack.c.bf16 %v8831_v30, %v8834_v43  ;;  %v9739_v55 = vsub.s32 0, %v9738_v35 }
 0xd1f   : > { %v6300_v53 = vpop.eup %6299  ;;  %v3729_v59 = vadd.f32 1e-05, %v3713_v22  ;;  %v3714_v58 = vmul.f32 0.0078125, %v3697_v44 }
 0xd20   : > { %v3699_v19 = vpop.xlane.xlu1 %3698  ;;  %v3757_v21 = vmul.f32 %v6300_v53, %v8726_v16  ;;  %v3778_v27 = vmul.f32 %v8774_v34, %v3756_v57  ;;  %v9740_v53 = vsub.s32 1, %v9738_v35 }
 0xd21   : > { %6305 = vrsqrt.f32 %v3729_v59  ;;  %v3715_v3 = vmul.f32 0.0078125, %v3699_v19  ;;  %v3730_v38 = vadd.f32 1e-05, %v3714_v58 }
 0xd22   : > { %v3779_v62 = vmul.f32 %v8774_v34, %v3757_v21  ;;  %6307 = vrsqrt.f32 %v3728_v37  ;;  %v8848_v49 = vadd.f32 %v8786_v1, %v3778_v27 }
 0xd23   : > { %v6302_v63 = vpop.eup %6301  ;;  %v3731_v4 = vadd.f32 1e-05, %v3715_v3 }
 0xd24   : > { %3987 = vmatmul.mubr.bf16.gmra.mrb[92].mxu1 %v3811_v46  ;;  %v6304_v18 = vpop.eup %6303  ;;  %v8844_v32 = vadd.f32 %v8786_v1, %v3779_v62  ;;  %v3759_v16 = vmul.f32 %v6302_v63, %v8736_v39 }
 0xd25   : > { %3996 = vmatprep.mubr.bf16.mxu1 %v9737_v13  ;;  %v3758_v14 = vmul.f32 %v6304_v18, %v8731_v42  ;;  %6309 = vrsqrt.f32 %v3731_v4 }
 0xd26   : > { %v3812_v33 = vpack.c.bf16 %v8844_v32, %v8848_v49  ;;  %v3781_v11 = vmul.f32 %v8774_v34, %v3759_v16  ;;  %6311 = vrsqrt.f32 %v3730_v38 }
 0xd27   : > { %v3780_v9 = vmul.f32 %v8774_v34, %v3758_v14 }
 0xd28   : > { %v8858_v15 = vadd.f32 %v8786_v1, %v3781_v11 }
 0xd29   : > { %v8862_v29 = vadd.f32 %v8786_v1, %v3780_v9 }
 0xd2b   : > { %v6306_v40 = vpop.eup %6305  ;;  %v3813_v7 = vpack.c.bf16 %v8858_v15, %v8862_v29 }
 0xd2c   : > { %3997 = vmatmul.mubr.bf16.gmra.mrb[96].mxu1 %v3812_v33  ;;  %v6308_v39 = vpop.eup %6307  ;;  %v3761_v42 = vmul.f32 %v6306_v40, %v8746_v23 }
 0xd2d   : > { %4006 = vmatprep.mubr.bf16.mxu1 %v9737_v13  ;;  %v3760_v5 = vmul.f32 %v6308_v39, %v8743_v41  ;;  %v6024_v41 = vld [vmem:[%s7190_s3 + $0x38] sm:$0xff]   ;;  %s9745_s3 = sld [smem:[#allocation99_spill]] (!%p5202_p10) }
 0xd2e   : > { %v3783_v25 = vmul.f32 %v8774_v34, %v3761_v42  ;;  %5390 = vmatpush3.bf16.msra.mxu0 %v6024_v41  ;;  %5774 = vmatpush3.bf16.msra.mxu1 %v6024_v41 }
 0xd2f   : > { %v6310_v36 = vpop.eup %6309  ;;  %v3782_v23 = vmul.f32 %v8774_v34, %v3760_v5 }
 0xd30   : > { %v6312_v52 = vpop.eup %6311  ;;  %v8875_v8 = vadd.f32 %v8786_v1, %v3783_v25  ;;  %v3763_v61 = vmul.f32 %v6310_v36, %v8756_v12 }
 0xd31   : > { %v8879_v10 = vadd.f32 %v8786_v1, %v3782_v23  ;;  %v3762_v50 = vmul.f32 %v6312_v52, %v8751_v6  ;;  %v3832_v6 = vld [vmem:[%s7176_s28] sm:$0x3] }
 0xd32   : > { %v3785_v0 = vmul.f32 %v8774_v34, %v3763_v61  ;;  %v8898_v22 = vrot.slane %v3832_v6, %v9739_v55 }
 0xd33   : > { %v3814_v56 = vpack.c.bf16 %v8875_v8, %v8879_v10  ;;  %v3784_v17 = vmul.f32 %v8774_v34, %v3762_v50  ;;  %v8902_v34 = vrot.slane %v3832_v6, %v9740_v53 }
 0xd34   : > { %4007 = vmatmul.mubr.bf16.gmra.mrb[100].mxu1 %v3813_v7  ;;  %v8888_v12 = vadd.f32 %v8786_v1, %v3785_v0 }
 0xd35   : > { %4016 = vmatprep.mubr.bf16.mxu1 %v9737_v13  ;;  %v8891_v60 = vadd.f32 %v8786_v1, %v3784_v17 }
 0xd37   : > { %v3815_v2 = vpack.c.bf16 %v8888_v12, %v8891_v60 }
 0xd3c   : > { %4017 = vmatmul.mubr.bf16.gmra.mrb[104].mxu1 %v3814_v56 }
 0xd3d   : > { %4026 = vmatprep.mubr.bf16.mxu1 %v9737_v13 }
 0xd44   : > { %4027 = vmatmul.mubr.bf16.gmra.mrb[108].mxu1 %v3815_v2 }
 0xdad   : > { %v3958_v13 = vpop.f32.mrb[80].mxu1 }
 0xdae   : > { %v3959_v37 = vadd.f32 %v3958_v13, %v8898_v22  ;;  %v3960_v59 = vpop.f32.mrb[81].mxu1 }
 0xdaf   : > { %v3961_v1 = vadd.f32 %v3960_v59, %v8902_v34  ;;  %v3962_v44 = vpop.f32.mrb[82].mxu1 }
 0xdb0   : > { %v3963_v19 = vadd.f32 %v3962_v44, %v8898_v22  ;;  %v3964_v57 = vpop.f32.mrb[83].mxu1  ;;  %v4037_v3 = vmax.f32 %v3959_v37, 0.0 }
 0xdb1   : > { %v3965_v21 = vadd.f32 %v3964_v57, %v8902_v34  ;;  %v4038_v62 = vmax.f32 %v3961_v1, 0.0 }
 0xdb2   : > { %v4039_v46 = vmax.f32 %v3963_v19, 0.0 }
 0xdb3   : > { %v4040_v63 = vmax.f32 %v3965_v21, 0.0 }
 0xdb4   : > { %v4069_v58 = vpack.c.bf16 %v4039_v46, %v4037_v3 }
 0xdb5   : > { %v4070_v27 = vpack.c.bf16 %v4040_v63, %v4038_v62  ;;  %v3968_v18 = vpop.f32.mrb[84].mxu1 }
 0xdb6   : > { %v3969_v4 = vadd.f32 %v3968_v18, %v8898_v22  ;;  %v3970_v16 = vpop.f32.mrb[85].mxu1 }
 0xdb7   : > { %v3971_v38 = vadd.f32 %v3970_v16, %v8902_v34  ;;  %v3972_v14 = vpop.f32.mrb[86].mxu1  ;;  %4252 = vmatprep.mubr.bf16.mxu0 %v4070_v27 }
 0xdb8   : > { %v3973_v33 = vadd.f32 %v3972_v14, %v8898_v22  ;;  %v3974_v11 = vpop.f32.mrb[87].mxu1  ;;  %4253 = vmatmul.mubr.bf16.vlgmr.msra.gmra.mrb[112].mxu0 %v4069_v58  ;;  %v4041_v9 = vmax.f32 %v3969_v4, 0.0 }
 0xdb9   : > { %v3975_v40 = vadd.f32 %v3974_v11, %v8902_v34  ;;  %v4042_v47 = vmax.f32 %v3971_v38, 0.0 }
 0xdba   : > { %v4043_v39 = vmax.f32 %v3973_v33, 0.0 }
 0xdbb   : > { %v4044_v42 = vmax.f32 %v3975_v40, 0.0 }
 0xdbc   : > { %v4071_v5 = vpack.c.bf16 %v4043_v39, %v4041_v9 }
 0xdbd   : > { %v4072_v54 = vpack.c.bf16 %v4044_v42, %v4042_v47 }
 0xdbf   : > { %4260 = vmatprep.mubr.bf16.mxu0 %v4072_v54 }
 0xdc0   : > { %4261 = vmatmul.mubr.bf16.gmra.mrb[116].mxu0 %v4071_v5 }
 0xdef   : > { %v3978_v31 = vpop.f32.mrb[88].mxu1 }
 0xdf0   : > { %v3979_v7 = vadd.f32 %v3978_v31, %v8898_v22  ;;  %v3980_v25 = vpop.f32.mrb[89].mxu1 }
 0xdf1   : > { %v3981_v36 = vadd.f32 %v3980_v25, %v8902_v34  ;;  %v3982_v23 = vpop.f32.mrb[90].mxu1 }
 0xdf2   : > { %v3983_v26 = vadd.f32 %v3982_v23, %v8898_v22  ;;  %v3984_v52 = vpop.f32.mrb[91].mxu1  ;;  %v4045_v61 = vmax.f32 %v3979_v7, 0.0 }
 0xdf3   : > { %v3985_v41 = vadd.f32 %v3984_v52, %v8902_v34  ;;  %v4046_v56 = vmax.f32 %v3981_v36, 0.0 }
 0xdf4   : > { %v4047_v50 = vmax.f32 %v3983_v26, 0.0 }
 0xdf5   : > { %v4048_v0 = vmax.f32 %v3985_v41, 0.0 }
 0xdf6   : > { %v4073_v17 = vpack.c.bf16 %v4047_v50, %v4045_v61 }
 0xdf7   : > { %v4074_v2 = vpack.c.bf16 %v4048_v0, %v4046_v56  ;;  %v3988_v6 = vpop.f32.mrb[92].mxu1 }
 0xdf8   : > { %v3989_v35 = vadd.f32 %v3988_v6, %v8898_v22  ;;  %v3990_v55 = vpop.f32.mrb[93].mxu1 }
 0xdf9   : > { %v3991_v53 = vadd.f32 %v3990_v55, %v8902_v34  ;;  %v3992_v13 = vpop.f32.mrb[94].mxu1  ;;  %4268 = vmatprep.mubr.bf16.mxu0 %v4074_v2 }
 0xdfa   : > { %v3993_v37 = vadd.f32 %v3992_v13, %v8898_v22  ;;  %v3994_v59 = vpop.f32.mrb[95].mxu1  ;;  %4269 = vmatmul.mubr.bf16.gmra.mrb[120].mxu0 %v4073_v17  ;;  %v4049_v44 = vmax.f32 %v3989_v35, 0.0 }
 0xdfb   : > { %v3995_v1 = vadd.f32 %v3994_v59, %v8902_v34  ;;  %v4050_v57 = vmax.f32 %v3991_v53, 0.0 }
 0xdfc   : > { %v4051_v19 = vmax.f32 %v3993_v37, 0.0 }
 0xdfd   : > { %v4052_v21 = vmax.f32 %v3995_v1, 0.0 }
 0xdfe   : > { %v4075_v3 = vpack.c.bf16 %v4051_v19, %v4049_v44 }
 0xdff   : > { %v4076_v46 = vpack.c.bf16 %v4052_v21, %v4050_v57  ;;  %v3998_v62 = vpop.f32.mrb[96].mxu1 }
 0xe00   : > { %v3999_v63 = vadd.f32 %v3998_v62, %v8898_v22  ;;  %v4000_v58 = vpop.f32.mrb[97].mxu1 }
 0xe01   : > { %v4001_v27 = vadd.f32 %v4000_v58, %v8902_v34  ;;  %v4002_v18 = vpop.f32.mrb[98].mxu1  ;;  %4276 = vmatprep.mubr.bf16.mxu0 %v4076_v46 }
 0xe02   : > { %v4003_v4 = vadd.f32 %v4002_v18, %v8898_v22  ;;  %v4004_v16 = vpop.f32.mrb[99].mxu1  ;;  %4277 = vmatmul.mubr.bf16.gmra.mrb[124].mxu0 %v4075_v3  ;;  %v4053_v14 = vmax.f32 %v3999_v63, 0.0 }
 0xe03   : > { %v4005_v38 = vadd.f32 %v4004_v16, %v8902_v34  ;;  %v4054_v11 = vmax.f32 %v4001_v27, 0.0 }
 0xe04   : > { %v4055_v33 = vmax.f32 %v4003_v4, 0.0 }
 0xe05   : > { %v4056_v40 = vmax.f32 %v4005_v38, 0.0 }
 0xe06   : > { %v4077_v9 = vpack.c.bf16 %v4055_v33, %v4053_v14 }
 0xe07   : > { %v4078_v39 = vpack.c.bf16 %v4056_v40, %v4054_v11  ;;  %v4008_v47 = vpop.f32.mrb[100].mxu1  ;;  %v8941_v40 = vld [vmem:[%s790_s4] ss:$0 sm:$0xff] }
 0xe08   : > { %v4009_v42 = vadd.f32 %v4008_v47, %v8898_v22  ;;  %v4010_v5 = vpop.f32.mrb[101].mxu1 }
 0xe09   : > { %v4011_v54 = vadd.f32 %v4010_v5, %v8902_v34  ;;  %v4012_v31 = vpop.f32.mrb[102].mxu1  ;;  %4284 = vmatprep.mubr.bf16.mxu0 %v4078_v39 }
 0xe0a   : > { %v4013_v7 = vadd.f32 %v4012_v31, %v8898_v22  ;;  %v4014_v25 = vpop.f32.mrb[103].mxu1  ;;  %4285 = vmatmul.mubr.bf16.gmra.mrb[128].mxu0 %v4077_v9  ;;  %v4057_v23 = vmax.f32 %v4009_v42, 0.0 }
 0xe0b   : > { %v4015_v36 = vadd.f32 %v4014_v25, %v8902_v34  ;;  %v4058_v52 = vmax.f32 %v4011_v54, 0.0 }
 0xe0c   : > { %v4059_v26 = vmax.f32 %v4013_v7, 0.0 }
 0xe0d   : > { %v4060_v41 = vmax.f32 %v4015_v36, 0.0 }
 0xe0e   : > { %v4079_v61 = vpack.c.bf16 %v4059_v26, %v4057_v23 }
 0xe0f   : > { %v4080_v50 = vpack.c.bf16 %v4060_v41, %v4058_v52  ;;  %v4018_v56 = vpop.f32.mrb[104].mxu1 }
 0xe10   : > { %v4019_v0 = vadd.f32 %v4018_v56, %v8898_v22  ;;  %v4020_v17 = vpop.f32.mrb[105].mxu1 }
 0xe11   : > { %v4021_v2 = vadd.f32 %v4020_v17, %v8902_v34  ;;  %v4022_v6 = vpop.f32.mrb[106].mxu1  ;;  %4292 = vmatprep.mubr.bf16.mxu0 %v4080_v50 }
 0xe12   : > { %v4023_v35 = vadd.f32 %v4022_v6, %v8898_v22  ;;  %v4024_v55 = vpop.f32.mrb[107].mxu1  ;;  %4293 = vmatmul.mubr.bf16.gmra.mrb[132].mxu0 %v4079_v61  ;;  %v4061_v13 = vmax.f32 %v4019_v0, 0.0 }
 0xe13   : > { %v4025_v53 = vadd.f32 %v4024_v55, %v8902_v34  ;;  %v4062_v59 = vmax.f32 %v4021_v2, 0.0 }
 0xe14   : > { %v4063_v37 = vmax.f32 %v4023_v35, 0.0 }
 0xe15   : > { %v4064_v1 = vmax.f32 %v4025_v53, 0.0 }
 0xe16   : > { %v4081_v44 = vpack.c.bf16 %v4063_v37, %v4061_v13 }
 0xe17   : > { %v4082_v19 = vpack.c.bf16 %v4064_v1, %v4062_v59  ;;  %v4028_v57 = vpop.f32.mrb[108].mxu1 }
 0xe18   : > { %v4029_v21 = vadd.f32 %v4028_v57, %v8898_v22  ;;  %v4030_v3 = vpop.f32.mrb[109].mxu1 }
 0xe19   : > { %v4031_v46 = vadd.f32 %v4030_v3, %v8902_v34  ;;  %v4032_v62 = vpop.f32.mrb[110].mxu1  ;;  %4300 = vmatprep.mubr.bf16.mxu1 %v4082_v19 }
 0xe1a   : > { %v4033_v63 = vadd.f32 %v4032_v62, %v8898_v22  ;;  %v4034_v58 = vpop.f32.mrb[111].mxu1  ;;  %4301 = vmatmul.mubr.bf16.vlgmr.msra.gmra.mrb[112].mxu1 %v4081_v44  ;;  %v4065_v18 = vmax.f32 %v4029_v21, 0.0 }
 0xe1b   : > { %v4035_v27 = vadd.f32 %v4034_v58, %v8902_v34  ;;  %v4066_v16 = vmax.f32 %v4031_v46, 0.0 }
 0xe1c   : > { %v4067_v4 = vmax.f32 %v4033_v63, 0.0 }
 0xe1d   : > { %v4068_v38 = vmax.f32 %v4035_v27, 0.0 }
 0xe1e   : > { %v4083_v14 = vpack.c.bf16 %v4067_v4, %v4065_v18 }
 0xe1f   : > { %v4084_v33 = vpack.c.bf16 %v4068_v38, %v4066_v16 }
 0xe21   : > { %4308 = vmatprep.mubr.bf16.mxu1 %v4084_v33 }
 0xe22   : > { %4309 = vmatmul.mubr.bf16.gmra.mrb[116].mxu1 %v4083_v14 }
 0xe8b   : > { %v5391_v11 = vpop.f32.mrb[112].mxu0 }
 0xe8c   : > { %v5392_v22 = vpop.f32.mrb[113].mxu0 }
 0xe8d   : > { %v5393_v9 = vadd.f32 %v5392_v22, %v5391_v11  ;;  %v5394_v39 = vpop.f32.mrb[114].mxu0 }
 0xe8e   : > { %v5395_v47 = vpop.f32.mrb[115].mxu0 }
 0xe8f   : > { %v4255_v34 = vadd.f32 %v5393_v9, %v8941_v40  ;;  %v5396_v42 = vadd.f32 %v5395_v47, %v5394_v39 }
 0xe91   : > { %v4258_v5 = vadd.f32 %v5396_v42, %v8941_v40  ;;  %v8946_v54 = vadd.f32 %v4255_v34, %v8792_v48 }
 0xe93   : > { %4335 = vadd.xlane.f32.xlu0 %v8946_v54  ;;  %v5397_v31 = vpop.f32.mrb[116].mxu0  ;;  %v8950_v7 = vadd.f32 %v4258_v5, %v8795_v24 }
 0xe94   : > { %v5398_v25 = vpop.f32.mrb[117].mxu0 }
 0xe95   : > { %v5399_v36 = vadd.f32 %v5398_v25, %v5397_v31  ;;  %4337 = vadd.xlane.f32.xlu1 %v8950_v7  ;;  %v5400_v23 = vpop.f32.mrb[118].mxu0 }
 0xe96   : > { %v5401_v26 = vpop.f32.mrb[119].mxu0 }
 0xe97   : > { %v4263_v52 = vadd.f32 %v5399_v36, %v8941_v40  ;;  %v5402_v41 = vadd.f32 %v5401_v26, %v5400_v23 }
 0xe99   : > { %v4266_v61 = vadd.f32 %v5402_v41, %v8941_v40  ;;  %v8956_v48 = vadd.f32 %v4263_v52, %v8808_v28 }
 0xe9b   : > { %4339 = vadd.xlane.f32.xlu0 %v8956_v48  ;;  %v8960_v50 = vadd.f32 %v4266_v61, %v8805_v20 }
 0xe9d   : > { %4341 = vadd.xlane.f32.xlu1 %v8960_v50 }
 0xecd   : > { %v5403_v24 = vpop.f32.mrb[120].mxu0 }
 0xece   : > { %v5404_v56 = vpop.f32.mrb[121].mxu0 }
 0xecf   : > { %v5405_v0 = vadd.f32 %v5404_v56, %v5403_v24  ;;  %v5406_v17 = vpop.f32.mrb[122].mxu0 }
 0xed0   : > { %v5407_v2 = vpop.f32.mrb[123].mxu0 }
 0xed1   : > { %v4271_v6 = vadd.f32 %v5405_v0, %v8941_v40  ;;  %v5408_v35 = vadd.f32 %v5407_v2, %v5406_v17 }
 0xed3   : > { %v4274_v55 = vadd.f32 %v5408_v35, %v8941_v40  ;;  %v8966_v28 = vadd.f32 %v4271_v6, %v8818_v45 }
 0xed5   : > { %4343 = vadd.xlane.f32.xlu0 %v8966_v28  ;;  %v5409_v53 = vpop.f32.mrb[124].mxu0  ;;  %v8970_v20 = vadd.f32 %v4274_v55, %v8821_v51 }
 0xed6   : > { %v5410_v13 = vpop.f32.mrb[125].mxu0 }
 0xed7   : > { %v5411_v37 = vadd.f32 %v5410_v13, %v5409_v53  ;;  %4345 = vadd.xlane.f32.xlu1 %v8970_v20  ;;  %v5412_v59 = vpop.f32.mrb[126].mxu0 }
 0xed8   : > { %v5413_v1 = vpop.f32.mrb[127].mxu0 }
 0xed9   : > { %v4279_v44 = vadd.f32 %v5411_v37, %v8941_v40  ;;  %v5414_v19 = vadd.f32 %v5413_v1, %v5412_v59 }
 0xedb   : > { %v4282_v57 = vadd.f32 %v5414_v19, %v8941_v40  ;;  %v8976_v45 = vadd.f32 %v4279_v44, %v8834_v43 }
 0xedd   : > { %4347 = vadd.xlane.f32.xlu0 %v8976_v45  ;;  %v5415_v21 = vpop.f32.mrb[128].mxu0  ;;  %v8980_v51 = vadd.f32 %v4282_v57, %v8831_v30 }
 0xede   : > { %v5416_v3 = vpop.f32.mrb[129].mxu0 }
 0xedf   : > { %v5417_v46 = vadd.f32 %v5416_v3, %v5415_v21  ;;  %4349 = vadd.xlane.f32.xlu1 %v8980_v51  ;;  %v5418_v62 = vpop.f32.mrb[130].mxu0 }
 0xee0   : > { %v5419_v63 = vpop.f32.mrb[131].mxu0 }
 0xee1   : > { %v4287_v58 = vadd.f32 %v5417_v46, %v8941_v40  ;;  %v5420_v27 = vadd.f32 %v5419_v63, %v5418_v62 }
 0xee3   : > { %v4290_v18 = vadd.f32 %v5420_v27, %v8941_v40  ;;  %v8986_v43 = vadd.f32 %v4287_v58, %v8848_v49 }
 0xee5   : > { %4351 = vadd.xlane.f32.xlu0 %v8986_v43  ;;  %v5421_v4 = vpop.f32.mrb[132].mxu0  ;;  %v8990_v30 = vadd.f32 %v4290_v18, %v8844_v32 }
 0xee6   : > { %v5422_v16 = vpop.f32.mrb[133].mxu0 }
 0xee7   : > { %v5423_v38 = vadd.f32 %v5422_v16, %v5421_v4  ;;  %4353 = vadd.xlane.f32.xlu1 %v8990_v30  ;;  %v5424_v14 = vpop.f32.mrb[134].mxu0 }
 0xee8   : > { %v5425_v33 = vpop.f32.mrb[135].mxu0 }
 0xee9   : > { %v4295_v11 = vadd.f32 %v5423_v38, %v8941_v40  ;;  %v5426_v22 = vadd.f32 %v5425_v33, %v5424_v14 }
 0xeeb   : > { %v4298_v9 = vadd.f32 %v5426_v22, %v8941_v40  ;;  %v8996_v49 = vadd.f32 %v4295_v11, %v8862_v29 }
 0xeed   : > { %4355 = vadd.xlane.f32.xlu0 %v8996_v49  ;;  %v5427_v39 = vpop.f32.mrb[112].mxu1  ;;  %v9000_v32 = vadd.f32 %v4298_v9, %v8858_v15 }
 0xeee   : > { %v5428_v47 = vpop.f32.mrb[113].mxu1 }
 0xeef   : > { %v5429_v34 = vadd.f32 %v5428_v47, %v5427_v39  ;;  %4357 = vadd.xlane.f32.xlu1 %v9000_v32  ;;  %v5430_v42 = vpop.f32.mrb[114].mxu1 }
 0xef0   : > { %v5431_v5 = vpop.f32.mrb[115].mxu1 }
 0xef1   : > { %v4303_v31 = vadd.f32 %v5429_v34, %v8941_v40  ;;  %v5432_v25 = vadd.f32 %v5431_v5, %v5430_v42 }
 0xef3   : > { %v4306_v36 = vadd.f32 %v5432_v25, %v8941_v40  ;;  %v9006_v29 = vadd.f32 %v4303_v31, %v8879_v10 }
 0xef5   : > { %4359 = vadd.xlane.f32.xlu0 %v9006_v29  ;;  %v5433_v23 = vpop.f32.mrb[116].mxu1  ;;  %v9010_v15 = vadd.f32 %v4306_v36, %v8875_v8 }
 0xef6   : > { %v5434_v26 = vpop.f32.mrb[117].mxu1 }
 0xef7   : > { %v5435_v52 = vadd.f32 %v5434_v26, %v5433_v23  ;;  %4361 = vadd.xlane.f32.xlu1 %v9010_v15  ;;  %v5436_v41 = vpop.f32.mrb[118].mxu1 }
 0xef8   : > { %v5437_v61 = vpop.f32.mrb[119].mxu1 }
 0xef9   : > { %v4311_v24 = vadd.f32 %v5435_v52, %v8941_v40  ;;  %v5438_v56 = vadd.f32 %v5437_v61, %v5436_v41 }
 0xefb   : > { %v4314_v0 = vadd.f32 %v5438_v56, %v8941_v40  ;;  %v9016_v10 = vadd.f32 %v4311_v24, %v8891_v60 }
 0xefd   : > { %4363 = vadd.xlane.f32.xlu0 %v9016_v10  ;;  %v9020_v17 = vadd.f32 %v4314_v0, %v8888_v12 }
 0xeff   : > { %4365 = vadd.xlane.f32.xlu1 %v9020_v17 }
 0xf20   : > { %v4336_v8 = vpop.xlane.xlu0 %4335 }
 0xf21   : > { %v4367_v2 = vmul.f32 0.0078125, %v4336_v8 }
 0xf22   : > { %v4338_v6 = vpop.xlane.xlu1 %4337 }
 0xf23   : > { %v9024_v35 = vsub.f32 %v8946_v54, %v4367_v2  ;;  %v4368_v55 = vmul.f32 0.0078125, %v4338_v6 }
 0xf25   : > { %v9027_v53 = vsub.f32 %v8950_v7, %v4368_v55  ;;  %v4399_v60 = vmul.f32 %v9024_v35, %v9024_v35 }
 0xf27   : > { %4415 = vadd.xlane.f32.xlu0 %v4399_v60  ;;  %v4400_v12 = vmul.f32 %v9027_v53, %v9027_v53 }
 0xf28   : > { %v4340_v40 = vpop.xlane.xlu0 %4339 }
 0xf29   : > { %v4369_v13 = vmul.f32 0.0078125, %v4340_v40  ;;  %4417 = vadd.xlane.f32.xlu1 %v4400_v12 }
 0xf2a   : > { %v4342_v37 = vpop.xlane.xlu1 %4341 }
 0xf2b   : > { %v9034_v59 = vsub.f32 %v8956_v48, %v4369_v13  ;;  %v4370_v54 = vmul.f32 0.0078125, %v4342_v37 }
 0xf2d   : > { %v9037_v1 = vsub.f32 %v8960_v50, %v4370_v54  ;;  %v4401_v7 = vmul.f32 %v9034_v59, %v9034_v59 }
 0xf2f   : > { %4419 = vadd.xlane.f32.xlu0 %v4401_v7  ;;  %v4402_v44 = vmul.f32 %v9037_v1, %v9037_v1 }
 0xf31   : > { %4421 = vadd.xlane.f32.xlu1 %v4402_v44 }
 0xf62   : > { %v4344_v19 = vpop.xlane.xlu0 %4343 }
 0xf63   : > { %v4371_v57 = vmul.f32 0.0078125, %v4344_v19 }
 0xf64   : > { %v4346_v21 = vpop.xlane.xlu1 %4345 }
 0xf65   : > { %v9044_v3 = vsub.f32 %v8966_v28, %v4371_v57  ;;  %v4372_v48 = vmul.f32 0.0078125, %v4346_v21  ;;  %v9108_v57 = vld [vmem:[%s793_s5] ss:$0 sm:$0xff] }
 0xf67   : > { %v9047_v46 = vsub.f32 %v8970_v20, %v4372_v48  ;;  %v4403_v50 = vmul.f32 %v9044_v3, %v9044_v3 }
 0xf69   : > { %4423 = vadd.xlane.f32.xlu0 %v4403_v50  ;;  %v4404_v62 = vmul.f32 %v9047_v46, %v9047_v46  ;;  %v9116_v50 = vld [vmem:[%s796_s0] ss:$0 sm:$0xff] }
 0xf6a   : > { %v4348_v63 = vpop.xlane.xlu0 %4347 }
 0xf6b   : > { %v4373_v58 = vmul.f32 0.0078125, %v4348_v63  ;;  %4425 = vadd.xlane.f32.xlu1 %v4404_v62 }
 0xf6c   : > { %v4350_v27 = vpop.xlane.xlu1 %4349 }
 0xf6d   : > { %v9054_v18 = vsub.f32 %v8976_v45, %v4373_v58  ;;  %v4374_v28 = vmul.f32 0.0078125, %v4350_v27 }
 0xf6f   : > { %v9057_v4 = vsub.f32 %v8980_v51, %v4374_v28  ;;  %v4405_v20 = vmul.f32 %v9054_v18, %v9054_v18 }
 0xf71   : > { %4427 = vadd.xlane.f32.xlu0 %v4405_v20  ;;  %v4406_v16 = vmul.f32 %v9057_v4, %v9057_v4 }
 0xf72   : > { %v4352_v38 = vpop.xlane.xlu0 %4351 }
 0xf73   : > { %v4375_v14 = vmul.f32 0.0078125, %v4352_v38  ;;  %4429 = vadd.xlane.f32.xlu1 %v4406_v16 }
 0xf74   : > { %v4354_v33 = vpop.xlane.xlu1 %4353 }
 0xf75   : > { %v9064_v11 = vsub.f32 %v8986_v43, %v4375_v14  ;;  %v4376_v45 = vmul.f32 0.0078125, %v4354_v33 }
 0xf77   : > { %v9067_v22 = vsub.f32 %v8990_v30, %v4376_v45  ;;  %v4407_v51 = vmul.f32 %v9064_v11, %v9064_v11 }
 0xf79   : > { %4431 = vadd.xlane.f32.xlu0 %v4407_v51  ;;  %v4408_v9 = vmul.f32 %v9067_v22, %v9067_v22 }
 0xf7a   : > { %v4356_v39 = vpop.xlane.xlu0 %4355 }
 0xf7b   : > { %v4377_v47 = vmul.f32 0.0078125, %v4356_v39  ;;  %4433 = vadd.xlane.f32.xlu1 %v4408_v9 }
 0xf7c   : > { %v4358_v34 = vpop.xlane.xlu1 %4357 }
 0xf7d   : > { %v9074_v42 = vsub.f32 %v8996_v49, %v4377_v47  ;;  %v4378_v43 = vmul.f32 0.0078125, %v4358_v34 }
 0xf7f   : > { %v9077_v5 = vsub.f32 %v9000_v32, %v4378_v43  ;;  %v4409_v30 = vmul.f32 %v9074_v42, %v9074_v42 }
 0xf81   : > { %4435 = vadd.xlane.f32.xlu0 %v4409_v30  ;;  %v4410_v31 = vmul.f32 %v9077_v5, %v9077_v5 }
 0xf82   : > { %v4360_v25 = vpop.xlane.xlu0 %4359 }
 0xf83   : > { %v4379_v36 = vmul.f32 0.0078125, %v4360_v25  ;;  %4437 = vadd.xlane.f32.xlu1 %v4410_v31 }
 0xf84   : > { %v4362_v23 = vpop.xlane.xlu1 %4361 }
 0xf85   : > { %v9084_v26 = vsub.f32 %v9006_v29, %v4379_v36  ;;  %v4380_v49 = vmul.f32 0.0078125, %v4362_v23 }
 0xf87   : > { %v9087_v52 = vsub.f32 %v9010_v15, %v4380_v49  ;;  %v4411_v32 = vmul.f32 %v9084_v26, %v9084_v26 }
 0xf89   : > { %4439 = vadd.xlane.f32.xlu0 %v4411_v32  ;;  %v4412_v41 = vmul.f32 %v9087_v52, %v9087_v52 }
 0xf8a   : > { %v4364_v61 = vpop.xlane.xlu0 %4363 }
 0xf8b   : > { %v4381_v24 = vmul.f32 0.0078125, %v4364_v61  ;;  %4441 = vadd.xlane.f32.xlu1 %v4412_v41 }
 0xf8c   : > { %v4366_v56 = vpop.xlane.xlu1 %4365 }
 0xf8d   : > { %v9094_v0 = vsub.f32 %v9016_v10, %v4381_v24  ;;  %v4382_v29 = vmul.f32 0.0078125, %v4366_v56 }
 0xf8f   : > { %v9097_v8 = vsub.f32 %v9020_v17, %v4382_v29  ;;  %v4413_v15 = vmul.f32 %v9094_v0, %v9094_v0 }
 0xf91   : > { %4443 = vadd.xlane.f32.xlu0 %v4413_v15  ;;  %v4414_v2 = vmul.f32 %v9097_v8, %v9097_v8 }
 0xf93   : > { %4445 = vadd.xlane.f32.xlu1 %v4414_v2 }
 0xfb4   : > { %v4416_v6 = vpop.xlane.xlu0 %4415 }
 0xfb5   : > { %v4447_v55 = vmul.f32 0.0078125, %v4416_v6 }
 0xfb6   : > { %v4418_v60 = vpop.xlane.xlu1 %4417 }
 0xfb7   : > { %v4463_v12 = vadd.f32 1e-05, %v4447_v55  ;;  %v4448_v40 = vmul.f32 0.0078125, %v4418_v60 }
 0xfb9   : > { %6313 = vrsqrt.f32 %v4463_v12  ;;  %v4464_v10 = vadd.f32 1e-05, %v4448_v40 }
 0xfbb   : > { %6315 = vrsqrt.f32 %v4464_v10 }
 0xfbc   : > { %v4420_v17 = vpop.xlane.xlu0 %4419 }
 0xfbd   : > { %v4449_v13 = vmul.f32 0.0078125, %v4420_v17 }
 0xfbe   : > { %v4422_v37 = vpop.xlane.xlu1 %4421 }
 0xfbf   : > { %v4465_v54 = vadd.f32 1e-05, %v4449_v13  ;;  %v4450_v7 = vmul.f32 0.0078125, %v4422_v37 }
 0xfc1   : > { %6317 = vrsqrt.f32 %v4465_v54  ;;  %v4466_v44 = vadd.f32 1e-05, %v4450_v7 }
 0xfc3   : > { %v6314_v19 = vpop.eup %6313  ;;  %6319 = vrsqrt.f32 %v4466_v44 }
 0xfc4   : > { %v4495_v21 = vmul.f32 %v6314_v19, %v9024_v35 }
 0xfc5   : > { %v6316_v48 = vpop.eup %6315 }
 0xfc6   : > { %v4517_v62 = vmul.f32 %v9108_v57, %v4495_v21  ;;  %v4496_v63 = vmul.f32 %v6316_v48, %v9027_v53 }
 0xfc8   : > { %v9121_v58 = vadd.f32 %v9116_v50, %v4517_v62  ;;  %v4518_v27 = vmul.f32 %v9108_v57, %v4496_v63 }
 0xfca   : > { %4555 = vst [vmem:[%s7194_s6] sm:$0xff] %v9121_v58  ;;  %v9127_v35 = vadd.f32 %v9116_v50, %v4518_v27  ;;  %4577 = vadd.xlane.f32.xlu0 (!%p5202_p10), %v9121_v58 }
 0xfcb   : > { %v6318_v28 = vpop.eup %6317 }
 0xfcc   : > { %4556 = vst [vmem:[%s7194_s6 + $0x8] sm:$0xff] %v9127_v35  ;;  %v4497_v20 = vmul.f32 %v6318_v28, %v9034_v59 }
 0xfcd   : > { %v6320_v16 = vpop.eup %6319 }
 0xfce   : > { %v4519_v38 = vmul.f32 %v9108_v57, %v4497_v20  ;;  %v4498_v53 = vmul.f32 %v6320_v16, %v9037_v1  ;;  %4579 = vadd.xlane.f32.xlu0 (!%p5202_p10), %v9127_v35 }
 0xfd0   : > { %v9135_v14 = vadd.f32 %v9116_v50, %v4519_v38  ;;  %v4520_v33 = vmul.f32 %v9108_v57, %v4498_v53 }
 0xfd2   : > { %4557 = vst [vmem:[%s7194_s6 + $0x10] sm:$0xff] %v9135_v14  ;;  %v9141_v45 = vadd.f32 %v9116_v50, %v4520_v33  ;;  %4581 = vadd.xlane.f32.xlu1 (!%p5202_p10), %v9135_v14 }
 0xfd4   : > { %4558 = vst [vmem:[%s7194_s6 + $0x18] sm:$0xff] %v9141_v45 }
 0xfd6   : > { %4583 = vadd.xlane.f32.xlu1 (!%p5202_p10), %v9141_v45 }
 0xff6   : > { %v4424_v51 = vpop.xlane.xlu0 %4423 }
 0xff7   : > { %v4451_v9 = vmul.f32 0.0078125, %v4424_v51 }
 0xff8   : > { %v4426_v59 = vpop.xlane.xlu1 %4425 }
 0xff9   : > { %v4467_v39 = vadd.f32 1e-05, %v4451_v9  ;;  %v4452_v47 = vmul.f32 0.0078125, %v4426_v59 }
 0xffb   : > { %6321 = vrsqrt.f32 %v4467_v39  ;;  %v4468_v34 = vadd.f32 1e-05, %v4452_v47 }
 0xffd   : > { %6323 = vrsqrt.f32 %v4468_v34 }
 0xffe   : > { %v4428_v1 = vpop.xlane.xlu0 %4427 }
 0xfff   : > { %v4453_v43 = vmul.f32 0.0078125, %v4428_v1 }
0x1000   : > { %v4430_v30 = vpop.xlane.xlu1 %4429 }
0x1001   : > { %v4469_v31 = vadd.f32 1e-05, %v4453_v43  ;;  %v4454_v25 = vmul.f32 0.0078125, %v4430_v30 }
0x1003   : > { %6325 = vrsqrt.f32 %v4469_v31  ;;  %v4470_v36 = vadd.f32 1e-05, %v4454_v25 }
0x1005   : > { %v6322_v23 = vpop.eup %6321  ;;  %6327 = vrsqrt.f32 %v4470_v36 }
0x1006   : > { %v4499_v49 = vmul.f32 %v6322_v23, %v9044_v3  ;;  %v4432_v32 = vpop.xlane.xlu0 %4431 }
0x1007   : > { %v6324_v41 = vpop.eup %6323  ;;  %v4455_v61 = vmul.f32 0.0078125, %v4432_v32 }
0x1008   : > { %v4521_v24 = vmul.f32 %v9108_v57, %v4499_v49  ;;  %v4500_v56 = vmul.f32 %v6324_v41, %v9047_v46  ;;  %v4434_v29 = vpop.xlane.xlu1 %4433 }
0x1009   : > { %v4471_v15 = vadd.f32 1e-05, %v4455_v61  ;;  %v4456_v2 = vmul.f32 0.0078125, %v4434_v29 }
0x100a   : > { %v9149_v6 = vadd.f32 %v9116_v50, %v4521_v24  ;;  %v4522_v55 = vmul.f32 %v9108_v57, %v4500_v56 }
0x100b   : > { %6329 = vrsqrt.f32 %v4471_v15  ;;  %v4472_v60 = vadd.f32 1e-05, %v4456_v2 }
0x100c   : > { %4559 = vst [vmem:[%s7194_s6 + $0x20] sm:$0xff] %v9149_v6  ;;  %v9155_v3 = vadd.f32 %v9116_v50, %v4522_v55  ;;  %4585 = vadd.xlane.f32.xlu0 (!%p5202_p10), %v9149_v6 }
0x100d   : > { %v6326_v12 = vpop.eup %6325  ;;  %6331 = vrsqrt.f32 %v4472_v60 }
0x100e   : > { %4560 = vst [vmem:[%s7194_s6 + $0x28] sm:$0xff] %v9155_v3  ;;  %v4501_v46 = vmul.f32 %v6326_v12, %v9054_v18  ;;  %v4436_v40 = vpop.xlane.xlu0 %4435  ;;  %4587 = vadd.xlane.f32.xlu1 (!%p5202_p10), %v9155_v3 }
0x100f   : > { %v6328_v10 = vpop.eup %6327  ;;  %v4457_v17 = vmul.f32 0.0078125, %v4436_v40 }
0x1010   : > { %v4523_v13 = vmul.f32 %v9108_v57, %v4501_v46  ;;  %v4502_v37 = vmul.f32 %v6328_v10, %v9057_v4  ;;  %v4438_v54 = vpop.xlane.xlu1 %4437 }
0x1011   : > { %v4473_v7 = vadd.f32 1e-05, %v4457_v17  ;;  %v4458_v44 = vmul.f32 0.0078125, %v4438_v54 }
0x1012   : > { %v9163_v19 = vadd.f32 %v9116_v50, %v4523_v13  ;;  %v4524_v21 = vmul.f32 %v9108_v57, %v4502_v37 }
0x1013   : > { %6333 = vrsqrt.f32 %v4473_v7  ;;  %v4474_v48 = vadd.f32 1e-05, %v4458_v44 }
0x1014   : > { %4561 = vst [vmem:[%s7194_s6 + $0x30] sm:$0xff] %v9163_v19  ;;  %v9169_v18 = vadd.f32 %v9116_v50, %v4524_v21  ;;  %4589 = vadd.xlane.f32.xlu0 (!%p5202_p10), %v9163_v19 }
0x1015   : > { %v6330_v62 = vpop.eup %6329  ;;  %6335 = vrsqrt.f32 %v4474_v48 }
0x1016   : > { %4562 = vst [vmem:[%s7194_s6 + $0x38] sm:$0xff] %v9169_v18  ;;  %v4503_v4 = vmul.f32 %v6330_v62, %v9064_v11  ;;  %v4440_v63 = vpop.xlane.xlu0 %4439  ;;  %4591 = vadd.xlane.f32.xlu1 (!%p5202_p10), %v9169_v18 }
0x1017   : > { %v6332_v27 = vpop.eup %6331  ;;  %v4459_v28 = vmul.f32 0.0078125, %v4440_v63 }
0x1018   : > { %v4525_v20 = vmul.f32 %v9108_v57, %v4503_v4  ;;  %v4504_v16 = vmul.f32 %v6332_v27, %v9067_v22  ;;  %v4442_v38 = vpop.xlane.xlu1 %4441 }
0x1019   : > { %v4475_v53 = vadd.f32 1e-05, %v4459_v28  ;;  %v4460_v33 = vmul.f32 0.0078125, %v4442_v38 }
0x101a   : > { %v9177_v51 = vadd.f32 %v9116_v50, %v4525_v20  ;;  %v4526_v9 = vmul.f32 %v9108_v57, %v4504_v16 }
0x101b   : > { %6337 = vrsqrt.f32 %v4475_v53  ;;  %v4476_v59 = vadd.f32 1e-05, %v4460_v33 }
0x101c   : > { %4563 = vst [vmem:[%s7194_s6 + $0x40] sm:$0xff] %v9177_v51  ;;  %v9183_v11 = vadd.f32 %v9116_v50, %v4526_v9  ;;  %4593 = vadd.xlane.f32.xlu0 (!%p5202_p10), %v9177_v51 }
0x101d   : > { %v6334_v39 = vpop.eup %6333  ;;  %6339 = vrsqrt.f32 %v4476_v59 }
0x101e   : > { %4564 = vst [vmem:[%s7194_s6 + $0x48] sm:$0xff] %v9183_v11  ;;  %v4505_v22 = vmul.f32 %v6334_v39, %v9074_v42  ;;  %v4444_v47 = vpop.xlane.xlu0 %4443  ;;  %4595 = vadd.xlane.f32.xlu1 (!%p5202_p10), %v9183_v11 }
0x101f   : > { %v6336_v34 = vpop.eup %6335  ;;  %v4461_v1 = vmul.f32 0.0078125, %v4444_v47 }
0x1020   : > { %v4527_v43 = vmul.f32 %v9108_v57, %v4505_v22  ;;  %v4506_v30 = vmul.f32 %v6336_v34, %v9077_v5  ;;  %v4446_v31 = vpop.xlane.xlu1 %4445 }
0x1021   : > { %v4477_v25 = vadd.f32 1e-05, %v4461_v1  ;;  %v4462_v36 = vmul.f32 0.0078125, %v4446_v31 }
0x1022   : > { %v9191_v23 = vadd.f32 %v9116_v50, %v4527_v43  ;;  %v4528_v49 = vmul.f32 %v9108_v57, %v4506_v30 }
0x1023   : > { %6341 = vrsqrt.f32 %v4477_v25  ;;  %v4478_v42 = vadd.f32 1e-05, %v4462_v36 }
0x1024   : > { %4565 = vst [vmem:[%s7194_s6 + $0x50] sm:$0xff] %v9191_v23  ;;  %v9197_v32 = vadd.f32 %v9116_v50, %v4528_v49  ;;  %4597 = vadd.xlane.f32.xlu0 (!%p5202_p10), %v9191_v23 }
0x1025   : > { %v6338_v41 = vpop.eup %6337  ;;  %6343 = vrsqrt.f32 %v4478_v42 }
0x1026   : > { %4566 = vst [vmem:[%s7194_s6 + $0x58] sm:$0xff] %v9197_v32  ;;  %v4507_v5 = vmul.f32 %v6338_v41, %v9084_v26  ;;  %4599 = vadd.xlane.f32.xlu1 (!%p5202_p10), %v9197_v32 }
0x1027   : > { %v6340_v61 = vpop.eup %6339 }
0x1028   : > { %v4529_v24 = vmul.f32 %v9108_v57, %v4507_v5  ;;  %v4508_v56 = vmul.f32 %v6340_v61, %v9087_v52 }
0x102a   : > { %v9205_v29 = vadd.f32 %v9116_v50, %v4529_v24  ;;  %v4530_v15 = vmul.f32 %v9108_v57, %v4508_v56 }
0x102c   : > { %4567 = vst [vmem:[%s7194_s6 + $0x60] sm:$0xff] %v9205_v29  ;;  %v9211_v2 = vadd.f32 %v9116_v50, %v4530_v15  ;;  %4601 = vadd.xlane.f32.xlu0 (!%p5202_p10), %v9205_v29 }
0x102d   : > { %v6342_v55 = vpop.eup %6341 }
0x102e   : > { %4568 = vst [vmem:[%s7194_s6 + $0x68] sm:$0xff] %v9211_v2  ;;  %v4509_v26 = vmul.f32 %v6342_v55, %v9094_v0  ;;  %4603 = vadd.xlane.f32.xlu1 (!%p5202_p10), %v9211_v2 }
0x102f   : > { %v6344_v60 = vpop.eup %6343 }
0x1030   : > { %v4531_v12 = vmul.f32 %v9108_v57, %v4509_v26  ;;  %v4510_v52 = vmul.f32 %v6344_v60, %v9097_v8  ;;  %4574 = sbr.rel (%p5202_p10) target bundleno = 4462 (0x116e), region = 108 }
0x1032   : > { %v9219_v46 = vadd.f32 %v9116_v50, %v4531_v12  ;;  %v4532_v40 = vmul.f32 %v9108_v57, %v4510_v52 }
0x1034   : > { %4569 = vst [vmem:[%s7194_s6 + $0x70] sm:$0xff] %v9219_v46  ;;  %v9225_v10 = vadd.f32 %v9116_v50, %v4532_v40  ;;  %4605 = vadd.xlane.f32.xlu0 (!%p5202_p10), %v9219_v46 }
0x1036   : > { %4570 = vst [vmem:[%s7194_s6 + $0x78] sm:$0xff] %v9225_v10  ;;  %4607 = vadd.xlane.f32.xlu1 (!%p5202_p10), %v9225_v10 }
0x1057   : > { %v4578_v0 = vpop.xlane.xlu0 %4577 }
0x1058   : > { %v4609_v57 = vmul.f32 0.0078125, %v4578_v0 }
0x105a   : > { %v9247_v17 = vsub.f32 %v9121_v58, %v4609_v57 }
0x105b   : > { %v4580_v37 = vpop.xlane.xlu0 %4579 }
0x105c   : > { %v4610_v7 = vmul.f32 0.0078125, %v4580_v37  ;;  %v4641_v44 = vmul.f32 %v9247_v17, %v9247_v17 }
0x105e   : > { %v9255_v48 = vsub.f32 %v9127_v35, %v4610_v7  ;;  %4657 = vadd.xlane.f32.xlu0 %v4641_v44 }
0x105f   : > { %v4582_v8 = vpop.xlane.xlu1 %4581 }
0x1060   : > { %v4611_v50 = vmul.f32 0.0078125, %v4582_v8  ;;  %v4642_v27 = vmul.f32 %v9255_v48, %v9255_v48 }
0x1062   : > { %v9250_v13 = vsub.f32 %v9135_v14, %v4611_v50  ;;  %4659 = vadd.xlane.f32.xlu1 %v4642_v27 }
0x1063   : > { %v4584_v54 = vpop.xlane.xlu1 %4583 }
0x1064   : > { %v4612_v21 = vmul.f32 0.0078125, %v4584_v54  ;;  %v4643_v58 = vmul.f32 %v9250_v13, %v9250_v13 }
0x1066   : > { %v9258_v62 = vsub.f32 %v9141_v45, %v4612_v21  ;;  %4661 = vadd.xlane.f32.xlu0 %v4643_v58 }
0x1068   : > { %v4644_v45 = vmul.f32 %v9258_v62, %v9258_v62 }
0x106a   : > { %4663 = vadd.xlane.f32.xlu1 %v4644_v45 }
0x1099   : > { %v4586_v4 = vpop.xlane.xlu0 %4585 }
0x109a   : > { %v4613_v63 = vmul.f32 0.0078125, %v4586_v4 }
0x109b   : > { %v4588_v14 = vpop.xlane.xlu1 %4587 }
0x109c   : > { %v4614_v28 = vmul.f32 0.0078125, %v4588_v14  ;;  %v9265_v20 = vsub.f32 %v9149_v6, %v4613_v63 }
0x109e   : > { %v9268_v35 = vsub.f32 %v9155_v3, %v4614_v28  ;;  %v4645_v33 = vmul.f32 %v9265_v20, %v9265_v20 }
0x10a0   : > { %4665 = vadd.xlane.f32.xlu0 %v4645_v33  ;;  %v4646_v3 = vmul.f32 %v9268_v35, %v9268_v35 }
0x10a1   : > { %v4590_v16 = vpop.xlane.xlu0 %4589 }
0x10a2   : > { %v4615_v53 = vmul.f32 0.0078125, %v4590_v16  ;;  %4667 = vadd.xlane.f32.xlu1 %v4646_v3 }
0x10a3   : > { %v4592_v38 = vpop.xlane.xlu1 %4591 }
0x10a4   : > { %v4616_v9 = vmul.f32 0.0078125, %v4592_v38  ;;  %v9275_v59 = vsub.f32 %v9163_v19, %v4615_v53 }
0x10a6   : > { %v9278_v6 = vsub.f32 %v9169_v18, %v4616_v9  ;;  %v4647_v34 = vmul.f32 %v9275_v59, %v9275_v59  ;;  %v9329_v9 = vld [vmem:[%s9745_s3] ss:$0 sm:$0xff] }
0x10a8   : > { %4669 = vadd.xlane.f32.xlu0 %v4647_v34  ;;  %v4648_v18 = vmul.f32 %v9278_v6, %v9278_v6 }
0x10a9   : > { %v4594_v39 = vpop.xlane.xlu0 %4593 }
0x10aa   : > { %v4617_v47 = vmul.f32 0.0078125, %v4594_v39  ;;  %4671 = vadd.xlane.f32.xlu1 %v4648_v18 }
0x10ab   : > { %v4596_v22 = vpop.xlane.xlu1 %4595 }
0x10ac   : > { %v4618_v1 = vmul.f32 0.0078125, %v4596_v22  ;;  %v9285_v43 = vsub.f32 %v9177_v51, %v4617_v47 }
0x10ae   : > { %v9288_v19 = vsub.f32 %v9183_v11, %v4618_v1  ;;  %v4649_v36 = vmul.f32 %v9285_v43, %v9285_v43  ;;  %v9335_v1 = vld [vmem:[%s9746_s9] ss:$0 sm:$0xff] }
0x10b0   : > { %4673 = vadd.xlane.f32.xlu0 %v4649_v36  ;;  %v4650_v11 = vmul.f32 %v9288_v19, %v9288_v19 }
0x10b1   : > { %v4598_v30 = vpop.xlane.xlu0 %4597 }
0x10b2   : > { %v4619_v25 = vmul.f32 0.0078125, %v4598_v30  ;;  %4675 = vadd.xlane.f32.xlu1 %v4650_v11 }
0x10b3   : > { %v4600_v31 = vpop.xlane.xlu1 %4599 }
0x10b4   : > { %v4620_v49 = vmul.f32 0.0078125, %v4600_v31  ;;  %v9295_v42 = vsub.f32 %v9191_v23, %v4619_v25 }
0x10b6   : > { %v9298_v51 = vsub.f32 %v9197_v32, %v4620_v49  ;;  %v4651_v24 = vmul.f32 %v9295_v42, %v9295_v42 }
0x10b8   : > { %4677 = vadd.xlane.f32.xlu0 %v4651_v24  ;;  %v4652_v32 = vmul.f32 %v9298_v51, %v9298_v51 }
0x10b9   : > { %v4602_v41 = vpop.xlane.xlu0 %4601 }
0x10ba   : > { %v4621_v61 = vmul.f32 0.0078125, %v4602_v41  ;;  %4679 = vadd.xlane.f32.xlu1 %v4652_v32 }
0x10bb   : > { %v4604_v5 = vpop.xlane.xlu1 %4603 }
0x10bc   : > { %v4622_v56 = vmul.f32 0.0078125, %v4604_v5  ;;  %v9305_v15 = vsub.f32 %v9205_v29, %v4621_v61 }
0x10be   : > { %v9308_v23 = vsub.f32 %v9211_v2, %v4622_v56  ;;  %v4653_v12 = vmul.f32 %v9305_v15, %v9305_v15 }
0x10c0   : > { %4681 = vadd.xlane.f32.xlu0 %v4653_v12  ;;  %v4654_v2 = vmul.f32 %v9308_v23, %v9308_v23 }
0x10c1   : > { %v4606_v55 = vpop.xlane.xlu0 %4605 }
0x10c2   : > { %v4623_v60 = vmul.f32 0.0078125, %v4606_v55  ;;  %4683 = vadd.xlane.f32.xlu1 %v4654_v2 }
0x10c3   : > { %v4608_v26 = vpop.xlane.xlu1 %4607 }
0x10c4   : > { %v4624_v52 = vmul.f32 0.0078125, %v4608_v26  ;;  %v9315_v40 = vsub.f32 %v9219_v46, %v4623_v60 }
0x10c6   : > { %v9318_v29 = vsub.f32 %v9225_v10, %v4624_v52  ;;  %v4655_v0 = vmul.f32 %v9315_v40, %v9315_v40 }
0x10c8   : > { %4685 = vadd.xlane.f32.xlu0 %v4655_v0  ;;  %v4656_v8 = vmul.f32 %v9318_v29, %v9318_v29 }
0x10ca   : > { %4687 = vadd.xlane.f32.xlu1 %v4656_v8 }
0x10eb   : > { %v4658_v57 = vpop.xlane.xlu0 %4657 }
0x10ec   : > { %v4689_v46 = vmul.f32 0.0078125, %v4658_v57 }
0x10ee   : > { %v4705_v50 = vadd.f32 1e-05, %v4689_v46 }
0x10ef   : > { %v4660_v37 = vpop.xlane.xlu1 %4659 }
0x10f0   : > { %6361 = vrsqrt.f32 %v4705_v50  ;;  %v4690_v10 = vmul.f32 0.0078125, %v4660_v37 }
0x10f2   : > { %v4706_v44 = vadd.f32 1e-05, %v4690_v10 }
0x10f3   : > { %v4662_v54 = vpop.xlane.xlu0 %4661 }
0x10f4   : > { %v4691_v7 = vmul.f32 0.0078125, %v4662_v54  ;;  %6363 = vrsqrt.f32 %v4706_v44 }
0x10f6   : > { %v4707_v21 = vadd.f32 1e-05, %v4691_v7 }
0x10f7   : > { %v4664_v58 = vpop.xlane.xlu1 %4663 }
0x10f8   : > { %v4692_v14 = vmul.f32 0.0078125, %v4664_v58  ;;  %6365 = vrsqrt.f32 %v4707_v21 }
0x10fa   : > { %v4708_v27 = vadd.f32 1e-05, %v4692_v14  ;;  %v6362_v33 = vpop.eup %6361 }
0x10fb   : > { %v4737_v22 = vmul.f32 %v6362_v33, %v9247_v17 }
0x10fc   : > { %6367 = vrsqrt.f32 %v4708_v27 }
0x10fd   : > { %v4759_v31 = vmul.f32 %v9329_v9, %v4737_v22 }
0x10fe   : > { %v6364_v25 = vpop.eup %6363 }
0x10ff   : > { %v4781_v17 = vadd.f32 %v9335_v1, %v4759_v31  ;;  %v4738_v41 = vmul.f32 %v6364_v25, %v9255_v48 }
0x1101   : > { %4797 = vst [vmem:[%s7194_s6] sm:$0xff] %v4781_v17  ;;  %v4760_v55 = vmul.f32 %v9329_v9, %v4738_v41 }
0x1102   : > { %v6366_v11 = vpop.eup %6365 }
0x1103   : > { %v4739_v24 = vmul.f32 %v6366_v11, %v9250_v13  ;;  %v4782_v48 = vadd.f32 %v9335_v1, %v4760_v55 }
0x1105   : > { %v4761_v60 = vmul.f32 %v9329_v9, %v4739_v24  ;;  %4798 = vst [vmem:[%s7194_s6 + $0x8] sm:$0xff] %v4782_v48 }
0x1106   : > { %v6368_v26 = vpop.eup %6367 }
0x1107   : > { %v4740_v0 = vmul.f32 %v6368_v26, %v9258_v62  ;;  %v4783_v57 = vadd.f32 %v9335_v1, %v4761_v60 }
0x1109   : > { %v4762_v37 = vmul.f32 %v9329_v9, %v4740_v0  ;;  %4799 = vst [vmem:[%s7194_s6 + $0x10] sm:$0xff] %v4783_v57 }
0x110b   : > { %v4784_v21 = vadd.f32 %v9335_v1, %v4762_v37 }
0x110d   : > { %4800 = vst [vmem:[%s7194_s6 + $0x18] sm:$0xff] %v4784_v21 }
0x112d   : > { %v4666_v4 = vpop.xlane.xlu0 %4665 }
0x112e   : > { %v4693_v63 = vmul.f32 0.0078125, %v4666_v4 }
0x112f   : > { %v4668_v45 = vpop.xlane.xlu1 %4667 }
0x1130   : > { %v4709_v28 = vadd.f32 1e-05, %v4693_v63  ;;  %v4694_v38 = vmul.f32 0.0078125, %v4668_v45 }
0x1132   : > { %6369 = vrsqrt.f32 %v4709_v28  ;;  %v4710_v3 = vadd.f32 1e-05, %v4694_v38 }
0x1134   : > { %6371 = vrsqrt.f32 %v4710_v3 }
0x1135   : > { %v4670_v16 = vpop.xlane.xlu0 %4669 }
0x1136   : > { %v4695_v53 = vmul.f32 0.0078125, %v4670_v16 }
0x1137   : > { %v4672_v47 = vpop.xlane.xlu1 %4671 }
0x1138   : > { %v4711_v39 = vadd.f32 1e-05, %v4695_v53  ;;  %v4696_v18 = vmul.f32 0.0078125, %v4672_v47 }
0x113a   : > { %6373 = vrsqrt.f32 %v4711_v39  ;;  %v4712_v36 = vadd.f32 1e-05, %v4696_v18 }
0x113c   : > { %6375 = vrsqrt.f32 %v4712_v36  ;;  %v6370_v2 = vpop.eup %6369 }
0x113d   : > { %v4674_v34 = vpop.xlane.xlu0 %4673  ;;  %v4741_v46 = vmul.f32 %v6370_v2, %v9265_v20 }
0x113e   : > { %v4697_v30 = vmul.f32 0.0078125, %v4674_v34  ;;  %v6372_v10 = vpop.eup %6371 }
0x113f   : > { %v4676_v5 = vpop.xlane.xlu1 %4675  ;;  %v4763_v7 = vmul.f32 %v9329_v9, %v4741_v46  ;;  %v4742_v58 = vmul.f32 %v6372_v10, %v9268_v35 }
0x1140   : > { %v4713_v49 = vadd.f32 1e-05, %v4697_v30  ;;  %v4698_v56 = vmul.f32 0.0078125, %v4676_v5 }
0x1141   : > { %v4785_v63 = vadd.f32 %v9335_v1, %v4763_v7  ;;  %v4764_v45 = vmul.f32 %v9329_v9, %v4742_v58 }
0x1142   : > { %6377 = vrsqrt.f32 %v4713_v49  ;;  %v4714_v12 = vadd.f32 1e-05, %v4698_v56 }
0x1143   : > { %4801 = vst [vmem:[%s7194_s6 + $0x20] sm:$0xff] %v4785_v63  ;;  %v4786_v3 = vadd.f32 %v9335_v1, %v4764_v45 }
0x1144   : > { %6379 = vrsqrt.f32 %v4714_v12  ;;  %v6374_v62 = vpop.eup %6373 }
0x1145   : > { %v4678_v61 = vpop.xlane.xlu0 %4677  ;;  %v4743_v27 = vmul.f32 %v6374_v62, %v9275_v59  ;;  %4802 = vst [vmem:[%s7194_s6 + $0x28] sm:$0xff] %v4786_v3 }
0x1146   : > { %v4699_v32 = vmul.f32 0.0078125, %v4678_v61  ;;  %v6376_v38 = vpop.eup %6375 }
0x1147   : > { %v4680_v13 = vpop.xlane.xlu1 %4679  ;;  %v4765_v35 = vmul.f32 %v9329_v9, %v4743_v27  ;;  %v4744_v39 = vmul.f32 %v6376_v38, %v9278_v6 }
0x1148   : > { %v4715_v52 = vadd.f32 1e-05, %v4699_v32  ;;  %v4700_v50 = vmul.f32 0.0078125, %v4680_v13 }
0x1149   : > { %v4787_v47 = vadd.f32 %v9335_v1, %v4765_v35  ;;  %v4766_v30 = vmul.f32 %v9329_v9, %v4744_v39 }
0x114a   : > { %6381 = vrsqrt.f32 %v4715_v52  ;;  %v4716_v44 = vadd.f32 1e-05, %v4700_v50 }
0x114b   : > { %4803 = vst [vmem:[%s7194_s6 + $0x30] sm:$0xff] %v4787_v47  ;;  %v4788_v49 = vadd.f32 %v9335_v1, %v4766_v30 }
0x114c   : > { %6383 = vrsqrt.f32 %v4716_v44  ;;  %v6378_v33 = vpop.eup %6377 }
0x114d   : > { %v4682_v8 = vpop.xlane.xlu0 %4681  ;;  %v4745_v34 = vmul.f32 %v6378_v33, %v9285_v43  ;;  %4804 = vst [vmem:[%s7194_s6 + $0x38] sm:$0xff] %v4788_v49 }
0x114e   : > { %v4701_v54 = vmul.f32 0.0078125, %v4682_v8  ;;  %v6380_v31 = vpop.eup %6379 }
0x114f   : > { %v4684_v4 = vpop.xlane.xlu1 %4683  ;;  %v4767_v25 = vmul.f32 %v9329_v9, %v4745_v34  ;;  %v4746_v11 = vmul.f32 %v6380_v31, %v9288_v19 }
0x1150   : > { %v4717_v20 = vadd.f32 1e-05, %v4701_v54  ;;  %v4702_v28 = vmul.f32 0.0078125, %v4684_v4 }
0x1151   : > { %v4789_v43 = vadd.f32 %v9335_v1, %v4767_v25  ;;  %v4768_v41 = vmul.f32 %v9329_v9, %v4746_v11 }
0x1152   : > { %6385 = vrsqrt.f32 %v4717_v20  ;;  %v4718_v53 = vadd.f32 1e-05, %v4702_v28 }
0x1153   : > { %4805 = vst [vmem:[%s7194_s6 + $0x40] sm:$0xff] %v4789_v43  ;;  %v4790_v56 = vadd.f32 %v9335_v1, %v4768_v41 }
0x1154   : > { %6387 = vrsqrt.f32 %v4718_v53  ;;  %v6382_v6 = vpop.eup %6381 }
0x1155   : > { %v4686_v14 = vpop.xlane.xlu0 %4685  ;;  %v4747_v17 = vmul.f32 %v6382_v6, %v9295_v42  ;;  %4806 = vst [vmem:[%s7194_s6 + $0x48] sm:$0xff] %v4790_v56 }
0x1156   : > { %v4703_v16 = vmul.f32 0.0078125, %v4686_v14  ;;  %v6384_v5 = vpop.eup %6383 }
0x1157   : > { %v4688_v22 = vpop.xlane.xlu1 %4687  ;;  %v4769_v61 = vmul.f32 %v9329_v9, %v4747_v17  ;;  %v4748_v32 = vmul.f32 %v6384_v5, %v9298_v51 }
0x1158   : > { %v4719_v59 = vadd.f32 1e-05, %v4703_v16  ;;  %v4704_v18 = vmul.f32 0.0078125, %v4688_v22 }
0x1159   : > { %v4791_v19 = vadd.f32 %v9335_v1, %v4769_v61  ;;  %v4770_v42 = vmul.f32 %v9329_v9, %v4748_v32 }
0x115a   : > { %6389 = vrsqrt.f32 %v4719_v59  ;;  %v4720_v36 = vadd.f32 1e-05, %v4704_v18 }
0x115b   : > { %4807 = vst [vmem:[%s7194_s6 + $0x50] sm:$0xff] %v4791_v19  ;;  %v4792_v52 = vadd.f32 %v9335_v1, %v4770_v42 }
0x115c   : > { %6391 = vrsqrt.f32 %v4720_v36  ;;  %v6386_v24 = vpop.eup %6385 }
0x115d   : > { %v4749_v55 = vmul.f32 %v6386_v24, %v9305_v15  ;;  %4808 = vst [vmem:[%s7194_s6 + $0x58] sm:$0xff] %v4792_v52 }
0x115e   : > { %v6388_v26 = vpop.eup %6387 }
0x115f   : > { %v4771_v60 = vmul.f32 %v9329_v9, %v4749_v55  ;;  %v4750_v51 = vmul.f32 %v6388_v26, %v9308_v23 }
0x1161   : > { %v4793_v2 = vadd.f32 %v9335_v1, %v4771_v60  ;;  %v4772_v15 = vmul.f32 %v9329_v9, %v4750_v51 }
0x1163   : > { %4809 = vst [vmem:[%s7194_s6 + $0x60] sm:$0xff] %v4793_v2  ;;  %v4794_v8 = vadd.f32 %v9335_v1, %v4772_v15 }
0x1164   : > { %v6390_v12 = vpop.eup %6389 }
0x1165   : > { %v4751_v48 = vmul.f32 %v6390_v12, %v9315_v40  ;;  %4810 = vst [vmem:[%s7194_s6 + $0x68] sm:$0xff] %v4794_v8 }
0x1166   : > { %v6392_v0 = vpop.eup %6391 }
0x1167   : > { %v4773_v13 = vmul.f32 %v9329_v9, %v4751_v48  ;;  %v4752_v57 = vmul.f32 %v6392_v0, %v9318_v29 }
0x1169   : > { %v4795_v46 = vadd.f32 %v9335_v1, %v4773_v13  ;;  %v4774_v23 = vmul.f32 %v9329_v9, %v4752_v57 }
0x116b   : > { %4811 = vst [vmem:[%s7194_s6 + $0x70] sm:$0xff] %v4795_v46  ;;  %v4796_v50 = vadd.f32 %v9335_v1, %v4774_v23 }
0x116d   : > { %4812 = vst [vmem:[%s7194_s6 + $0x78] sm:$0xff] %v4796_v50 }
0x116e PF: > { %s9747_s21 = sld [smem:[#allocation23_spill]]  ;;  %s9748_s24 = sld [smem:[#allocation101_spill]] }
0x116f   : > { %s4827_s17 = sshll.u32 %s7194_s6, 4  ;;  %s4814_s14 = scalar_lea.sflag [#allocation5], %s7122_s27  ;;  %s9407_s17 = int_to_ptr.vmem [resolvable:$true] %s4827_s17 }
0x1170   : > { %s6543_s29 = scalar_lea.vmem %s9407_s17, 2048  ;;  %p9750_p7 = scmp.ne.s32.totalorder %s9579_s20, 0 }
0x1171   : > { %p6544_p13 = scmp.ne.s32.totalorder %s9407_s17, %s6543_s29  ;;  %s6690_s8 = smov [#allocation12]  }
0x1172   : > { %s6547_s30 = sshll.u32 %s6690_s8, 4  ;;  %s6548_s30 = int_to_ptr.vmem [resolvable:$false] %s6547_s30 }
0x1173   : > { %p6545_p1 = pnand %p6544_p13, %p9750_p7  ;;  %s6549_s28 = scalar_lea.vmem %s6548_s30, 4096 }
0x1174   : > { %s5214_s22 = sshll.u32 %s9747_s21, 11  ;;  %s9749_s16 = smov %s9748_s24 }
0x1175   : > { %s9404_s19 = scalar_lea.hbm %s9748_s24, %s5214_s22  ;;  %p6546_p6 = pneg %p6545_p1 }
0x1176   : > { %p6550_p12 = scmp.lt.s32.totalorder %s9407_s17, %s6548_s30  ;;  %p6551_p11 = scmp.lt.s32.totalorder %s6549_s28, %s6543_s29 }
0x1178   : > { %p6552_p2 = por %p6551_p11, %p6550_p12 }
0x117a   : > { %p6553_p8 = pnand %p6552_p2, %p6546_p6 }
0x117c   : > { %6556 = shalt.err (!%p6553_p8)
}
0x117d   : > { %s6557_s6 = scalar_lea.hbm %s9404_s19, 2048  ;;  %s6561_s18 = scalar_lea.hbm %s9749_s16, 4096 }
0x117e   : > { %p6558_p9 = scmp.ne.s32.totalorder %s9404_s19, %s6557_s6  ;;  %p6562_p3 = scmp.lt.u32.totalorder %s9404_s19, %s9749_s16 }
0x117f   : > { %p6563_p0 = scmp.lt.u32.totalorder %s6561_s18, %s6557_s6  ;;  %p6565_p13 = scmp.lt.u32.totalorder %s6557_s6, %s9404_s19 }
0x1180   : > { %p6559_p5 = pnand %p6558_p9, %p9750_p7 }
0x1181   : > { %p6564_p10 = por %p6563_p0, %p6562_p3 }
0x1182   : > { %p6560_p4 = pneg %p6559_p5 }
0x1183   : > { %p6566_p1 = por %p6565_p13, %p6564_p10 }
0x1185   : > { %p6567_p6 = pnand %p6566_p1, %p6560_p4 }
0x1187   : > { %6570 = shalt.err (!%p6567_p6)
}
0x1188   : > { %s6691_s13 = smov 128   ;;  %s6692_s23 = smov 8  }
0x1189   : > { %5821 = dma.vmem_to_hbm [thread:$0]  (%p9750_p7), %s9407_s17, 2048, %s9404_s19, %s4814_s14, %s6691_s13, %s6691_s13, %s6692_s23  }
0x118a PF: > { %s9751_s15 = sld [smem:[#allocation26_spill]]  ;;  %s9752_s10 = sld [smem:[#allocation19_spill]] }
0x118b   : > { %s9753_s5 = sld [smem:[#allocation33_spill]] }
0x1190   : > { %p5844_p12 = scmp.ge.s32.totalorder %s9751_s15, 2  ;;  %s4842_s0 = sand.u32 1, %s9752_s10  }
0x1191   : > { %p9754_p11 = scmp.ne.s32.totalorder %s9753_s5, 0  ;;  %s4843_s3 = scalar_lea.sflag [#allocation5], %s4842_s0 }
0x1193   : > { %p5840_p2 = pnand %p5844_p12, %p9754_p11 }
0x1195   : > { %6628 = dma.done.wait (!%p5840_p2), %s4843_s3, 2048  }
0x1196   : > { %6630 = vsyncadd (!%p5840_p2), %s4843_s3, 4294965248  ;;  %s37_s28 = sadd.s32 1, %s9751_s15   ;;  %s9755_s18 = sld [smem:[#allocation17_spill]] }
0x1197   : > { %p34_p8 = scmp.ge.s32.totalorder %s37_s28, 6   ;;  %s9756_s19 = sld [smem:[#allocation18_spill]] }
0x1198   : > { %s9757_s20 = sld [smem:[#allocation28_spill]]  ;;  %s9758_s21 = sld [smem:[#allocation20_spill]] }
0x1199   : > { %s9759_s22 = sld [smem:[#allocation21_spill]]  ;;  %s9760_s23 = sld [smem:[#allocation32_spill]] }
0x119a   : > { %s9761_s24 = sld [smem:[#allocation24_spill]]  ;;  %s9762_s25 = sld [smem:[#allocation25_spill]] }
0x119b   : > { %s9763_s26 = sld [smem:[#allocation27_spill]]  ;;  %s9764_s27 = sld [smem:[#allocation31_spill]] }
0x119c   :  { %36 = sbr.rel (!%p34_p8) target bundleno = 30 (0x1e), region = 205 }
0x11a3   :  { %4848 = vsyncpa [#allocation4], 1 }
0x11a4   :  { %4850 = vsyncpa [#allocation4 + $0x1], 1 }
0x11a5   :  { %4851 = vsyncpa [#allocation7], 1 }
0x11a6   :  { %4853 = vsyncpa [#allocation7 + $0x1], 1 }
0x11a7   :  { %4854 = vsyncpa [#allocation10], 1 }
0x11a8   :  { %4856 = vsyncpa [#allocation10 + $0x1], 1 }
0x11a9   :  { %4857 = vsyncpa [#allocation5], 1 }
0x11aa   :  { %4859 = vsyncpa [#allocation5 + $0x1], 1 }

</bundles_post_ra>
